<compile_context>
chip_gen: v7x
topology: tpu7x:2x2x1
jax: 0.10.0
libtpu: 0.0.40
codegen_flags: <defaults>
</compile_context>

<pallas_src>
import functools

import jax
import jax.numpy as jnp
from jax.experimental import pallas as pl
from jax.experimental.pallas import tpu as pltpu


def _round_up(x, m):
    return (x + m - 1) // m * m


def _lstm_kernel(x_ref,        # (T*Bp, Ip)  bf16  time-major, flattened
                 wih0_ref,     # (Ip, 4Hp)   bf16
                 whh0_ref,     # (Hp, 4Hp)   bf16
                 b0_ref,       # (1, 4Hp)    f32   (b_ih0 + b_hh0)
                 wih1_ref,     # (Hp, 4Hp)   bf16
                 whh1_ref,     # (Hp, 4Hp)   bf16
                 b1_ref,       # (1, 4Hp)    f32   (b_ih1 + b_hh1)
                 wfc_ref,      # (Hp, 128)   bf16  (col 0 = real fc weight)
                 bfc_ref,      # (1, 128)    f32   (col 0 = real fc bias)
                 out_ref,      # (Bp, 128)   f32   (col 0 = prediction)
                 gx_ref,       # VMEM scratch (T, Bp, 4Hp) f32
                 *, seq_len, batch_pad, hidden_pad):
    T, Bp, Hp = seq_len, batch_pad, hidden_pad

    # ---- Hoisted layer-0 input projection: one MXU matmul over all t ----
    gx = jnp.dot(x_ref[...], wih0_ref[...],
                 preferred_element_type=jnp.float32) + b0_ref[...]
    gx_ref[...] = gx.reshape(T, Bp, 4 * Hp)

    # Hoist the layer-1 bias broadcast out of the unrolled loop (JAX does not
    # CSE broadcast_in_dim; unroll=True would otherwise emit it T times).
    b1_b = jnp.broadcast_to(b1_ref[...], (Bp, 4 * Hp))

    def gates_to_hc(g, c_prev):
        # 128-lane-aligned gate slices (PyTorch order i, f, g, o).
        # Elementwise / transcendental math kept in f32 (v5e has no bf16 VPU/
        # EUP; c accumulates over T so f32 is required on every generation).
        i_g = jax.nn.sigmoid(g[:, 0 * Hp:1 * Hp])
        f_g = jax.nn.sigmoid(g[:, 1 * Hp:2 * Hp])
        g_g = jnp.tanh(g[:, 2 * Hp:3 * Hp])
        o_g = jax.nn.sigmoid(g[:, 3 * Hp:4 * Hp])
        c_new = f_g * c_prev + i_g * g_g
        h_new = o_g * jnp.tanh(c_new)
        return h_new, c_new

    def step(t, carry):
        h1, c1, h2, c2 = carry
        # Layer-1 recurrent partial: depends only on h2(t-1), NOT on h1(t),
        # so it sits off the serial chain and can overlap the layer-0 work.
        g1_part = jnp.dot(h2.astype(jnp.bfloat16), whh1_ref[...],
                          preferred_element_type=jnp.float32) + b1_b
        # Layer 0: x-path precomputed; only the recurrent matmul is in-loop.
        g0 = gx_ref[t] + jnp.dot(h1.astype(jnp.bfloat16), whh0_ref[...],
                                 preferred_element_type=jnp.float32)
        h1, c1 = gates_to_hc(g0, c1)
        # Layer 1: only the h1(t) @ Wih1 dot (K = Hp) stays on the serial
        # chain (previously a concatenate + K = 2*Hp fused matmul).
        g1 = g1_part + jnp.dot(h1.astype(jnp.bfloat16), wih1_ref[...],
                               preferred_element_type=jnp.float32)
        h2, c2 = gates_to_hc(g1, c2)
        return (h1, c1, h2, c2)

    z = jnp.zeros((Bp, Hp), jnp.float32)
    # unroll=True is right for short T; switch to unroll=4..8 (or a time-chunk
    # grid) for long sequences to keep live ranges within the 64-vreg file.
    _, _, h2, _ = jax.lax.fori_loop(0, T, step, (z, z, z, z), unroll=True)

    # Final Linear(hidden, 1): bf16 MXU matmul, padded to a lane-dense
    # (Bp, 128) store; the wrapper slices out column 0.
    out_ref[...] = (jnp.dot(h2.astype(jnp.bfloat16), wfc_ref[...],
                            preferred_element_type=jnp.float32) + bfc_ref[...])


def lstm_model_forward(x, params):
    """x: (B, T, I) float32.  Returns (B, 1) float32."""
    B, T, I = x.shape
    H = params["whh0"].shape[0]          # whh0 is stored (H, 4H)

    Bp = _round_up(B, 8)                 # sublane-pad the batch
    Ip = _round_up(I, 128)               # lane-pad features
    Hp = _round_up(H, 128)               # lane-pad hidden (per gate)

    f32, bf16 = jnp.float32, jnp.bfloat16

    def pad_gates(w, Kp):
        # (K, 4H) -> (Kp, 4Hp): zero-pad rows and each gate block separately
        K = w.shape[0]
        out = jnp.zeros((Kp, 4 * Hp), f32)
        for g in range(4):
            out = out.at[:K, g * Hp:g * Hp + H].set(w[:, g * H:(g + 1) * H])
        return out

    wih0_p = pad_gates(params["wih0"], Ip).astype(bf16)
    whh0_p = pad_gates(params["whh0"], Hp).astype(bf16)
    b0_p = pad_gates(params["b0"], 1)
    wih1_p = pad_gates(params["wih1"], Hp).astype(bf16)
    whh1_p = pad_gates(params["whh1"], Hp).astype(bf16)
    b1_p = pad_gates(params["b1"], 1)
    wfc_p = jnp.zeros((Hp, 128), f32).at[:H, :1].set(params["wfc"]).astype(bf16)
    bfc_p = jnp.zeros((1, 128), f32).at[:, :1].set(params["bfc"])

    # time-major, batch/feature zero-padded, flattened, bf16: (T*Bp, Ip)
    x_p = jnp.zeros((T, Bp, Ip), f32).at[:, :B, :I].set(
        jnp.transpose(x, (1, 0, 2))).reshape(T * Bp, Ip).astype(bf16)

    vmem = pl.BlockSpec(memory_space=pltpu.MemorySpace.VMEM)
    kernel = functools.partial(_lstm_kernel, seq_len=T, batch_pad=Bp,
                               hidden_pad=Hp)

    out_p = pl.pallas_call(
        kernel,
        out_shape=jax.ShapeDtypeStruct((Bp, 128), f32),
        in_specs=[vmem] * 9,
        out_specs=vmem,
        # f32 hoisted x-gates; store in bf16 on v7x for long T (64 MiB VMEM).
        scratch_shapes=[pltpu.VMEM((T, Bp, 4 * Hp), f32)],
    )(x_p, wih0_p, whh0_p, b0_p, wih1_p, whh1_p, b1_p, wfc_p, bfc_p)

    return out_p[:B, :1]


def _reference_forward(x, params):
    """Pure-JAX f32 reference of the same forward pass (sanity check)."""
    B, T, I = x.shape
    H = params["whh0"].shape[0]

    def cell(x_in, h, c, wih, whh, b):
        g = x_in @ wih + h @ whh + b
        i = jax.nn.sigmoid(g[:, 0 * H:1 * H])
        f = jax.nn.sigmoid(g[:, 1 * H:2 * H])
        gg = jnp.tanh(g[:, 2 * H:3 * H])
        o = jax.nn.sigmoid(g[:, 3 * H:4 * H])
        c = f * c + i * gg
        h = o * jnp.tanh(c)
        return h, c

    def step(carry, xt):
        h1, c1, h2, c2 = carry
        h1, c1 = cell(xt, h1, c1, params["wih0"], params["whh0"], params["b0"])
        h2, c2 = cell(h1, h2, c2, params["wih1"], params["whh1"], params["b1"])
        return (h1, c1, h2, c2), None

    z = jnp.zeros((B, H), jnp.float32)
    (h1, c1, h2, c2), _ = jax.lax.scan(step, (z, z, z, z),
                                       jnp.transpose(x, (1, 0, 2)))
    return h2 @ params["wfc"] + params["bfc"]


def init_params(key, input_size, hidden_size):
    """Deterministic init mimicking PyTorch's U(-1/sqrt(H), 1/sqrt(H))."""
    H, I = hidden_size, input_size
    bound = 1.0 / jnp.sqrt(jnp.float32(H))
    ks = jax.random.split(key, 11)
    u = lambda k, shape: jax.random.uniform(k, shape, jnp.float32, -bound, bound)
    return {
        # stored pre-transposed for (B, K) @ (K, 4H) matmuls; gate order i,f,g,o
        "wih0": u(ks[0], (I, 4 * H)),
        "whh0": u(ks[1], (H, 4 * H)),
        "b0":   u(ks[2], (1, 4 * H)) + u(ks[3], (1, 4 * H)),  # b_ih0 + b_hh0
        "wih1": u(ks[4], (H, 4 * H)),
        "whh1": u(ks[5], (H, 4 * H)),
        "b1":   u(ks[6], (1, 4 * H)) + u(ks[7], (1, 4 * H)),  # b_ih1 + b_hh1
        "wfc":  u(ks[8], (H, 1)),
        "bfc":  u(ks[9], (1, 1)),
    }


if __name__ == "__main__":
    B, T, I, H = 2, 8, 16, 32  # batch, seq, input_size, hidden_size

    key = jax.random.PRNGKey(0)
    k_x, k_p = jax.random.split(key)
    x = jax.random.normal(k_x, (B, T, I), jnp.float32)
    params = init_params(k_p, I, H)

    out = lstm_model_forward(x, params)
    out = jax.block_until_ready(out)

    ref = _reference_forward(x, params)
    assert out.shape == (B, 1)
    # kernel uses bf16 matmul inputs/x with f32 accumulation -> small tolerance
    assert jnp.allclose(out, ref, atol=2e-2, rtol=2e-2), (out, ref)

    print("KERNEL_OK")
</pallas_src>

<mosaic_0001>
module attributes {stable_mosaic.version = 11 : i64} {
  func.func @_lstm_kernel(%arg0: memref<64x128xbf16, #tpu.memory_space<vmem>>, %arg1: memref<128x512xbf16, #tpu.memory_space<vmem>>, %arg2: memref<128x512xbf16, #tpu.memory_space<vmem>>, %arg3: memref<1x512xf32, #tpu.memory_space<vmem>>, %arg4: memref<128x512xbf16, #tpu.memory_space<vmem>>, %arg5: memref<128x512xbf16, #tpu.memory_space<vmem>>, %arg6: memref<1x512xf32, #tpu.memory_space<vmem>>, %arg7: memref<128x128xbf16, #tpu.memory_space<vmem>>, %arg8: memref<1x128xf32, #tpu.memory_space<vmem>>, %arg9: memref<8x128xf32, #tpu.memory_space<vmem>>, %arg10: memref<8x8x512xf32, #tpu.memory_space<vmem>>) attributes {dimension_semantics = [], scalar_prefetch = 0 : i64, scratch_operands = 1 : i64, tpu.core_type = #tpu.core_type<tc>} {
    %c0 = arith.constant 0 : index
    %c0_0 = arith.constant 0 : index
    %0 = vector.load %arg0[%c0, %c0_0] : memref<64x128xbf16, #tpu.memory_space<vmem>>, vector<64x128xbf16>
    %c0_1 = arith.constant 0 : index
    %c0_2 = arith.constant 0 : index
    %1 = vector.load %arg1[%c0_1, %c0_2] : memref<128x512xbf16, #tpu.memory_space<vmem>>, vector<128x512xbf16>
    %cst = arith.constant dense<0.000000e+00> : vector<64x512xf32>
    %2 = tpu.matmul %0, %1, %cst {dimension_numbers = #tpu.dot_dimension_numbers<[1], [0], [0], [1], [0, 0, 1, 1], [], []>} : vector<64x128xbf16>, vector<128x512xbf16>, vector<64x512xf32> -> vector<64x512xf32>
    %c0_3 = arith.constant 0 : index
    %c0_4 = arith.constant 0 : index
    %3 = vector.load %arg3[%c0_3, %c0_4] : memref<1x512xf32, #tpu.memory_space<vmem>>, vector<1x512xf32>
    %4 = vector.broadcast %3 : vector<1x512xf32> to vector<64x512xf32>
    %5 = arith.addf %2, %4 : vector<64x512xf32>
    %6 = vector.shape_cast %5 : vector<64x512xf32> to vector<8x8x512xf32>
    %c0_5 = arith.constant 0 : index
    %c0_6 = arith.constant 0 : index
    %c0_7 = arith.constant 0 : index
    %7 = vector.load %arg10[%c0_5, %c0_6, %c0_7] : memref<8x8x512xf32, #tpu.memory_space<vmem>>, vector<8x8x512xf32>
    tpu.vector_store %arg10[%c0_5, %c0_6, %c0_7], %6 {strides = array<i32>} : memref<8x8x512xf32, #tpu.memory_space<vmem>>, vector<8x8x512xf32>,
    %c0_8 = arith.constant 0 : index
    %c0_9 = arith.constant 0 : index
    %8 = vector.load %arg6[%c0_8, %c0_9] : memref<1x512xf32, #tpu.memory_space<vmem>>, vector<1x512xf32>
    %9 = vector.shape_cast %8 : vector<1x512xf32> to vector<1x512xf32>
    %10 = vector.broadcast %9 : vector<1x512xf32> to vector<8x512xf32>
    %cst_10 = arith.constant 0.000000e+00 : f32
    %11 = vector.broadcast %cst_10 : f32 to vector<8x128xf32>
    %c0_i32 = arith.constant 0 : i32
    %12 = arith.truncf %11 : vector<8x128xf32> to vector<8x128xbf16>
    %c0_11 = arith.constant 0 : index
    %c0_12 = arith.constant 0 : index
    %13 = vector.load %arg5[%c0_11, %c0_12] : memref<128x512xbf16, #tpu.memory_space<vmem>>, vector<128x512xbf16>
    %cst_13 = arith.constant dense<0.000000e+00> : vector<8x512xf32>
    %14 = tpu.matmul %12, %13, %cst_13 {dimension_numbers = #tpu.dot_dimension_numbers<[1], [0], [0], [1], [0, 0, 1, 1], [], []>} : vector<8x128xbf16>, vector<128x512xbf16>, vector<8x512xf32> -> vector<8x512xf32>
    %15 = arith.addf %14, %10 : vector<8x512xf32>
    %16 = arith.index_cast %c0_i32 : i32 to index
    %c0_14 = arith.constant 0 : index
    %c0_15 = arith.constant 0 : index
    %17 = vector.load %arg10[%16, %c0_14, %c0_15] : memref<8x8x512xf32, #tpu.memory_space<vmem>>, vector<1x8x512xf32>
    %18 = vector.shape_cast %17 : vector<1x8x512xf32> to vector<8x512xf32>
    %19 = arith.truncf %11 : vector<8x128xf32> to vector<8x128xbf16>
    %c0_16 = arith.constant 0 : index
    %c0_17 = arith.constant 0 : index
    %20 = vector.load %arg2[%c0_16, %c0_17] : memref<128x512xbf16, #tpu.memory_space<vmem>>, vector<128x512xbf16>
    %cst_18 = arith.constant dense<0.000000e+00> : vector<8x512xf32>
    %21 = tpu.matmul %19, %20, %cst_18 {dimension_numbers = #tpu.dot_dimension_numbers<[1], [0], [0], [1], [0, 0, 1, 1], [], []>} : vector<8x128xbf16>, vector<128x512xbf16>, vector<8x512xf32> -> vector<8x512xf32>
    %22 = arith.addf %18, %21 : vector<8x512xf32>
    %23 = vector.extract_strided_slice %22 {offsets = [0, 0], sizes = [8, 128], strides = [1, 1]} : vector<8x512xf32> to vector<8x128xf32>
    %24 = arith.negf %23 : vector<8x128xf32>
    %25 = math.exp %24 : vector<8x128xf32>
    %cst_19 = arith.constant 1.000000e+00 : f32
    %26 = vector.broadcast %cst_19 : f32 to vector<8x128xf32>
    %27 = arith.addf %26, %25 : vector<8x128xf32>
    %28 = arith.divf %26, %27 : vector<8x128xf32>
    %29 = vector.extract_strided_slice %22 {offsets = [0, 128], sizes = [8, 128], strides = [1, 1]} : vector<8x512xf32> to vector<8x128xf32>
    %30 = arith.negf %29 : vector<8x128xf32>
    %31 = math.exp %30 : vector<8x128xf32>
    %cst_20 = arith.constant 1.000000e+00 : f32
    %32 = vector.broadcast %cst_20 : f32 to vector<8x128xf32>
    %33 = arith.addf %32, %31 : vector<8x128xf32>
    %34 = arith.divf %32, %33 : vector<8x128xf32>
    %35 = vector.extract_strided_slice %22 {offsets = [0, 256], sizes = [8, 128], strides = [1, 1]} : vector<8x512xf32> to vector<8x128xf32>
    %36 = math.tanh %35 : vector<8x128xf32>
    %37 = vector.extract_strided_slice %22 {offsets = [0, 384], sizes = [8, 128], strides = [1, 1]} : vector<8x512xf32> to vector<8x128xf32>
    %38 = arith.negf %37 : vector<8x128xf32>
    %39 = math.exp %38 : vector<8x128xf32>
    %cst_21 = arith.constant 1.000000e+00 : f32
    %40 = vector.broadcast %cst_21 : f32 to vector<8x128xf32>
    %41 = arith.addf %40, %39 : vector<8x128xf32>
    %42 = arith.divf %40, %41 : vector<8x128xf32>
    %43 = arith.mulf %34, %11 : vector<8x128xf32>
    %44 = arith.mulf %28, %36 : vector<8x128xf32>
    %45 = arith.addf %43, %44 : vector<8x128xf32>
    %46 = math.tanh %45 : vector<8x128xf32>
    %47 = arith.mulf %42, %46 : vector<8x128xf32>
    %48 = arith.truncf %47 : vector<8x128xf32> to vector<8x128xbf16>
    %c0_22 = arith.constant 0 : index
    %c0_23 = arith.constant 0 : index
    %49 = vector.load %arg4[%c0_22, %c0_23] : memref<128x512xbf16, #tpu.memory_space<vmem>>, vector<128x512xbf16>
    %cst_24 = arith.constant dense<0.000000e+00> : vector<8x512xf32>
    %50 = tpu.matmul %48, %49, %cst_24 {dimension_numbers = #tpu.dot_dimension_numbers<[1], [0], [0], [1], [0, 0, 1, 1], [], []>} : vector<8x128xbf16>, vector<128x512xbf16>, vector<8x512xf32> -> vector<8x512xf32>
    %51 = arith.addf %15, %50 : vector<8x512xf32>
    %52 = vector.extract_strided_slice %51 {offsets = [0, 0], sizes = [8, 128], strides = [1, 1]} : vector<8x512xf32> to vector<8x128xf32>
    %53 = arith.negf %52 : vector<8x128xf32>
    %54 = math.exp %53 : vector<8x128xf32>
    %cst_25 = arith.constant 1.000000e+00 : f32
    %55 = vector.broadcast %cst_25 : f32 to vector<8x128xf32>
    %56 = arith.addf %55, %54 : vector<8x128xf32>
    %57 = arith.divf %55, %56 : vector<8x128xf32>
    %58 = vector.extract_strided_slice %51 {offsets = [0, 128], sizes = [8, 128], strides = [1, 1]} : vector<8x512xf32> to vector<8x128xf32>
    %59 = arith.negf %58 : vector<8x128xf32>
    %60 = math.exp %59 : vector<8x128xf32>
    %cst_26 = arith.constant 1.000000e+00 : f32
    %61 = vector.broadcast %cst_26 : f32 to vector<8x128xf32>
    %62 = arith.addf %61, %60 : vector<8x128xf32>
    %63 = arith.divf %61, %62 : vector<8x128xf32>
    %64 = vector.extract_strided_slice %51 {offsets = [0, 256], sizes = [8, 128], strides = [1, 1]} : vector<8x512xf32> to vector<8x128xf32>
    %65 = math.tanh %64 : vector<8x128xf32>
    %66 = vector.extract_strided_slice %51 {offsets = [0, 384], sizes = [8, 128], strides = [1, 1]} : vector<8x512xf32> to vector<8x128xf32>
    %67 = arith.negf %66 : vector<8x128xf32>
    %68 = math.exp %67 : vector<8x128xf32>
    %cst_27 = arith.constant 1.000000e+00 : f32
    %69 = vector.broadcast %cst_27 : f32 to vector<8x128xf32>
    %70 = arith.addf %69, %68 : vector<8x128xf32>
    %71 = arith.divf %69, %70 : vector<8x128xf32>
    %72 = arith.mulf %63, %11 : vector<8x128xf32>
    %73 = arith.mulf %57, %65 : vector<8x128xf32>
    %74 = arith.addf %72, %73 : vector<8x128xf32>
    %75 = math.tanh %74 : vector<8x128xf32>
    %76 = arith.mulf %71, %75 : vector<8x128xf32>
    %c1_i32 = arith.constant 1 : i32
    %77 = arith.truncf %76 : vector<8x128xf32> to vector<8x128xbf16>
    %c0_28 = arith.constant 0 : index
    %c0_29 = arith.constant 0 : index
    %78 = vector.load %arg5[%c0_28, %c0_29] : memref<128x512xbf16, #tpu.memory_space<vmem>>, vector<128x512xbf16>
    %cst_30 = arith.constant dense<0.000000e+00> : vector<8x512xf32>
    %79 = tpu.matmul %77, %78, %cst_30 {dimension_numbers = #tpu.dot_dimension_numbers<[1], [0], [0], [1], [0, 0, 1, 1], [], []>} : vector<8x128xbf16>, vector<128x512xbf16>, vector<8x512xf32> -> vector<8x512xf32>
    %80 = arith.addf %79, %10 : vector<8x512xf32>
    %81 = arith.index_cast %c1_i32 : i32 to index
    %c0_31 = arith.constant 0 : index
    %c0_32 = arith.constant 0 : index
    %82 = vector.load %arg10[%81, %c0_31, %c0_32] : memref<8x8x512xf32, #tpu.memory_space<vmem>>, vector<1x8x512xf32>
    %83 = vector.shape_cast %82 : vector<1x8x512xf32> to vector<8x512xf32>
    %84 = arith.truncf %47 : vector<8x128xf32> to vector<8x128xbf16>
    %c0_33 = arith.constant 0 : index
    %c0_34 = arith.constant 0 : index
    %85 = vector.load %arg2[%c0_33, %c0_34] : memref<128x512xbf16, #tpu.memory_space<vmem>>, vector<128x512xbf16>
    %cst_35 = arith.constant dense<0.000000e+00> : vector<8x512xf32>
    %86 = tpu.matmul %84, %85, %cst_35 {dimension_numbers = #tpu.dot_dimension_numbers<[1], [0], [0], [1], [0, 0, 1, 1], [], []>} : vector<8x128xbf16>, vector<128x512xbf16>, vector<8x512xf32> -> vector<8x512xf32>
    %87 = arith.addf %83, %86 : vector<8x512xf32>
    %88 = vector.extract_strided_slice %87 {offsets = [0, 0], sizes = [8, 128], strides = [1, 1]} : vector<8x512xf32> to vector<8x128xf32>
    %89 = arith.negf %88 : vector<8x128xf32>
    %90 = math.exp %89 : vector<8x128xf32>
    %cst_36 = arith.constant 1.000000e+00 : f32
    %91 = vector.broadcast %cst_36 : f32 to vector<8x128xf32>
    %92 = arith.addf %91, %90 : vector<8x128xf32>
    %93 = arith.divf %91, %92 : vector<8x128xf32>
    %94 = vector.extract_strided_slice %87 {offsets = [0, 128], sizes = [8, 128], strides = [1, 1]} : vector<8x512xf32> to vector<8x128xf32>
    %95 = arith.negf %94 : vector<8x128xf32>
    %96 = math.exp %95 : vector<8x128xf32>
    %cst_37 = arith.constant 1.000000e+00 : f32
    %97 = vector.broadcast %cst_37 : f32 to vector<8x128xf32>
    %98 = arith.addf %97, %96 : vector<8x128xf32>
    %99 = arith.divf %97, %98 : vector<8x128xf32>
    %100 = vector.extract_strided_slice %87 {offsets = [0, 256], sizes = [8, 128], strides = [1, 1]} : vector<8x512xf32> to vector<8x128xf32>
    %101 = math.tanh %100 : vector<8x128xf32>
    %102 = vector.extract_strided_slice %87 {offsets = [0, 384], sizes = [8, 128], strides = [1, 1]} : vector<8x512xf32> to vector<8x128xf32>
    %103 = arith.negf %102 : vector<8x128xf32>
    %104 = math.exp %103 : vector<8x128xf32>
    %cst_38 = arith.constant 1.000000e+00 : f32
    %105 = vector.broadcast %cst_38 : f32 to vector<8x128xf32>
    %106 = arith.addf %105, %104 : vector<8x128xf32>
    %107 = arith.divf %105, %106 : vector<8x128xf32>
    %108 = arith.mulf %99, %45 : vector<8x128xf32>
    %109 = arith.mulf %93, %101 : vector<8x128xf32>
    %110 = arith.addf %108, %109 : vector<8x128xf32>
    %111 = math.tanh %110 : vector<8x128xf32>
    %112 = arith.mulf %107, %111 : vector<8x128xf32>
    %113 = arith.truncf %112 : vector<8x128xf32> to vector<8x128xbf16>
    %c0_39 = arith.constant 0 : index
    %c0_40 = arith.constant 0 : index
    %114 = vector.load %arg4[%c0_39, %c0_40] : memref<128x512xbf16, #tpu.memory_space<vmem>>, vector<128x512xbf16>
    %cst_41 = arith.constant dense<0.000000e+00> : vector<8x512xf32>
    %115 = tpu.matmul %113, %114, %cst_41 {dimension_numbers = #tpu.dot_dimension_numbers<[1], [0], [0], [1], [0, 0, 1, 1], [], []>} : vector<8x128xbf16>, vector<128x512xbf16>, vector<8x512xf32> -> vector<8x512xf32>
    %116 = arith.addf %80, %115 : vector<8x512xf32>
    %117 = vector.extract_strided_slice %116 {offsets = [0, 0], sizes = [8, 128], strides = [1, 1]} : vector<8x512xf32> to vector<8x128xf32>
    %118 = arith.negf %117 : vector<8x128xf32>
    %119 = math.exp %118 : vector<8x128xf32>
    %cst_42 = arith.constant 1.000000e+00 : f32
    %120 = vector.broadcast %cst_42 : f32 to vector<8x128xf32>
    %121 = arith.addf %120, %119 : vector<8x128xf32>
    %122 = arith.divf %120, %121 : vector<8x128xf32>
    %123 = vector.extract_strided_slice %116 {offsets = [0, 128], sizes = [8, 128], strides = [1, 1]} : vector<8x512xf32> to vector<8x128xf32>
    %124 = arith.negf %123 : vector<8x128xf32>
    %125 = math.exp %124 : vector<8x128xf32>
    %cst_43 = arith.constant 1.000000e+00 : f32
    %126 = vector.broadcast %cst_43 : f32 to vector<8x128xf32>
    %127 = arith.addf %126, %125 : vector<8x128xf32>
    %128 = arith.divf %126, %127 : vector<8x128xf32>
    %129 = vector.extract_strided_slice %116 {offsets = [0, 256], sizes = [8, 128], strides = [1, 1]} : vector<8x512xf32> to vector<8x128xf32>
    %130 = math.tanh %129 : vector<8x128xf32>
    %131 = vector.extract_strided_slice %116 {offsets = [0, 384], sizes = [8, 128], strides = [1, 1]} : vector<8x512xf32> to vector<8x128xf32>
    %132 = arith.negf %131 : vector<8x128xf32>
    %133 = math.exp %132 : vector<8x128xf32>
    %cst_44 = arith.constant 1.000000e+00 : f32
    %134 = vector.broadcast %cst_44 : f32 to vector<8x128xf32>
    %135 = arith.addf %134, %133 : vector<8x128xf32>
    %136 = arith.divf %134, %135 : vector<8x128xf32>
    %137 = arith.mulf %128, %74 : vector<8x128xf32>
    %138 = arith.mulf %122, %130 : vector<8x128xf32>
    %139 = arith.addf %137, %138 : vector<8x128xf32>
    %140 = math.tanh %139 : vector<8x128xf32>
    %141 = arith.mulf %136, %140 : vector<8x128xf32>
    %c2_i32 = arith.constant 2 : i32
    %142 = arith.truncf %141 : vector<8x128xf32> to vector<8x128xbf16>
    %c0_45 = arith.constant 0 : index
    %c0_46 = arith.constant 0 : index
    %143 = vector.load %arg5[%c0_45, %c0_46] : memref<128x512xbf16, #tpu.memory_space<vmem>>, vector<128x512xbf16>
    %cst_47 = arith.constant dense<0.000000e+00> : vector<8x512xf32>
    %144 = tpu.matmul %142, %143, %cst_47 {dimension_numbers = #tpu.dot_dimension_numbers<[1], [0], [0], [1], [0, 0, 1, 1], [], []>} : vector<8x128xbf16>, vector<128x512xbf16>, vector<8x512xf32> -> vector<8x512xf32>
    %145 = arith.addf %144, %10 : vector<8x512xf32>
    %146 = arith.index_cast %c2_i32 : i32 to index
    %c0_48 = arith.constant 0 : index
    %c0_49 = arith.constant 0 : index
    %147 = vector.load %arg10[%146, %c0_48, %c0_49] : memref<8x8x512xf32, #tpu.memory_space<vmem>>, vector<1x8x512xf32>
    %148 = vector.shape_cast %147 : vector<1x8x512xf32> to vector<8x512xf32>
    %149 = arith.truncf %112 : vector<8x128xf32> to vector<8x128xbf16>
    %c0_50 = arith.constant 0 : index
    %c0_51 = arith.constant 0 : index
    %150 = vector.load %arg2[%c0_50, %c0_51] : memref<128x512xbf16, #tpu.memory_space<vmem>>, vector<128x512xbf16>
    %cst_52 = arith.constant dense<0.000000e+00> : vector<8x512xf32>
    %151 = tpu.matmul %149, %150, %cst_52 {dimension_numbers = #tpu.dot_dimension_numbers<[1], [0], [0], [1], [0, 0, 1, 1], [], []>} : vector<8x128xbf16>, vector<128x512xbf16>, vector<8x512xf32> -> vector<8x512xf32>
    %152 = arith.addf %148, %151 : vector<8x512xf32>
    %153 = vector.extract_strided_slice %152 {offsets = [0, 0], sizes = [8, 128], strides = [1, 1]} : vector<8x512xf32> to vector<8x128xf32>
    %154 = arith.negf %153 : vector<8x128xf32>
    %155 = math.exp %154 : vector<8x128xf32>
    %cst_53 = arith.constant 1.000000e+00 : f32
    %156 = vector.broadcast %cst_53 : f32 to vector<8x128xf32>
    %157 = arith.addf %156, %155 : vector<8x128xf32>
    %158 = arith.divf %156, %157 : vector<8x128xf32>
    %159 = vector.extract_strided_slice %152 {offsets = [0, 128], sizes = [8, 128], strides = [1, 1]} : vector<8x512xf32> to vector<8x128xf32>
    %160 = arith.negf %159 : vector<8x128xf32>
    %161 = math.exp %160 : vector<8x128xf32>
    %cst_54 = arith.constant 1.000000e+00 : f32
    %162 = vector.broadcast %cst_54 : f32 to vector<8x128xf32>
    %163 = arith.addf %162, %161 : vector<8x128xf32>
    %164 = arith.divf %162, %163 : vector<8x128xf32>
    %165 = vector.extract_strided_slice %152 {offsets = [0, 256], sizes = [8, 128], strides = [1, 1]} : vector<8x512xf32> to vector<8x128xf32>
    %166 = math.tanh %165 : vector<8x128xf32>
    %167 = vector.extract_strided_slice %152 {offsets = [0, 384], sizes = [8, 128], strides = [1, 1]} : vector<8x512xf32> to vector<8x128xf32>
    %168 = arith.negf %167 : vector<8x128xf32>
    %169 = math.exp %168 : vector<8x128xf32>
    %cst_55 = arith.constant 1.000000e+00 : f32
    %170 = vector.broadcast %cst_55 : f32 to vector<8x128xf32>
    %171 = arith.addf %170, %169 : vector<8x128xf32>
    %172 = arith.divf %170, %171 : vector<8x128xf32>
    %173 = arith.mulf %164, %110 : vector<8x128xf32>
    %174 = arith.mulf %158, %166 : vector<8x128xf32>
    %175 = arith.addf %173, %174 : vector<8x128xf32>
    %176 = math.tanh %175 : vector<8x128xf32>
    %177 = arith.mulf %172, %176 : vector<8x128xf32>
    %178 = arith.truncf %177 : vector<8x128xf32> to vector<8x128xbf16>
    %c0_56 = arith.constant 0 : index
    %c0_57 = arith.constant 0 : index
    %179 = vector.load %arg4[%c0_56, %c0_57] : memref<128x512xbf16, #tpu.memory_space<vmem>>, vector<128x512xbf16>
    %cst_58 = arith.constant dense<0.000000e+00> : vector<8x512xf32>
    %180 = tpu.matmul %178, %179, %cst_58 {dimension_numbers = #tpu.dot_dimension_numbers<[1], [0], [0], [1], [0, 0, 1, 1], [], []>} : vector<8x128xbf16>, vector<128x512xbf16>, vector<8x512xf32> -> vector<8x512xf32>
    %181 = arith.addf %145, %180 : vector<8x512xf32>
    %182 = vector.extract_strided_slice %181 {offsets = [0, 0], sizes = [8, 128], strides = [1, 1]} : vector<8x512xf32> to vector<8x128xf32>
    %183 = arith.negf %182 : vector<8x128xf32>
    %184 = math.exp %183 : vector<8x128xf32>
    %cst_59 = arith.constant 1.000000e+00 : f32
    %185 = vector.broadcast %cst_59 : f32 to vector<8x128xf32>
    %186 = arith.addf %185, %184 : vector<8x128xf32>
    %187 = arith.divf %185, %186 : vector<8x128xf32>
    %188 = vector.extract_strided_slice %181 {offsets = [0, 128], sizes = [8, 128], strides = [1, 1]} : vector<8x512xf32> to vector<8x128xf32>
    %189 = arith.negf %188 : vector<8x128xf32>
    %190 = math.exp %189 : vector<8x128xf32>
    %cst_60 = arith.constant 1.000000e+00 : f32
    %191 = vector.broadcast %cst_60 : f32 to vector<8x128xf32>
    %192 = arith.addf %191, %190 : vector<8x128xf32>
    %193 = arith.divf %191, %192 : vector<8x128xf32>
    %194 = vector.extract_strided_slice %181 {offsets = [0, 256], sizes = [8, 128], strides = [1, 1]} : vector<8x512xf32> to vector<8x128xf32>
    %195 = math.tanh %194 : vector<8x128xf32>
    %196 = vector.extract_strided_slice %181 {offsets = [0, 384], sizes = [8, 128], strides = [1, 1]} : vector<8x512xf32> to vector<8x128xf32>
    %197 = arith.negf %196 : vector<8x128xf32>
    %198 = math.exp %197 : vector<8x128xf32>
    %cst_61 = arith.constant 1.000000e+00 : f32
    %199 = vector.broadcast %cst_61 : f32 to vector<8x128xf32>
    %200 = arith.addf %199, %198 : vector<8x128xf32>
    %201 = arith.divf %199, %200 : vector<8x128xf32>
    %202 = arith.mulf %193, %139 : vector<8x128xf32>
    %203 = arith.mulf %187, %195 : vector<8x128xf32>
    %204 = arith.addf %202, %203 : vector<8x128xf32>
    %205 = math.tanh %204 : vector<8x128xf32>
    %206 = arith.mulf %201, %205 : vector<8x128xf32>
    %c3_i32 = arith.constant 3 : i32
    %207 = arith.truncf %206 : vector<8x128xf32> to vector<8x128xbf16>
    %c0_62 = arith.constant 0 : index
    %c0_63 = arith.constant 0 : index
    %208 = vector.load %arg5[%c0_62, %c0_63] : memref<128x512xbf16, #tpu.memory_space<vmem>>, vector<128x512xbf16>
    %cst_64 = arith.constant dense<0.000000e+00> : vector<8x512xf32>
    %209 = tpu.matmul %207, %208, %cst_64 {dimension_numbers = #tpu.dot_dimension_numbers<[1], [0], [0], [1], [0, 0, 1, 1], [], []>} : vector<8x128xbf16>, vector<128x512xbf16>, vector<8x512xf32> -> vector<8x512xf32>
    %210 = arith.addf %209, %10 : vector<8x512xf32>
    %211 = arith.index_cast %c3_i32 : i32 to index
    %c0_65 = arith.constant 0 : index
    %c0_66 = arith.constant 0 : index
    %212 = vector.load %arg10[%211, %c0_65, %c0_66] : memref<8x8x512xf32, #tpu.memory_space<vmem>>, vector<1x8x512xf32>
    %213 = vector.shape_cast %212 : vector<1x8x512xf32> to vector<8x512xf32>
    %214 = arith.truncf %177 : vector<8x128xf32> to vector<8x128xbf16>
    %c0_67 = arith.constant 0 : index
    %c0_68 = arith.constant 0 : index
    %215 = vector.load %arg2[%c0_67, %c0_68] : memref<128x512xbf16, #tpu.memory_space<vmem>>, vector<128x512xbf16>
    %cst_69 = arith.constant dense<0.000000e+00> : vector<8x512xf32>
    %216 = tpu.matmul %214, %215, %cst_69 {dimension_numbers = #tpu.dot_dimension_numbers<[1], [0], [0], [1], [0, 0, 1, 1], [], []>} : vector<8x128xbf16>, vector<128x512xbf16>, vector<8x512xf32> -> vector<8x512xf32>
    %217 = arith.addf %213, %216 : vector<8x512xf32>
    %218 = vector.extract_strided_slice %217 {offsets = [0, 0], sizes = [8, 128], strides = [1, 1]} : vector<8x512xf32> to vector<8x128xf32>
    %219 = arith.negf %218 : vector<8x128xf32>
    %220 = math.exp %219 : vector<8x128xf32>
    %cst_70 = arith.constant 1.000000e+00 : f32
    %221 = vector.broadcast %cst_70 : f32 to vector<8x128xf32>
    %222 = arith.addf %221, %220 : vector<8x128xf32>
    %223 = arith.divf %221, %222 : vector<8x128xf32>
    %224 = vector.extract_strided_slice %217 {offsets = [0, 128], sizes = [8, 128], strides = [1, 1]} : vector<8x512xf32> to vector<8x128xf32>
    %225 = arith.negf %224 : vector<8x128xf32>
    %226 = math.exp %225 : vector<8x128xf32>
    %cst_71 = arith.constant 1.000000e+00 : f32
    %227 = vector.broadcast %cst_71 : f32 to vector<8x128xf32>
    %228 = arith.addf %227, %226 : vector<8x128xf32>
    %229 = arith.divf %227, %228 : vector<8x128xf32>
    %230 = vector.extract_strided_slice %217 {offsets = [0, 256], sizes = [8, 128], strides = [1, 1]} : vector<8x512xf32> to vector<8x128xf32>
    %231 = math.tanh %230 : vector<8x128xf32>
    %232 = vector.extract_strided_slice %217 {offsets = [0, 384], sizes = [8, 128], strides = [1, 1]} : vector<8x512xf32> to vector<8x128xf32>
    %233 = arith.negf %232 : vector<8x128xf32>
    %234 = math.exp %233 : vector<8x128xf32>
    %cst_72 = arith.constant 1.000000e+00 : f32
    %235 = vector.broadcast %cst_72 : f32 to vector<8x128xf32>
    %236 = arith.addf %235, %234 : vector<8x128xf32>
    %237 = arith.divf %235, %236 : vector<8x128xf32>
    %238 = arith.mulf %229, %175 : vector<8x128xf32>
    %239 = arith.mulf %223, %231 : vector<8x128xf32>
    %240 = arith.addf %238, %239 : vector<8x128xf32>
    %241 = math.tanh %240 : vector<8x128xf32>
    %242 = arith.mulf %237, %241 : vector<8x128xf32>
    %243 = arith.truncf %242 : vector<8x128xf32> to vector<8x128xbf16>
    %c0_73 = arith.constant 0 : index
    %c0_74 = arith.constant 0 : index
    %244 = vector.load %arg4[%c0_73, %c0_74] : memref<128x512xbf16, #tpu.memory_space<vmem>>, vector<128x512xbf16>
    %cst_75 = arith.constant dense<0.000000e+00> : vector<8x512xf32>
    %245 = tpu.matmul %243, %244, %cst_75 {dimension_numbers = #tpu.dot_dimension_numbers<[1], [0], [0], [1], [0, 0, 1, 1], [], []>} : vector<8x128xbf16>, vector<128x512xbf16>, vector<8x512xf32> -> vector<8x512xf32>
    %246 = arith.addf %210, %245 : vector<8x512xf32>
    %247 = vector.extract_strided_slice %246 {offsets = [0, 0], sizes = [8, 128], strides = [1, 1]} : vector<8x512xf32> to vector<8x128xf32>
    %248 = arith.negf %247 : vector<8x128xf32>
    %249 = math.exp %248 : vector<8x128xf32>
    %cst_76 = arith.constant 1.000000e+00 : f32
    %250 = vector.broadcast %cst_76 : f32 to vector<8x128xf32>
    %251 = arith.addf %250, %249 : vector<8x128xf32>
    %252 = arith.divf %250, %251 : vector<8x128xf32>
    %253 = vector.extract_strided_slice %246 {offsets = [0, 128], sizes = [8, 128], strides = [1, 1]} : vector<8x512xf32> to vector<8x128xf32>
    %254 = arith.negf %253 : vector<8x128xf32>
    %255 = math.exp %254 : vector<8x128xf32>
    %cst_77 = arith.constant 1.000000e+00 : f32
    %256 = vector.broadcast %cst_77 : f32 to vector<8x128xf32>
    %257 = arith.addf %256, %255 : vector<8x128xf32>
    %258 = arith.divf %256, %257 : vector<8x128xf32>
    %259 = vector.extract_strided_slice %246 {offsets = [0, 256], sizes = [8, 128], strides = [1, 1]} : vector<8x512xf32> to vector<8x128xf32>
    %260 = math.tanh %259 : vector<8x128xf32>
    %261 = vector.extract_strided_slice %246 {offsets = [0, 384], sizes = [8, 128], strides = [1, 1]} : vector<8x512xf32> to vector<8x128xf32>
    %262 = arith.negf %261 : vector<8x128xf32>
    %263 = math.exp %262 : vector<8x128xf32>
    %cst_78 = arith.constant 1.000000e+00 : f32
    %264 = vector.broadcast %cst_78 : f32 to vector<8x128xf32>
    %265 = arith.addf %264, %263 : vector<8x128xf32>
    %266 = arith.divf %264, %265 : vector<8x128xf32>
    %267 = arith.mulf %258, %204 : vector<8x128xf32>
    %268 = arith.mulf %252, %260 : vector<8x128xf32>
    %269 = arith.addf %267, %268 : vector<8x128xf32>
    %270 = math.tanh %269 : vector<8x128xf32>
    %271 = arith.mulf %266, %270 : vector<8x128xf32>
    %c4_i32 = arith.constant 4 : i32
    %272 = arith.truncf %271 : vector<8x128xf32> to vector<8x128xbf16>
    %c0_79 = arith.constant 0 : index
    %c0_80 = arith.constant 0 : index
    %273 = vector.load %arg5[%c0_79, %c0_80] : memref<128x512xbf16, #tpu.memory_space<vmem>>, vector<128x512xbf16>
    %cst_81 = arith.constant dense<0.000000e+00> : vector<8x512xf32>
    %274 = tpu.matmul %272, %273, %cst_81 {dimension_numbers = #tpu.dot_dimension_numbers<[1], [0], [0], [1], [0, 0, 1, 1], [], []>} : vector<8x128xbf16>, vector<128x512xbf16>, vector<8x512xf32> -> vector<8x512xf32>
    %275 = arith.addf %274, %10 : vector<8x512xf32>
    %276 = arith.index_cast %c4_i32 : i32 to index
    %c0_82 = arith.constant 0 : index
    %c0_83 = arith.constant 0 : index
    %277 = vector.load %arg10[%276, %c0_82, %c0_83] : memref<8x8x512xf32, #tpu.memory_space<vmem>>, vector<1x8x512xf32>
    %278 = vector.shape_cast %277 : vector<1x8x512xf32> to vector<8x512xf32>
    %279 = arith.truncf %242 : vector<8x128xf32> to vector<8x128xbf16>
    %c0_84 = arith.constant 0 : index
    %c0_85 = arith.constant 0 : index
    %280 = vector.load %arg2[%c0_84, %c0_85] : memref<128x512xbf16, #tpu.memory_space<vmem>>, vector<128x512xbf16>
    %cst_86 = arith.constant dense<0.000000e+00> : vector<8x512xf32>
    %281 = tpu.matmul %279, %280, %cst_86 {dimension_numbers = #tpu.dot_dimension_numbers<[1], [0], [0], [1], [0, 0, 1, 1], [], []>} : vector<8x128xbf16>, vector<128x512xbf16>, vector<8x512xf32> -> vector<8x512xf32>
    %282 = arith.addf %278, %281 : vector<8x512xf32>
    %283 = vector.extract_strided_slice %282 {offsets = [0, 0], sizes = [8, 128], strides = [1, 1]} : vector<8x512xf32> to vector<8x128xf32>
    %284 = arith.negf %283 : vector<8x128xf32>
    %285 = math.exp %284 : vector<8x128xf32>
    %cst_87 = arith.constant 1.000000e+00 : f32
    %286 = vector.broadcast %cst_87 : f32 to vector<8x128xf32>
    %287 = arith.addf %286, %285 : vector<8x128xf32>
    %288 = arith.divf %286, %287 : vector<8x128xf32>
    %289 = vector.extract_strided_slice %282 {offsets = [0, 128], sizes = [8, 128], strides = [1, 1]} : vector<8x512xf32> to vector<8x128xf32>
    %290 = arith.negf %289 : vector<8x128xf32>
    %291 = math.exp %290 : vector<8x128xf32>
    %cst_88 = arith.constant 1.000000e+00 : f32
    %292 = vector.broadcast %cst_88 : f32 to vector<8x128xf32>
    %293 = arith.addf %292, %291 : vector<8x128xf32>
    %294 = arith.divf %292, %293 : vector<8x128xf32>
    %295 = vector.extract_strided_slice %282 {offsets = [0, 256], sizes = [8, 128], strides = [1, 1]} : vector<8x512xf32> to vector<8x128xf32>
    %296 = math.tanh %295 : vector<8x128xf32>
    %297 = vector.extract_strided_slice %282 {offsets = [0, 384], sizes = [8, 128], strides = [1, 1]} : vector<8x512xf32> to vector<8x128xf32>
    %298 = arith.negf %297 : vector<8x128xf32>
    %299 = math.exp %298 : vector<8x128xf32>
    %cst_89 = arith.constant 1.000000e+00 : f32
    %300 = vector.broadcast %cst_89 : f32 to vector<8x128xf32>
    %301 = arith.addf %300, %299 : vector<8x128xf32>
    %302 = arith.divf %300, %301 : vector<8x128xf32>
    %303 = arith.mulf %294, %240 : vector<8x128xf32>
    %304 = arith.mulf %288, %296 : vector<8x128xf32>
    %305 = arith.addf %303, %304 : vector<8x128xf32>
    %306 = math.tanh %305 : vector<8x128xf32>
    %307 = arith.mulf %302, %306 : vector<8x128xf32>
    %308 = arith.truncf %307 : vector<8x128xf32> to vector<8x128xbf16>
    %c0_90 = arith.constant 0 : index
    %c0_91 = arith.constant 0 : index
    %309 = vector.load %arg4[%c0_90, %c0_91] : memref<128x512xbf16, #tpu.memory_space<vmem>>, vector<128x512xbf16>
    %cst_92 = arith.constant dense<0.000000e+00> : vector<8x512xf32>
    %310 = tpu.matmul %308, %309, %cst_92 {dimension_numbers = #tpu.dot_dimension_numbers<[1], [0], [0], [1], [0, 0, 1, 1], [], []>} : vector<8x128xbf16>, vector<128x512xbf16>, vector<8x512xf32> -> vector<8x512xf32>
    %311 = arith.addf %275, %310 : vector<8x512xf32>
    %312 = vector.extract_strided_slice %311 {offsets = [0, 0], sizes = [8, 128], strides = [1, 1]} : vector<8x512xf32> to vector<8x128xf32>
    %313 = arith.negf %312 : vector<8x128xf32>
    %314 = math.exp %313 : vector<8x128xf32>
    %cst_93 = arith.constant 1.000000e+00 : f32
    %315 = vector.broadcast %cst_93 : f32 to vector<8x128xf32>
    %316 = arith.addf %315, %314 : vector<8x128xf32>
    %317 = arith.divf %315, %316 : vector<8x128xf32>
    %318 = vector.extract_strided_slice %311 {offsets = [0, 128], sizes = [8, 128], strides = [1, 1]} : vector<8x512xf32> to vector<8x128xf32>
    %319 = arith.negf %318 : vector<8x128xf32>
    %320 = math.exp %319 : vector<8x128xf32>
    %cst_94 = arith.constant 1.000000e+00 : f32
    %321 = vector.broadcast %cst_94 : f32 to vector<8x128xf32>
    %322 = arith.addf %321, %320 : vector<8x128xf32>
    %323 = arith.divf %321, %322 : vector<8x128xf32>
    %324 = vector.extract_strided_slice %311 {offsets = [0, 256], sizes = [8, 128], strides = [1, 1]} : vector<8x512xf32> to vector<8x128xf32>
    %325 = math.tanh %324 : vector<8x128xf32>
    %326 = vector.extract_strided_slice %311 {offsets = [0, 384], sizes = [8, 128], strides = [1, 1]} : vector<8x512xf32> to vector<8x128xf32>
    %327 = arith.negf %326 : vector<8x128xf32>
    %328 = math.exp %327 : vector<8x128xf32>
    %cst_95 = arith.constant 1.000000e+00 : f32
    %329 = vector.broadcast %cst_95 : f32 to vector<8x128xf32>
    %330 = arith.addf %329, %328 : vector<8x128xf32>
    %331 = arith.divf %329, %330 : vector<8x128xf32>
    %332 = arith.mulf %323, %269 : vector<8x128xf32>
    %333 = arith.mulf %317, %325 : vector<8x128xf32>
    %334 = arith.addf %332, %333 : vector<8x128xf32>
    %335 = math.tanh %334 : vector<8x128xf32>
    %336 = arith.mulf %331, %335 : vector<8x128xf32>
    %c5_i32 = arith.constant 5 : i32
    %337 = arith.truncf %336 : vector<8x128xf32> to vector<8x128xbf16>
    %c0_96 = arith.constant 0 : index
    %c0_97 = arith.constant 0 : index
    %338 = vector.load %arg5[%c0_96, %c0_97] : memref<128x512xbf16, #tpu.memory_space<vmem>>, vector<128x512xbf16>
    %cst_98 = arith.constant dense<0.000000e+00> : vector<8x512xf32>
    %339 = tpu.matmul %337, %338, %cst_98 {dimension_numbers = #tpu.dot_dimension_numbers<[1], [0], [0], [1], [0, 0, 1, 1], [], []>} : vector<8x128xbf16>, vector<128x512xbf16>, vector<8x512xf32> -> vector<8x512xf32>
    %340 = arith.addf %339, %10 : vector<8x512xf32>
    %341 = arith.index_cast %c5_i32 : i32 to index
    %c0_99 = arith.constant 0 : index
    %c0_100 = arith.constant 0 : index
    %342 = vector.load %arg10[%341, %c0_99, %c0_100] : memref<8x8x512xf32, #tpu.memory_space<vmem>>, vector<1x8x512xf32>
    %343 = vector.shape_cast %342 : vector<1x8x512xf32> to vector<8x512xf32>
    %344 = arith.truncf %307 : vector<8x128xf32> to vector<8x128xbf16>
    %c0_101 = arith.constant 0 : index
    %c0_102 = arith.constant 0 : index
    %345 = vector.load %arg2[%c0_101, %c0_102] : memref<128x512xbf16, #tpu.memory_space<vmem>>, vector<128x512xbf16>
    %cst_103 = arith.constant dense<0.000000e+00> : vector<8x512xf32>
    %346 = tpu.matmul %344, %345, %cst_103 {dimension_numbers = #tpu.dot_dimension_numbers<[1], [0], [0], [1], [0, 0, 1, 1], [], []>} : vector<8x128xbf16>, vector<128x512xbf16>, vector<8x512xf32> -> vector<8x512xf32>
    %347 = arith.addf %343, %346 : vector<8x512xf32>
    %348 = vector.extract_strided_slice %347 {offsets = [0, 0], sizes = [8, 128], strides = [1, 1]} : vector<8x512xf32> to vector<8x128xf32>
    %349 = arith.negf %348 : vector<8x128xf32>
    %350 = math.exp %349 : vector<8x128xf32>
    %cst_104 = arith.constant 1.000000e+00 : f32
    %351 = vector.broadcast %cst_104 : f32 to vector<8x128xf32>
    %352 = arith.addf %351, %350 : vector<8x128xf32>
    %353 = arith.divf %351, %352 : vector<8x128xf32>
    %354 = vector.extract_strided_slice %347 {offsets = [0, 128], sizes = [8, 128], strides = [1, 1]} : vector<8x512xf32> to vector<8x128xf32>
    %355 = arith.negf %354 : vector<8x128xf32>
    %356 = math.exp %355 : vector<8x128xf32>
    %cst_105 = arith.constant 1.000000e+00 : f32
    %357 = vector.broadcast %cst_105 : f32 to vector<8x128xf32>
    %358 = arith.addf %357, %356 : vector<8x128xf32>
    %359 = arith.divf %357, %358 : vector<8x128xf32>
    %360 = vector.extract_strided_slice %347 {offsets = [0, 256], sizes = [8, 128], strides = [1, 1]} : vector<8x512xf32> to vector<8x128xf32>
    %361 = math.tanh %360 : vector<8x128xf32>
    %362 = vector.extract_strided_slice %347 {offsets = [0, 384], sizes = [8, 128], strides = [1, 1]} : vector<8x512xf32> to vector<8x128xf32>
    %363 = arith.negf %362 : vector<8x128xf32>
    %364 = math.exp %363 : vector<8x128xf32>
    %cst_106 = arith.constant 1.000000e+00 : f32
    %365 = vector.broadcast %cst_106 : f32 to vector<8x128xf32>
    %366 = arith.addf %365, %364 : vector<8x128xf32>
    %367 = arith.divf %365, %366 : vector<8x128xf32>
    %368 = arith.mulf %359, %305 : vector<8x128xf32>
    %369 = arith.mulf %353, %361 : vector<8x128xf32>
    %370 = arith.addf %368, %369 : vector<8x128xf32>
    %371 = math.tanh %370 : vector<8x128xf32>
    %372 = arith.mulf %367, %371 : vector<8x128xf32>
    %373 = arith.truncf %372 : vector<8x128xf32> to vector<8x128xbf16>
    %c0_107 = arith.constant 0 : index
    %c0_108 = arith.constant 0 : index
    %374 = vector.load %arg4[%c0_107, %c0_108] : memref<128x512xbf16, #tpu.memory_space<vmem>>, vector<128x512xbf16>
    %cst_109 = arith.constant dense<0.000000e+00> : vector<8x512xf32>
    %375 = tpu.matmul %373, %374, %cst_109 {dimension_numbers = #tpu.dot_dimension_numbers<[1], [0], [0], [1], [0, 0, 1, 1], [], []>} : vector<8x128xbf16>, vector<128x512xbf16>, vector<8x512xf32> -> vector<8x512xf32>
    %376 = arith.addf %340, %375 : vector<8x512xf32>
    %377 = vector.extract_strided_slice %376 {offsets = [0, 0], sizes = [8, 128], strides = [1, 1]} : vector<8x512xf32> to vector<8x128xf32>
    %378 = arith.negf %377 : vector<8x128xf32>
    %379 = math.exp %378 : vector<8x128xf32>
    %cst_110 = arith.constant 1.000000e+00 : f32
    %380 = vector.broadcast %cst_110 : f32 to vector<8x128xf32>
    %381 = arith.addf %380, %379 : vector<8x128xf32>
    %382 = arith.divf %380, %381 : vector<8x128xf32>
    %383 = vector.extract_strided_slice %376 {offsets = [0, 128], sizes = [8, 128], strides = [1, 1]} : vector<8x512xf32> to vector<8x128xf32>
    %384 = arith.negf %383 : vector<8x128xf32>
    %385 = math.exp %384 : vector<8x128xf32>
    %cst_111 = arith.constant 1.000000e+00 : f32
    %386 = vector.broadcast %cst_111 : f32 to vector<8x128xf32>
    %387 = arith.addf %386, %385 : vector<8x128xf32>
    %388 = arith.divf %386, %387 : vector<8x128xf32>
    %389 = vector.extract_strided_slice %376 {offsets = [0, 256], sizes = [8, 128], strides = [1, 1]} : vector<8x512xf32> to vector<8x128xf32>
    %390 = math.tanh %389 : vector<8x128xf32>
    %391 = vector.extract_strided_slice %376 {offsets = [0, 384], sizes = [8, 128], strides = [1, 1]} : vector<8x512xf32> to vector<8x128xf32>
    %392 = arith.negf %391 : vector<8x128xf32>
    %393 = math.exp %392 : vector<8x128xf32>
    %cst_112 = arith.constant 1.000000e+00 : f32
    %394 = vector.broadcast %cst_112 : f32 to vector<8x128xf32>
    %395 = arith.addf %394, %393 : vector<8x128xf32>
    %396 = arith.divf %394, %395 : vector<8x128xf32>
    %397 = arith.mulf %388, %334 : vector<8x128xf32>
    %398 = arith.mulf %382, %390 : vector<8x128xf32>
    %399 = arith.addf %397, %398 : vector<8x128xf32>
    %400 = math.tanh %399 : vector<8x128xf32>
    %401 = arith.mulf %396, %400 : vector<8x128xf32>
    %c6_i32 = arith.constant 6 : i32
    %402 = arith.truncf %401 : vector<8x128xf32> to vector<8x128xbf16>
    %c0_113 = arith.constant 0 : index
    %c0_114 = arith.constant 0 : index
    %403 = vector.load %arg5[%c0_113, %c0_114] : memref<128x512xbf16, #tpu.memory_space<vmem>>, vector<128x512xbf16>
    %cst_115 = arith.constant dense<0.000000e+00> : vector<8x512xf32>
    %404 = tpu.matmul %402, %403, %cst_115 {dimension_numbers = #tpu.dot_dimension_numbers<[1], [0], [0], [1], [0, 0, 1, 1], [], []>} : vector<8x128xbf16>, vector<128x512xbf16>, vector<8x512xf32> -> vector<8x512xf32>
    %405 = arith.addf %404, %10 : vector<8x512xf32>
    %406 = arith.index_cast %c6_i32 : i32 to index
    %c0_116 = arith.constant 0 : index
    %c0_117 = arith.constant 0 : index
    %407 = vector.load %arg10[%406, %c0_116, %c0_117] : memref<8x8x512xf32, #tpu.memory_space<vmem>>, vector<1x8x512xf32>
    %408 = vector.shape_cast %407 : vector<1x8x512xf32> to vector<8x512xf32>
    %409 = arith.truncf %372 : vector<8x128xf32> to vector<8x128xbf16>
    %c0_118 = arith.constant 0 : index
    %c0_119 = arith.constant 0 : index
    %410 = vector.load %arg2[%c0_118, %c0_119] : memref<128x512xbf16, #tpu.memory_space<vmem>>, vector<128x512xbf16>
    %cst_120 = arith.constant dense<0.000000e+00> : vector<8x512xf32>
    %411 = tpu.matmul %409, %410, %cst_120 {dimension_numbers = #tpu.dot_dimension_numbers<[1], [0], [0], [1], [0, 0, 1, 1], [], []>} : vector<8x128xbf16>, vector<128x512xbf16>, vector<8x512xf32> -> vector<8x512xf32>
    %412 = arith.addf %408, %411 : vector<8x512xf32>
    %413 = vector.extract_strided_slice %412 {offsets = [0, 0], sizes = [8, 128], strides = [1, 1]} : vector<8x512xf32> to vector<8x128xf32>
    %414 = arith.negf %413 : vector<8x128xf32>
    %415 = math.exp %414 : vector<8x128xf32>
    %cst_121 = arith.constant 1.000000e+00 : f32
    %416 = vector.broadcast %cst_121 : f32 to vector<8x128xf32>
    %417 = arith.addf %416, %415 : vector<8x128xf32>
    %418 = arith.divf %416, %417 : vector<8x128xf32>
    %419 = vector.extract_strided_slice %412 {offsets = [0, 128], sizes = [8, 128], strides = [1, 1]} : vector<8x512xf32> to vector<8x128xf32>
    %420 = arith.negf %419 : vector<8x128xf32>
    %421 = math.exp %420 : vector<8x128xf32>
    %cst_122 = arith.constant 1.000000e+00 : f32
    %422 = vector.broadcast %cst_122 : f32 to vector<8x128xf32>
    %423 = arith.addf %422, %421 : vector<8x128xf32>
    %424 = arith.divf %422, %423 : vector<8x128xf32>
    %425 = vector.extract_strided_slice %412 {offsets = [0, 256], sizes = [8, 128], strides = [1, 1]} : vector<8x512xf32> to vector<8x128xf32>
    %426 = math.tanh %425 : vector<8x128xf32>
    %427 = vector.extract_strided_slice %412 {offsets = [0, 384], sizes = [8, 128], strides = [1, 1]} : vector<8x512xf32> to vector<8x128xf32>
    %428 = arith.negf %427 : vector<8x128xf32>
    %429 = math.exp %428 : vector<8x128xf32>
    %cst_123 = arith.constant 1.000000e+00 : f32
    %430 = vector.broadcast %cst_123 : f32 to vector<8x128xf32>
    %431 = arith.addf %430, %429 : vector<8x128xf32>
    %432 = arith.divf %430, %431 : vector<8x128xf32>
    %433 = arith.mulf %424, %370 : vector<8x128xf32>
    %434 = arith.mulf %418, %426 : vector<8x128xf32>
    %435 = arith.addf %433, %434 : vector<8x128xf32>
    %436 = math.tanh %435 : vector<8x128xf32>
    %437 = arith.mulf %432, %436 : vector<8x128xf32>
    %438 = arith.truncf %437 : vector<8x128xf32> to vector<8x128xbf16>
    %c0_124 = arith.constant 0 : index
    %c0_125 = arith.constant 0 : index
    %439 = vector.load %arg4[%c0_124, %c0_125] : memref<128x512xbf16, #tpu.memory_space<vmem>>, vector<128x512xbf16>
    %cst_126 = arith.constant dense<0.000000e+00> : vector<8x512xf32>
    %440 = tpu.matmul %438, %439, %cst_126 {dimension_numbers = #tpu.dot_dimension_numbers<[1], [0], [0], [1], [0, 0, 1, 1], [], []>} : vector<8x128xbf16>, vector<128x512xbf16>, vector<8x512xf32> -> vector<8x512xf32>
    %441 = arith.addf %405, %440 : vector<8x512xf32>
    %442 = vector.extract_strided_slice %441 {offsets = [0, 0], sizes = [8, 128], strides = [1, 1]} : vector<8x512xf32> to vector<8x128xf32>
    %443 = arith.negf %442 : vector<8x128xf32>
    %444 = math.exp %443 : vector<8x128xf32>
    %cst_127 = arith.constant 1.000000e+00 : f32
    %445 = vector.broadcast %cst_127 : f32 to vector<8x128xf32>
    %446 = arith.addf %445, %444 : vector<8x128xf32>
    %447 = arith.divf %445, %446 : vector<8x128xf32>
    %448 = vector.extract_strided_slice %441 {offsets = [0, 128], sizes = [8, 128], strides = [1, 1]} : vector<8x512xf32> to vector<8x128xf32>
    %449 = arith.negf %448 : vector<8x128xf32>
    %450 = math.exp %449 : vector<8x128xf32>
    %cst_128 = arith.constant 1.000000e+00 : f32
    %451 = vector.broadcast %cst_128 : f32 to vector<8x128xf32>
    %452 = arith.addf %451, %450 : vector<8x128xf32>
    %453 = arith.divf %451, %452 : vector<8x128xf32>
    %454 = vector.extract_strided_slice %441 {offsets = [0, 256], sizes = [8, 128], strides = [1, 1]} : vector<8x512xf32> to vector<8x128xf32>
    %455 = math.tanh %454 : vector<8x128xf32>
    %456 = vector.extract_strided_slice %441 {offsets = [0, 384], sizes = [8, 128], strides = [1, 1]} : vector<8x512xf32> to vector<8x128xf32>
    %457 = arith.negf %456 : vector<8x128xf32>
    %458 = math.exp %457 : vector<8x128xf32>
    %cst_129 = arith.constant 1.000000e+00 : f32
    %459 = vector.broadcast %cst_129 : f32 to vector<8x128xf32>
    %460 = arith.addf %459, %458 : vector<8x128xf32>
    %461 = arith.divf %459, %460 : vector<8x128xf32>
    %462 = arith.mulf %453, %399 : vector<8x128xf32>
    %463 = arith.mulf %447, %455 : vector<8x128xf32>
    %464 = arith.addf %462, %463 : vector<8x128xf32>
    %465 = math.tanh %464 : vector<8x128xf32>
    %466 = arith.mulf %461, %465 : vector<8x128xf32>
    %c7_i32 = arith.constant 7 : i32
    %467 = arith.truncf %466 : vector<8x128xf32> to vector<8x128xbf16>
    %c0_130 = arith.constant 0 : index
    %c0_131 = arith.constant 0 : index
    %468 = vector.load %arg5[%c0_130, %c0_131] : memref<128x512xbf16, #tpu.memory_space<vmem>>, vector<128x512xbf16>
    %cst_132 = arith.constant dense<0.000000e+00> : vector<8x512xf32>
    %469 = tpu.matmul %467, %468, %cst_132 {dimension_numbers = #tpu.dot_dimension_numbers<[1], [0], [0], [1], [0, 0, 1, 1], [], []>} : vector<8x128xbf16>, vector<128x512xbf16>, vector<8x512xf32> -> vector<8x512xf32>
    %470 = arith.addf %469, %10 : vector<8x512xf32>
    %471 = arith.index_cast %c7_i32 : i32 to index
    %c0_133 = arith.constant 0 : index
    %c0_134 = arith.constant 0 : index
    %472 = vector.load %arg10[%471, %c0_133, %c0_134] : memref<8x8x512xf32, #tpu.memory_space<vmem>>, vector<1x8x512xf32>
    %473 = vector.shape_cast %472 : vector<1x8x512xf32> to vector<8x512xf32>
    %474 = arith.truncf %437 : vector<8x128xf32> to vector<8x128xbf16>
    %c0_135 = arith.constant 0 : index
    %c0_136 = arith.constant 0 : index
    %475 = vector.load %arg2[%c0_135, %c0_136] : memref<128x512xbf16, #tpu.memory_space<vmem>>, vector<128x512xbf16>
    %cst_137 = arith.constant dense<0.000000e+00> : vector<8x512xf32>
    %476 = tpu.matmul %474, %475, %cst_137 {dimension_numbers = #tpu.dot_dimension_numbers<[1], [0], [0], [1], [0, 0, 1, 1], [], []>} : vector<8x128xbf16>, vector<128x512xbf16>, vector<8x512xf32> -> vector<8x512xf32>
    %477 = arith.addf %473, %476 : vector<8x512xf32>
    %478 = vector.extract_strided_slice %477 {offsets = [0, 0], sizes = [8, 128], strides = [1, 1]} : vector<8x512xf32> to vector<8x128xf32>
    %479 = arith.negf %478 : vector<8x128xf32>
    %480 = math.exp %479 : vector<8x128xf32>
    %cst_138 = arith.constant 1.000000e+00 : f32
    %481 = vector.broadcast %cst_138 : f32 to vector<8x128xf32>
    %482 = arith.addf %481, %480 : vector<8x128xf32>
    %483 = arith.divf %481, %482 : vector<8x128xf32>
    %484 = vector.extract_strided_slice %477 {offsets = [0, 128], sizes = [8, 128], strides = [1, 1]} : vector<8x512xf32> to vector<8x128xf32>
    %485 = arith.negf %484 : vector<8x128xf32>
    %486 = math.exp %485 : vector<8x128xf32>
    %cst_139 = arith.constant 1.000000e+00 : f32
    %487 = vector.broadcast %cst_139 : f32 to vector<8x128xf32>
    %488 = arith.addf %487, %486 : vector<8x128xf32>
    %489 = arith.divf %487, %488 : vector<8x128xf32>
    %490 = vector.extract_strided_slice %477 {offsets = [0, 256], sizes = [8, 128], strides = [1, 1]} : vector<8x512xf32> to vector<8x128xf32>
    %491 = math.tanh %490 : vector<8x128xf32>
    %492 = vector.extract_strided_slice %477 {offsets = [0, 384], sizes = [8, 128], strides = [1, 1]} : vector<8x512xf32> to vector<8x128xf32>
    %493 = arith.negf %492 : vector<8x128xf32>
    %494 = math.exp %493 : vector<8x128xf32>
    %cst_140 = arith.constant 1.000000e+00 : f32
    %495 = vector.broadcast %cst_140 : f32 to vector<8x128xf32>
    %496 = arith.addf %495, %494 : vector<8x128xf32>
    %497 = arith.divf %495, %496 : vector<8x128xf32>
    %498 = arith.mulf %489, %435 : vector<8x128xf32>
    %499 = arith.mulf %483, %491 : vector<8x128xf32>
    %500 = arith.addf %498, %499 : vector<8x128xf32>
    %501 = math.tanh %500 : vector<8x128xf32>
    %502 = arith.mulf %497, %501 : vector<8x128xf32>
    %503 = arith.truncf %502 : vector<8x128xf32> to vector<8x128xbf16>
    %c0_141 = arith.constant 0 : index
    %c0_142 = arith.constant 0 : index
    %504 = vector.load %arg4[%c0_141, %c0_142] : memref<128x512xbf16, #tpu.memory_space<vmem>>, vector<128x512xbf16>
    %cst_143 = arith.constant dense<0.000000e+00> : vector<8x512xf32>
    %505 = tpu.matmul %503, %504, %cst_143 {dimension_numbers = #tpu.dot_dimension_numbers<[1], [0], [0], [1], [0, 0, 1, 1], [], []>} : vector<8x128xbf16>, vector<128x512xbf16>, vector<8x512xf32> -> vector<8x512xf32>
    %506 = arith.addf %470, %505 : vector<8x512xf32>
    %507 = vector.extract_strided_slice %506 {offsets = [0, 0], sizes = [8, 128], strides = [1, 1]} : vector<8x512xf32> to vector<8x128xf32>
    %508 = arith.negf %507 : vector<8x128xf32>
    %509 = math.exp %508 : vector<8x128xf32>
    %cst_144 = arith.constant 1.000000e+00 : f32
    %510 = vector.broadcast %cst_144 : f32 to vector<8x128xf32>
    %511 = arith.addf %510, %509 : vector<8x128xf32>
    %512 = arith.divf %510, %511 : vector<8x128xf32>
    %513 = vector.extract_strided_slice %506 {offsets = [0, 128], sizes = [8, 128], strides = [1, 1]} : vector<8x512xf32> to vector<8x128xf32>
    %514 = arith.negf %513 : vector<8x128xf32>
    %515 = math.exp %514 : vector<8x128xf32>
    %cst_145 = arith.constant 1.000000e+00 : f32
    %516 = vector.broadcast %cst_145 : f32 to vector<8x128xf32>
    %517 = arith.addf %516, %515 : vector<8x128xf32>
    %518 = arith.divf %516, %517 : vector<8x128xf32>
    %519 = vector.extract_strided_slice %506 {offsets = [0, 256], sizes = [8, 128], strides = [1, 1]} : vector<8x512xf32> to vector<8x128xf32>
    %520 = math.tanh %519 : vector<8x128xf32>
    %521 = vector.extract_strided_slice %506 {offsets = [0, 384], sizes = [8, 128], strides = [1, 1]} : vector<8x512xf32> to vector<8x128xf32>
    %522 = arith.negf %521 : vector<8x128xf32>
    %523 = math.exp %522 : vector<8x128xf32>
    %cst_146 = arith.constant 1.000000e+00 : f32
    %524 = vector.broadcast %cst_146 : f32 to vector<8x128xf32>
    %525 = arith.addf %524, %523 : vector<8x128xf32>
    %526 = arith.divf %524, %525 : vector<8x128xf32>
    %527 = arith.mulf %518, %464 : vector<8x128xf32>
    %528 = arith.mulf %512, %520 : vector<8x128xf32>
    %529 = arith.addf %527, %528 : vector<8x128xf32>
    %530 = math.tanh %529 : vector<8x128xf32>
    %531 = arith.mulf %526, %530 : vector<8x128xf32>
    %c8_i32 = arith.constant 8 : i32
    %532 = arith.truncf %531 : vector<8x128xf32> to vector<8x128xbf16>
    %c0_147 = arith.constant 0 : index
    %c0_148 = arith.constant 0 : index
    %533 = vector.load %arg7[%c0_147, %c0_148] : memref<128x128xbf16, #tpu.memory_space<vmem>>, vector<128x128xbf16>
    %cst_149 = arith.constant dense<0.000000e+00> : vector<8x128xf32>
    %534 = tpu.matmul %532, %533, %cst_149 {dimension_numbers = #tpu.dot_dimension_numbers<[1], [0], [0], [1], [0, 0, 1, 1], [], []>} : vector<8x128xbf16>, vector<128x128xbf16>, vector<8x128xf32> -> vector<8x128xf32>
    %c0_150 = arith.constant 0 : index
    %c0_151 = arith.constant 0 : index
    %535 = vector.load %arg8[%c0_150, %c0_151] : memref<1x128xf32, #tpu.memory_space<vmem>>, vector<1x128xf32>
    %536 = vector.broadcast %535 : vector<1x128xf32> to vector<8x128xf32>
    %537 = arith.addf %534, %536 : vector<8x128xf32>
    %c0_152 = arith.constant 0 : index
    %c0_153 = arith.constant 0 : index
    %538 = vector.load %arg9[%c0_152, %c0_153] : memref<8x128xf32, #tpu.memory_space<vmem>>, vector<8x128xf32>
    tpu.vector_store %arg9[%c0_152, %c0_153], %537 {strides = array<i32>} : memref<8x128xf32, #tpu.memory_space<vmem>>, vector<8x128xf32>,
    return
  }
}

</mosaic_0001>

<bundles_post_ra>
// kernel: tpu_custom_call.1
= control target key start
LH: loop header
LB: loop body
LE: loop exit
PB: predicated region body
PF: predicated region fallthrough
CT: control target
= control target key end

     0   :  { %14 = vsyncpa [#allocation4], 0  ;;  %s6736_s0 = inlined_call_operand.hbm [shape: bf16[64,128], index: 0, kind: input, shape index: {}]   ;;  %s6737_s1 = inlined_call_operand.hbm [shape: bf16[128,512], index: 1, kind: input, shape index: {}]   ;;  %s6738_s2 = inlined_call_operand.hbm [shape: bf16[128,512], index: 2, kind: input, shape index: {}]   ;;  %s6739_s3 = inlined_call_operand.vmem [shape: f32[1,512], index: 3, kind: input, shape index: {}]   ;;  %s6740_s4 = inlined_call_operand.hbm [shape: bf16[128,512], index: 4, kind: input, shape index: {}]   ;;  %s6741_s5 = inlined_call_operand.hbm [shape: bf16[128,512], index: 5, kind: input, shape index: {}]   ;;  %s6742_s6 = inlined_call_operand.vmem [shape: f32[1,512], index: 6, kind: input, shape index: {}]   ;;  %s6743_s7 = inlined_call_operand.hbm [shape: bf16[128,128], index: 7, kind: input, shape index: {}]   ;;  %s6744_s8 = inlined_call_operand.vmem [shape: f32[1,128], index: 8, kind: input, shape index: {}]   ;;  %s6745_s9 = inlined_call_operand.hbm [shape: f32[8,128], index: 9, kind: output, shape index: {}]  }
   0x1   :  { %15 = vsyncpa [#allocation7], 0 }
   0x2   :  { %16 = vsyncpa [#allocation10], 0 }
   0x3   :  { %17 = vsyncpa [#allocation13], 0 }
   0x4   :  { %18 = vsyncpa [#allocation5], 0  ;;  %s4883_s30 = smov [#allocation6]   ;;  %s4719_s13 = scalar_lea.hbm %s6737_s1, 4096 }
   0x5   :  { %s36_s10 = sshll.u32 %s4883_s30, 4  ;;  %p4720_p0 = scmp.ne.s32.totalorder %s6737_s1, %s4719_s13  ;;  %s37_s10 = int_to_ptr.vmem [resolvable:$true] %s36_s10 }
   0x6   :  { %p4723_p1 = scmp.lt.u32.totalorder %s4719_s13, %s6737_s1 }
   0x8   :  { %p4725_p2 = pnand %p4723_p1, %p4720_p0 }
   0xa   :  { %4728 = shalt.err (!%p4725_p2)
}
   0xb   :  { %s4729_s18 = scalar_lea.vmem %s37_s10, 4096  ;;  %p4734_p4 = scmp.lt.s32.totalorder %s37_s10, %s37_s10 }
   0xc   :  { %p4730_p3 = scmp.ne.s32.totalorder %s37_s10, %s4729_s18  ;;  %p4735_p5 = scmp.lt.s32.totalorder %s4729_s18, %s4729_s18 }
   0xe   :  { %p4736_p6 = por %p4735_p5, %p4734_p4 }
  0x10   :  { %p4737_p7 = pnand %p4736_p6, %p4730_p3 }
  0x12   :  { %4740 = shalt.err (!%p4737_p7)
}
  0x13   :  { %s4884_s19 = smov 256   ;;  %s4885_s20 = smov 16  }
  0x14   :  { %42 = dma.hbm_to_vmem [thread:$0]  %s6737_s1, 4096, %s37_s10, [#allocation7], %s4884_s19, %s4884_s19, %s4885_s20  }
  0x15   :  { %s4886_s23 = smov [#allocation9]   ;;  %s4887_s25 = smov [#allocation3]  }
  0x16   :  { %s62_s24 = sshll.u32 %s4886_s23, 4  ;;  %s24_s26 = sshll.u32 %s4887_s25, 4  ;;  %s63_s24 = int_to_ptr.vmem [resolvable:$true] %s62_s24  ;;  %s25_s26 = int_to_ptr.vmem [resolvable:$true] %s24_s26 }
  0x17   :  { %s4741_s29 = scalar_lea.hbm %s6740_s4, 4096 }
  0x18   :  { %p4742_p8 = scmp.ne.s32.totalorder %s6740_s4, %s4741_s29  ;;  %p4745_p9 = scmp.lt.u32.totalorder %s4741_s29, %s6740_s4 }
  0x1a   :  { %p4747_p10 = pnand %p4745_p9, %p4742_p8 }
  0x1c   :  { %4750 = shalt.err (!%p4747_p10)
}
  0x1d   :  { %s4751_s1 = scalar_lea.vmem %s63_s24, 4096  ;;  %p4756_p12 = scmp.lt.s32.totalorder %s63_s24, %s63_s24 }
  0x1e   :  { %p4752_p11 = scmp.ne.s32.totalorder %s63_s24, %s4751_s1  ;;  %p4757_p13 = scmp.lt.s32.totalorder %s4751_s1, %s4751_s1 }
  0x20   :  { %p4758_p0 = por %p4757_p13, %p4756_p12 }
  0x22   :  { %p4759_p1 = pnand %p4758_p0, %p4752_p11 }
  0x24   :  { %4762 = shalt.err (!%p4759_p1)
}
  0x25   :  { %68 = dma.hbm_to_vmem [thread:$0]  %s6740_s4, 4096, %s63_s24, [#allocation10], %s4884_s19, %s4884_s19, %s4885_s20  }
  0x26   :  { %s4763_s17 = scalar_lea.hbm %s6736_s0, 512 }
  0x27   :  { %p4764_p2 = scmp.ne.s32.totalorder %s6736_s0, %s4763_s17  ;;  %p4767_p3 = scmp.lt.u32.totalorder %s4763_s17, %s6736_s0 }
  0x29   :  { %p4769_p4 = pnand %p4767_p3, %p4764_p2 }
  0x2b   :  { %4772 = shalt.err (!%p4769_p4)
}
  0x2c   :  { %s4773_s25 = scalar_lea.vmem %s25_s26, 512  ;;  %p4778_p6 = scmp.lt.s32.totalorder %s25_s26, %s25_s26 }
  0x2d   :  { %p4774_p5 = scmp.ne.s32.totalorder %s25_s26, %s4773_s25  ;;  %p4779_p7 = scmp.lt.s32.totalorder %s4773_s25, %s4773_s25 }
  0x2f   :  { %p4780_p8 = por %p4779_p7, %p4778_p6 }
  0x31   :  { %p4781_p9 = pnand %p4780_p8, %p4774_p5 }
  0x33   :  { %4784 = shalt.err (!%p4781_p9)
}
  0x34   :  { %s4888_s4 = smov 64   ;;  %s4889_s24 = smov 4  }
  0x35   :  { %30 = dma.hbm_to_vmem [thread:$0]  %s6736_s0, 512, %s25_s26, [#allocation4], %s4888_s4, %s4888_s4, %s4889_s24  }
  0x36   :  { %s4890_s29 = smov [#allocation8]   ;;  %s4891_s11 = smov [#allocation11]  }
  0x37   :  { %s48_s30 = sshll.u32 %s4890_s29, 4  ;;  %s74_s12 = sshll.u32 %s4891_s11, 4  ;;  %s49_s30 = int_to_ptr.vmem [resolvable:$true] %s48_s30  ;;  %s75_s12 = int_to_ptr.vmem [resolvable:$true] %s74_s12 }
  0x38   :  { %s4785_s10 = scalar_lea.hbm %s6738_s2, 4096 }
  0x39   :  { %p4786_p10 = scmp.ne.s32.totalorder %s6738_s2, %s4785_s10  ;;  %p4789_p11 = scmp.lt.u32.totalorder %s4785_s10, %s6738_s2 }
  0x3b   :  { %p4791_p12 = pnand %p4789_p11, %p4786_p10 }
  0x3d   :  { %4794 = shalt.err (!%p4791_p12)
}
  0x3e   :  { %s4795_s0 = scalar_lea.vmem %s49_s30, 4096  ;;  %p4800_p0 = scmp.lt.s32.totalorder %s49_s30, %s49_s30 }
  0x3f   :  { %p4796_p13 = scmp.ne.s32.totalorder %s49_s30, %s4795_s0  ;;  %p4801_p1 = scmp.lt.s32.totalorder %s4795_s0, %s4795_s0 }
  0x41   :  { %p4802_p2 = por %p4801_p1, %p4800_p0 }
  0x43   :  { %p4803_p3 = pnand %p4802_p2, %p4796_p13 }
  0x45   :  { %4806 = shalt.err (!%p4803_p3)
}
  0x46   :  { %54 = dma.hbm_to_vmem [thread:$0]  %s6738_s2, 4096, %s49_s30, [#allocation7], %s4884_s19, %s4884_s19, %s4885_s20  }
  0x47   :  { %s4807_s23 = scalar_lea.hbm %s6741_s5, 4096 }
  0x48   :  { %p4808_p4 = scmp.ne.s32.totalorder %s6741_s5, %s4807_s23  ;;  %p4811_p5 = scmp.lt.u32.totalorder %s4807_s23, %s6741_s5 }
  0x4a   :  { %p4813_p6 = pnand %p4811_p5, %p4808_p4 }
  0x4c   :  { %4816 = shalt.err (!%p4813_p6)
}
  0x4d   :  { %s4817_s11 = scalar_lea.vmem %s75_s12, 4096  ;;  %p4822_p8 = scmp.lt.s32.totalorder %s75_s12, %s75_s12 }
  0x4e   :  { %p4818_p7 = scmp.ne.s32.totalorder %s75_s12, %s4817_s11  ;;  %p4823_p9 = scmp.lt.s32.totalorder %s4817_s11, %s4817_s11 }
  0x50   :  { %p4824_p10 = por %p4823_p9, %p4822_p8 }
  0x52   :  { %p4825_p11 = pnand %p4824_p10, %p4818_p7 }
  0x54   :  { %4828 = shalt.err (!%p4825_p11)
}
  0x55   :  { %80 = dma.hbm_to_vmem [thread:$0]  %s6741_s5, 4096, %s75_s12, [#allocation10], %s4884_s19, %s4884_s19, %s4885_s20  }
  0x56   :  { %s4892_s13 = smov [#allocation12]   ;;  %s4829_s15 = scalar_lea.hbm %s6743_s7, 1024 }
  0x57   :  { %s88_s1 = sshll.u32 %s4892_s13, 4  ;;  %p4830_p12 = scmp.ne.s32.totalorder %s6743_s7, %s4829_s15  ;;  %s89_s1 = int_to_ptr.vmem [resolvable:$true] %s88_s1 }
  0x58   :  { %p4833_p13 = scmp.lt.u32.totalorder %s4829_s15, %s6743_s7 }
  0x5a   :  { %p4835_p0 = pnand %p4833_p13, %p4830_p12 }
  0x5c   :  { %4838 = shalt.err (!%p4835_p0)
}
  0x5d   :  { %s4839_s18 = scalar_lea.vmem %s89_s1, 1024  ;;  %p4844_p2 = scmp.lt.s32.totalorder %s89_s1, %s89_s1 }
  0x5e   :  { %p4840_p1 = scmp.ne.s32.totalorder %s89_s1, %s4839_s18  ;;  %p4845_p3 = scmp.lt.s32.totalorder %s4839_s18, %s4839_s18 }
  0x60   :  { %p4846_p4 = por %p4845_p3, %p4844_p2 }
  0x62   :  { %p4847_p5 = pnand %p4846_p4, %p4840_p1 }
  0x64   :  { %4850 = shalt.err (!%p4847_p5)
}
  0x65   :  { %94 = dma.hbm_to_vmem [thread:$0]  %s6743_s7, 1024, %s89_s1, [#allocation13], %s4888_s4, %s4888_s4, %s4889_s24  }
  0x66   :  { %4873 = dma.done.wait [#allocation4], 512  }
  0x67   :  { %4874 = vsyncadd [#allocation4], 4294966784 }
  0x68   :  { %4875 = dma.done.wait [#allocation7], 8192  }
  0x69   :  { %4876 = vsyncadd [#allocation7], 4294959104 }
  0x6a   :  { %4877 = dma.done.wait [#allocation10], 8192  }
  0x6b   :  { %4878 = vsyncadd [#allocation10], 4294959104 }
  0x6c   :  { %4879 = dma.done.wait [#allocation13], 1024  }
  0x6d   :  { %4880 = vsyncadd [#allocation13], 4294966272  ;;  %v6746_v0 = vmov 0   ;;  %v4067_v1 = vld [vmem:[#allocation6 + $0x4] ss:$16 sps:$4 sm:$0xff]   ;;  %v4128_v44 = vld [vmem:[#allocation3 + $0x8] sm:$0xff]  }
  0x6e   :  { %394 = vmatprep.mubr.bf16.mxu0 %v6746_v0  ;;  %467 = vmatprep.mubr.bf16.mxu1 %v6746_v0  ;;  %v4069_v2 = vld [vmem:[#allocation6 + $0xc] ss:$16 sps:$4 sm:$0xff]   ;;  %v4071_v3 = vld [vmem:[#allocation6] ss:$16 sps:$4 sm:$0xff]   ;;  %v4072_v4 = vld [vmem:[#allocation6 + $0x8] ss:$16 sps:$4 sm:$0xff]  }
  0x6f   :  { %362 = vmatprep.subr.bf16.mxu0 %v4067_v1  ;;  %435 = vmatprep.subr.bf16.mxu1 %v4069_v2  ;;  %v4073_v5 = vld [vmem:[#allocation6 + $0x24] ss:$16 sps:$4 sm:$0xff]   ;;  %v4075_v6 = vld [vmem:[#allocation6 + $0x2c] ss:$16 sps:$4 sm:$0xff]   ;;  %v4077_v7 = vld [vmem:[#allocation6 + $0x20] ss:$16 sps:$4 sm:$0xff]  }
  0x70   :  { %363 = vmatpush1.bf16.msra.mxu0 %v4071_v3  ;;  %436 = vmatpush1.bf16.msra.mxu1 %v4072_v4  ;;  %v4078_v8 = vld [vmem:[#allocation6 + $0x28] ss:$16 sps:$4 sm:$0xff]   ;;  %v4079_v9 = vld [vmem:[#allocation6 + $0x44] ss:$16 sps:$4 sm:$0xff]   ;;  %v4081_v10 = vld [vmem:[#allocation6 + $0x4c] ss:$16 sps:$4 sm:$0xff]  }
  0x71   :  { %364 = vmatprep.subr.bf16.mxu0 %v4073_v5  ;;  %437 = vmatprep.subr.bf16.mxu1 %v4075_v6  ;;  %v4083_v11 = vld [vmem:[#allocation6 + $0x40] ss:$16 sps:$4 sm:$0xff]   ;;  %v4084_v12 = vld [vmem:[#allocation6 + $0x48] ss:$16 sps:$4 sm:$0xff]   ;;  %v4085_v13 = vld [vmem:[#allocation6 + $0x64] ss:$16 sps:$4 sm:$0xff]  }
  0x72   :  { %v4087_v14 = vld [vmem:[#allocation6 + $0x6c] ss:$16 sps:$4 sm:$0xff]   ;;  %v4089_v15 = vld [vmem:[#allocation6 + $0x60] ss:$16 sps:$4 sm:$0xff]   ;;  %v4090_v16 = vld [vmem:[#allocation6 + $0x68] ss:$16 sps:$4 sm:$0xff]  }
  0x73   :  { %v4091_v17 = vld [vmem:[#allocation6 + $0x84] ss:$16 sps:$4 sm:$0xff]   ;;  %v4093_v18 = vld [vmem:[#allocation6 + $0x8c] ss:$16 sps:$4 sm:$0xff]   ;;  %v4095_v19 = vld [vmem:[#allocation6 + $0x80] ss:$16 sps:$4 sm:$0xff]  }
  0x74   :  { %365 = vmatpush1.bf16.msra.mxu0 %v4077_v7  ;;  %438 = vmatpush1.bf16.msra.mxu1 %v4078_v8  ;;  %v4096_v20 = vld [vmem:[#allocation6 + $0x88] ss:$16 sps:$4 sm:$0xff]   ;;  %v4097_v21 = vld [vmem:[#allocation6 + $0xa4] ss:$16 sps:$4 sm:$0xff]   ;;  %v4099_v22 = vld [vmem:[#allocation6 + $0xac] ss:$16 sps:$4 sm:$0xff]  }
  0x75   :  { %366 = vmatprep.subr.bf16.mxu0 %v4079_v9  ;;  %439 = vmatprep.subr.bf16.mxu1 %v4081_v10  ;;  %v4101_v23 = vld [vmem:[#allocation6 + $0xa0] ss:$16 sps:$4 sm:$0xff]   ;;  %v4102_v24 = vld [vmem:[#allocation6 + $0xa8] ss:$16 sps:$4 sm:$0xff]   ;;  %v4103_v25 = vld [vmem:[#allocation6 + $0xc4] ss:$16 sps:$4 sm:$0xff]  }
  0x76   :  { %v4105_v26 = vld [vmem:[#allocation6 + $0xcc] ss:$16 sps:$4 sm:$0xff]   ;;  %v4107_v27 = vld [vmem:[#allocation6 + $0xc0] ss:$16 sps:$4 sm:$0xff]   ;;  %v4108_v28 = vld [vmem:[#allocation6 + $0xc8] ss:$16 sps:$4 sm:$0xff]  }
  0x77   :  { %v4109_v29 = vld [vmem:[#allocation6 + $0xe4] ss:$16 sps:$4 sm:$0xff]   ;;  %v4111_v30 = vld [vmem:[#allocation6 + $0xec] ss:$16 sps:$4 sm:$0xff]   ;;  %v4113_v31 = vld [vmem:[#allocation6 + $0xe0] ss:$16 sps:$4 sm:$0xff]  }
  0x78   :  { %367 = vmatpush1.bf16.msra.mxu0 %v4083_v11  ;;  %440 = vmatpush1.bf16.msra.mxu1 %v4084_v12  ;;  %v4114_v32 = vld [vmem:[#allocation6 + $0xe8] ss:$16 sps:$4 sm:$0xff]   ;;  %v5039_v33 = vld [vmem:[#allocation11 + $0x4] ss:$16 sps:$4 sm:$0xff]   ;;  %v5041_v34 = vld [vmem:[#allocation11 + $0xc] ss:$16 sps:$4 sm:$0xff]  }
  0x79   :  { %368 = vmatprep.subr.bf16.mxu0 %v4085_v13  ;;  %441 = vmatprep.subr.bf16.mxu1 %v4087_v14  ;;  %v4115_v35 = vld [vmem:[#allocation3] sm:$0xff]   ;;  %v5045_v37 = vld [vmem:[#allocation11 + $0x8] ss:$16 sps:$4 sm:$0xff]   ;;  %v5051_v39 = vld [vmem:[#allocation11 + $0x2c] ss:$16 sps:$4 sm:$0xff]   ;;  %vm4895_vm0 = vmmov 0  }
  0x7a   :  { %v5043_v36 = vld [vmem:[#allocation11] ss:$16 sps:$4 sm:$0xff]   ;;  %v5049_v38 = vld [vmem:[#allocation11 + $0x24] ss:$16 sps:$4 sm:$0xff]   ;;  %v5057_v41 = vld [vmem:[#allocation11 + $0x28] ss:$16 sps:$4 sm:$0xff]  }
  0x7b   :  { %v5053_v40 = vld [vmem:[#allocation11 + $0x20] ss:$16 sps:$4 sm:$0xff]   ;;  %v5061_v42 = vld [vmem:[#allocation11 + $0x44] ss:$16 sps:$4 sm:$0xff]   ;;  %v5063_v43 = vld [vmem:[#allocation11 + $0x4c] ss:$16 sps:$4 sm:$0xff]  }
  0x7c   :  { %369 = vmatpush1.bf16.msra.mxu0 %v4089_v15  ;;  %442 = vmatpush1.bf16.msra.mxu1 %v4090_v16  ;;  %v5067_v45 = vld [vmem:[#allocation11 + $0x40] ss:$16 sps:$4 sm:$0xff]   ;;  %v5069_v46 = vld [vmem:[#allocation11 + $0x48] ss:$16 sps:$4 sm:$0xff]   ;;  %v5073_v47 = vld [vmem:[#allocation11 + $0x64] ss:$16 sps:$4 sm:$0xff]  }
  0x7d   :  { %370 = vmatprep.subr.bf16.mxu0 %v4091_v17  ;;  %443 = vmatprep.subr.bf16.mxu1 %v4093_v18  ;;  %v5077_v48 = vld [vmem:[#allocation11 + $0x6c] ss:$16 sps:$4 sm:$0xff]   ;;  %v5079_v49 = vld [vmem:[#allocation11 + $0x60] ss:$16 sps:$4 sm:$0xff]   ;;  %v5081_v50 = vld [vmem:[#allocation11 + $0x68] ss:$16 sps:$4 sm:$0xff]  }
  0x7e   :  { %v5085_v51 = vld [vmem:[#allocation11 + $0x84] ss:$16 sps:$4 sm:$0xff]   ;;  %v5089_v52 = vld [vmem:[#allocation11 + $0x8c] ss:$16 sps:$4 sm:$0xff]   ;;  %v5093_v54 = vld [vmem:[#allocation11 + $0x80] ss:$16 sps:$4 sm:$0xff]  }
  0x7f   :  { %v4141_v53 = vld [vmem:[#allocation3 + $0x10] sm:$0xff]   ;;  %v5097_v55 = vld [vmem:[#allocation11 + $0x88] ss:$16 sps:$4 sm:$0xff]   ;;  %v5103_v57 = vld [vmem:[#allocation11 + $0xac] ss:$16 sps:$4 sm:$0xff]   ;;  %s4896_s12 = smov [#allocation14]  }
  0x80   :  { %371 = vmatpush1.bf16.msra.mxu0 %v4095_v19  ;;  %444 = vmatpush1.bf16.msra.mxu1 %v4096_v20  ;;  %v5099_v56 = vld [vmem:[#allocation11 + $0xa4] ss:$16 sps:$4 sm:$0xff]   ;;  %v5105_v58 = vld [vmem:[#allocation11 + $0xa0] ss:$16 sps:$4 sm:$0xff]   ;;  %v5107_v59 = vld [vmem:[#allocation11 + $0xa8] ss:$16 sps:$4 sm:$0xff]  }
  0x81   :  { %372 = vmatprep.subr.bf16.mxu0 %v4097_v21  ;;  %445 = vmatprep.subr.bf16.mxu1 %v4099_v22  ;;  %v5111_v60 = vld [vmem:[#allocation11 + $0xc4] ss:$16 sps:$4 sm:$0xff]   ;;  %v5115_v61 = vld [vmem:[#allocation11 + $0xcc] ss:$16 sps:$4 sm:$0xff]   ;;  %v5119_v63 = vld [vmem:[#allocation11 + $0xc0] ss:$16 sps:$4 sm:$0xff]  }
  0x82   :  { %v4154_v62 = vld [vmem:[#allocation3 + $0x18] sm:$0xff]   ;;  %v5125_v2 = vld [vmem:[#allocation11 + $0xe4] ss:$16 sps:$4 sm:$0xff]   ;;  %v5131_v4 = vld [vmem:[#allocation11 + $0xe0] ss:$16 sps:$4 sm:$0xff]   ;;  %s3727_s21 = sshll.u32 %s4896_s12, 4  ;;  %s3728_s21 = int_to_ptr.vmem [resolvable:$true] %s3727_s21 }
  0x83   :  { %v5123_v1 = vld [vmem:[#allocation11 + $0xc8] ss:$16 sps:$4 sm:$0xff]   ;;  %v5129_v3 = vld [vmem:[#allocation11 + $0xec] ss:$16 sps:$4 sm:$0xff]   ;;  %v5137_v6 = vld [vmem:[#allocation8 + $0x4] ss:$16 sps:$4 sm:$0xff]   ;;  %p4856_p7 = scmp.lt.s32.totalorder %s3728_s21, %s3728_s21 }
  0x84   :  { %373 = vmatpush1.bf16.msra.mxu0 %v4101_v23  ;;  %446 = vmatpush1.bf16.msra.mxu1 %v4102_v24  ;;  %v5133_v5 = vld [vmem:[#allocation11 + $0xe8] ss:$16 sps:$4 sm:$0xff]   ;;  %v5141_v7 = vld [vmem:[#allocation8 + $0xc] ss:$16 sps:$4 sm:$0xff]   ;;  %v5145_v8 = vld [vmem:[#allocation8] ss:$16 sps:$4 sm:$0xff]  }
  0x85   :  { %374 = vmatprep.subr.bf16.mxu0 %v4103_v25  ;;  %447 = vmatprep.subr.bf16.mxu1 %v4105_v26  ;;  %v5149_v9 = vld [vmem:[#allocation8 + $0x8] ss:$16 sps:$4 sm:$0xff]   ;;  %v5151_v10 = vld [vmem:[#allocation8 + $0x24] ss:$16 sps:$4 sm:$0xff]   ;;  %v5155_v11 = vld [vmem:[#allocation8 + $0x2c] ss:$16 sps:$4 sm:$0xff]  }
  0x86   :  { %v5159_v12 = vld [vmem:[#allocation8 + $0x20] ss:$16 sps:$4 sm:$0xff]   ;;  %v5161_v13 = vld [vmem:[#allocation8 + $0x28] ss:$16 sps:$4 sm:$0xff]   ;;  %v5163_v14 = vld [vmem:[#allocation8 + $0x44] ss:$16 sps:$4 sm:$0xff]  }
  0x87   :  { %7117 = vst [vmem:[#allocation20_spill] sm:$0xff] %v5159_v12  ;;  %7118 = vst [vmem:[#allocation21_spill] sm:$0xff] %v5161_v13  ;;  %v5167_v15 = vld [vmem:[#allocation8 + $0x4c] ss:$16 sps:$4 sm:$0xff]   ;;  %v5171_v16 = vld [vmem:[#allocation8 + $0x40] ss:$16 sps:$4 sm:$0xff]  }
  0x88   :  { %375 = vmatpush1.bf16.msra.mxu0 %v4107_v27  ;;  %448 = vmatpush1.bf16.msra.mxu1 %v4108_v28  ;;  %7119 = vst [vmem:[#allocation22_spill] sm:$0xff] %v5163_v14  ;;  %7120 = vst [vmem:[#allocation23_spill] sm:$0xff] %v5167_v15  ;;  %v5173_v17 = vld [vmem:[#allocation8 + $0x48] ss:$16 sps:$4 sm:$0xff]   ;;  %v5177_v18 = vld [vmem:[#allocation8 + $0x64] ss:$16 sps:$4 sm:$0xff]  }
  0x89   :  { %376 = vmatprep.subr.bf16.mxu0 %v4109_v29  ;;  %449 = vmatprep.subr.bf16.mxu1 %v4111_v30  ;;  %7121 = vst [vmem:[#allocation24_spill] sm:$0xff] %v5171_v16  ;;  %7122 = vst [vmem:[#allocation25_spill] sm:$0xff] %v5173_v17  ;;  %v5179_v19 = vld [vmem:[#allocation8 + $0x6c] ss:$16 sps:$4 sm:$0xff]   ;;  %v5185_v20 = vld [vmem:[#allocation8 + $0x60] ss:$16 sps:$4 sm:$0xff]  }
  0x8a   :  { %7123 = vst [vmem:[#allocation26_spill] sm:$0xff] %v5177_v18  ;;  %7124 = vst [vmem:[#allocation27_spill] sm:$0xff] %v5179_v19  ;;  %v5187_v21 = vld [vmem:[#allocation8 + $0x68] ss:$16 sps:$4 sm:$0xff]   ;;  %v5189_v22 = vld [vmem:[#allocation8 + $0x84] ss:$16 sps:$4 sm:$0xff]  }
  0x8b   :  { %7125 = vst [vmem:[#allocation28_spill] sm:$0xff] %v5185_v20  ;;  %7126 = vst [vmem:[#allocation29_spill] sm:$0xff] %v5187_v21  ;;  %v5191_v23 = vld [vmem:[#allocation8 + $0x8c] ss:$16 sps:$4 sm:$0xff]   ;;  %v5197_v24 = vld [vmem:[#allocation8 + $0x80] ss:$16 sps:$4 sm:$0xff]  }
  0x8c   :  { %377 = vmatpush1.bf16.msra.mxu0 %v4113_v31  ;;  %450 = vmatpush1.bf16.msra.mxu1 %v4114_v32  ;;  %7127 = vst [vmem:[#allocation30_spill] sm:$0xff] %v5189_v22  ;;  %7128 = vst [vmem:[#allocation31_spill] sm:$0xff] %v5191_v23  ;;  %v5199_v25 = vld [vmem:[#allocation8 + $0x88] ss:$16 sps:$4 sm:$0xff]   ;;  %v5201_v26 = vld [vmem:[#allocation8 + $0xa4] ss:$16 sps:$4 sm:$0xff]  }
  0x8d   :  { %754 = vmatprep.subr.bf16.mxu0 %v5039_v33  ;;  %795 = vmatprep.subr.bf16.mxu1 %v5041_v34  ;;  %7129 = vst [vmem:[#allocation32_spill] sm:$0xff] %v5197_v24  ;;  %7130 = vst [vmem:[#allocation33_spill] sm:$0xff] %v5199_v25  ;;  %v5203_v27 = vld [vmem:[#allocation8 + $0xac] ss:$16 sps:$4 sm:$0xff]   ;;  %v5211_v28 = vld [vmem:[#allocation8 + $0xa0] ss:$16 sps:$4 sm:$0xff]  }
  0x8e   :  { %7131 = vst [vmem:[#allocation34_spill] sm:$0xff] %v5201_v26  ;;  %7132 = vst [vmem:[#allocation35_spill] sm:$0xff] %v5203_v27  ;;  %v5213_v29 = vld [vmem:[#allocation8 + $0xa8] ss:$16 sps:$4 sm:$0xff]   ;;  %v5217_v30 = vld [vmem:[#allocation8 + $0xc4] ss:$16 sps:$4 sm:$0xff]  }
  0x8f   :  { %395 = vmatmul.mubr.bf16.vlgmr.msra.gmra.mrb[0].mxu0 %v4115_v35  ;;  %468 = vmatmul.mubr.bf16.vlgmr.msra.gmra.mrb[0].mxu1 %v4115_v35  ;;  %7133 = vst [vmem:[#allocation36_spill] sm:$0xff] %v5211_v28  ;;  %7134 = vst [vmem:[#allocation37_spill] sm:$0xff] %v5213_v29  ;;  %v5219_v31 = vld [vmem:[#allocation8 + $0xcc] ss:$16 sps:$4 sm:$0xff]   ;;  %v5223_v32 = vld [vmem:[#allocation8 + $0xc0] ss:$16 sps:$4 sm:$0xff]  }
  0x90   :  { %755 = vmatpush1.bf16.msra.mxu0 %v5043_v36  ;;  %796 = vmatpush1.bf16.msra.mxu1 %v5045_v37  ;;  %7135 = vst [vmem:[#allocation38_spill] sm:$0xff] %v5217_v30  ;;  %7136 = vst [vmem:[#allocation39_spill] sm:$0xff] %v5219_v31  ;;  %v5225_v35 = vld [vmem:[#allocation8 + $0xc8] ss:$16 sps:$4 sm:$0xff]   ;;  %s4851_s22 = scalar_lea.vmem %s3728_s21, 128 }
  0x91   :  { %756 = vmatprep.subr.bf16.mxu0 %v5049_v38  ;;  %797 = vmatprep.subr.bf16.mxu1 %v5051_v39  ;;  %7137 = vst [vmem:[#allocation40_spill] sm:$0xff] %v5223_v32  ;;  %7138 = vst [vmem:[#allocation41_spill] sm:$0xff] %v5225_v35  ;;  %p4852_p6 = scmp.ne.s32.totalorder %s3728_s21, %s4851_s22  ;;  %p4857_p8 = scmp.lt.s32.totalorder %s4851_s22, %s4851_s22 }
  0x92   :  { %404 = vmatprep.mubr.bf16.mxu0 %v6746_v0  ;;  %477 = vmatprep.mubr.bf16.mxu1 %v6746_v0 }
  0x93   :  { %p4858_p9 = por %p4857_p8, %p4856_p7 }
  0x94   :  { %757 = vmatpush1.bf16.msra.mxu0 %v5053_v40  ;;  %798 = vmatpush1.bf16.msra.mxu1 %v5057_v41 }
  0x95   :  { %758 = vmatprep.subr.bf16.mxu0 %v5061_v42  ;;  %799 = vmatprep.subr.bf16.mxu1 %v5063_v43  ;;  %p4859_p10 = pnand %p4858_p9, %p4852_p6 }
  0x97   :  { %405 = vmatmul.mubr.bf16.gmra.mrb[4].mxu0 %v4128_v44  ;;  %478 = vmatmul.mubr.bf16.gmra.mrb[4].mxu1 %v4128_v44  ;;  %v5229_v44 = vld [vmem:[#allocation8 + $0xe4] ss:$16 sps:$4 sm:$0xff]  }
  0x98   :  { %759 = vmatpush1.bf16.msra.mxu0 %v5067_v45  ;;  %800 = vmatpush1.bf16.msra.mxu1 %v5069_v46  ;;  %7139 = vst [vmem:[#allocation42_spill] sm:$0xff] %v5229_v44 }
  0x99   :  { %760 = vmatprep.subr.bf16.mxu0 %v5073_v47  ;;  %801 = vmatprep.subr.bf16.mxu1 %v5077_v48 }
  0x9a   :  { %414 = vmatprep.mubr.bf16.mxu0 %v6746_v0  ;;  %487 = vmatprep.mubr.bf16.mxu1 %v6746_v0 }
  0x9c   :  { %761 = vmatpush1.bf16.msra.mxu0 %v5079_v49  ;;  %802 = vmatpush1.bf16.msra.mxu1 %v5081_v50 }
  0x9d   :  { %762 = vmatprep.subr.bf16.mxu0 %v5085_v51  ;;  %803 = vmatprep.subr.bf16.mxu1 %v5089_v52 }
  0x9f   :  { %415 = vmatmul.mubr.bf16.gmra.mrb[8].mxu0 %v4141_v53  ;;  %488 = vmatmul.mubr.bf16.gmra.mrb[8].mxu1 %v4141_v53  ;;  %v5231_v53 = vld [vmem:[#allocation8 + $0xec] ss:$16 sps:$4 sm:$0xff]  }
  0xa0   :  { %763 = vmatpush1.bf16.msra.mxu0 %v5093_v54  ;;  %804 = vmatpush1.bf16.msra.mxu1 %v5097_v55  ;;  %7140 = vst [vmem:[#allocation43_spill] sm:$0xff] %v5231_v53 }
  0xa1   :  { %764 = vmatprep.subr.bf16.mxu0 %v5099_v56  ;;  %805 = vmatprep.subr.bf16.mxu1 %v5103_v57 }
  0xa2   :  { %424 = vmatprep.mubr.bf16.mxu0 %v6746_v0  ;;  %497 = vmatprep.mubr.bf16.mxu1 %v6746_v0 }
  0xa4   :  { %765 = vmatpush1.bf16.msra.mxu0 %v5105_v58  ;;  %806 = vmatpush1.bf16.msra.mxu1 %v5107_v59 }
  0xa5   :  { %766 = vmatprep.subr.bf16.mxu0 %v5111_v60  ;;  %807 = vmatprep.subr.bf16.mxu1 %v5115_v61 }
  0xa7   :  { %425 = vmatmul.mubr.bf16.gmra.mrb[12].mxu0 %v4154_v62  ;;  %498 = vmatmul.mubr.bf16.gmra.mrb[12].mxu1 %v4154_v62  ;;  %v5235_v62 = vld [vmem:[#allocation8 + $0xe0] ss:$16 sps:$4 sm:$0xff]  }
  0xa8   :  { %767 = vmatpush1.bf16.msra.mxu0 %v5119_v63  ;;  %808 = vmatpush1.bf16.msra.mxu1 %v5123_v1  ;;  %7141 = vst [vmem:[#allocation44_spill] sm:$0xff] %v5235_v62 }
  0xa9   :  { %768 = vmatprep.subr.bf16.mxu0 %v5125_v2  ;;  %809 = vmatprep.subr.bf16.mxu1 %v5129_v3 }
  0xaa   :  { %786 = vmatprep.mubr.bf16.mxu0 %v6746_v0  ;;  %827 = vmatprep.mubr.bf16.mxu1 %v6746_v0 }
  0xac   :  { %769 = vmatpush1.bf16.msra.mxu0 %v5131_v4  ;;  %810 = vmatpush1.bf16.msra.mxu1 %v5133_v5 }
  0xad   :  { %1032 = vmatprep.subr.bf16.mxu0 %v5137_v6  ;;  %1073 = vmatprep.subr.bf16.mxu1 %v5141_v7 }
  0xaf   :  { %787 = vmatmul.mubr.bf16.vlgmr.msra.gmra.mrb[16].mxu0 %v6746_v0  ;;  %828 = vmatmul.mubr.bf16.vlgmr.msra.gmra.mrb[16].mxu1 %v6746_v0 }
  0xb0   :  { %1033 = vmatpush1.bf16.msra.mxu0 %v5145_v8  ;;  %1074 = vmatpush1.bf16.msra.mxu1 %v5149_v9 }
  0xb1   :  { %1034 = vmatprep.subr.bf16.mxu0 %v5151_v10  ;;  %1075 = vmatprep.subr.bf16.mxu1 %v5155_v11 }
  0xb2   :  { %1064 = vmatprep.mubr.bf16.mxu0 %v6746_v0  ;;  %1105 = vmatprep.mubr.bf16.mxu1 %v6746_v0  ;;  %v5237_v0 = vld [vmem:[#allocation8 + $0xe8] ss:$16 sps:$4 sm:$0xff]  }
  0xb3   :  { %7142 = vst [vmem:[#allocation45_spill] sm:$0xff] %v5237_v0 }
  0xb4   :  { %1035 = vmatpush1.bf16.msra.mxu0 %v5159_v12  ;;  %1076 = vmatpush1.bf16.msra.mxu1 %v5161_v13 }
  0xb5   :  { %1036 = vmatprep.subr.bf16.mxu0 %v5163_v14  ;;  %1077 = vmatprep.subr.bf16.mxu1 %v5167_v15 }
  0xb8   :  { %1037 = vmatpush1.bf16.msra.mxu0 %v5171_v16  ;;  %1078 = vmatpush1.bf16.msra.mxu1 %v5173_v17 }
  0xb9   :  { %1038 = vmatprep.subr.bf16.mxu0 %v5177_v18  ;;  %1079 = vmatprep.subr.bf16.mxu1 %v5179_v19 }
  0xbc   :  { %1039 = vmatpush1.bf16.msra.mxu0 %v5185_v20  ;;  %1080 = vmatpush1.bf16.msra.mxu1 %v5187_v21 }
  0xbd   :  { %1040 = vmatprep.subr.bf16.mxu0 %v5189_v22  ;;  %1081 = vmatprep.subr.bf16.mxu1 %v5191_v23 }
  0xc0   :  { %1041 = vmatpush1.bf16.msra.mxu0 %v5197_v24  ;;  %1082 = vmatpush1.bf16.msra.mxu1 %v5199_v25 }
  0xc1   :  { %1042 = vmatprep.subr.bf16.mxu0 %v5201_v26  ;;  %1083 = vmatprep.subr.bf16.mxu1 %v5203_v27 }
  0xc4   :  { %1043 = vmatpush1.bf16.msra.mxu0 %v5211_v28  ;;  %1084 = vmatpush1.bf16.msra.mxu1 %v5213_v29  ;;  %v5265_v29 = vld [vmem:[#allocation9 + $0x28] ss:$16 sps:$4 sm:$0xff]   ;;  %v5305_v28 = vld [vmem:[#allocation9 + $0xa4] ss:$16 sps:$4 sm:$0xff]  }
  0xc5   :  { %1044 = vmatprep.subr.bf16.mxu0 %v5217_v30  ;;  %1085 = vmatprep.subr.bf16.mxu1 %v5219_v31  ;;  %v7143_v31 = vmov 0   ;;  %v5251_v30 = vld [vmem:[#allocation9] ss:$16 sps:$4 sm:$0xff]   ;;  %7151 = vst [vmem:[#allocation53_spill] sm:$0xff] %v5265_v29  ;;  %7164 = vst [vmem:[#allocation66_spill] sm:$0xff] %v5305_v28 }
  0xc6   :  { %7146 = vst [vmem:[#allocation48_spill] sm:$0xff] %v5251_v30 }
  0xc8   :  { %1045 = vmatpush1.bf16.msra.mxu0 %v5223_v32  ;;  %1086 = vmatpush1.bf16.msra.mxu1 %v5225_v35  ;;  %v5247_v35 = vld [vmem:[#allocation9 + $0x4] ss:$16 sps:$4 sm:$0xff]   ;;  %v5249_v32 = vld [vmem:[#allocation9 + $0xc] ss:$16 sps:$4 sm:$0xff]  }
  0xc9   :  { %1046 = vmatprep.subr.bf16.mxu0 %v5229_v44  ;;  %1087 = vmatprep.subr.bf16.mxu1 %v5231_v53  ;;  %7144 = vst [vmem:[#allocation46_spill] sm:$0xff] %v5247_v35  ;;  %7145 = vst [vmem:[#allocation47_spill] sm:$0xff] %v5249_v32  ;;  %v5253_v44 = vld [vmem:[#allocation9 + $0x8] ss:$16 sps:$4 sm:$0xff]   ;;  %v5263_v53 = vld [vmem:[#allocation9 + $0x20] ss:$16 sps:$4 sm:$0xff]  }
  0xca   :  { %7147 = vst [vmem:[#allocation49_spill] sm:$0xff] %v5253_v44  ;;  %7150 = vst [vmem:[#allocation52_spill] sm:$0xff] %v5263_v53 }
  0xcc   :  { %1047 = vmatpush1.bf16.msra.mxu0 %v5235_v62  ;;  %1088 = vmatpush1.bf16.msra.mxu1 %v5237_v0  ;;  %v5259_v0 = vld [vmem:[#allocation9 + $0x24] ss:$16 sps:$4 sm:$0xff]   ;;  %v5261_v62 = vld [vmem:[#allocation9 + $0x2c] ss:$16 sps:$4 sm:$0xff]  }
  0xcd   :  { %1335 = vmatprep.subr.bf16.mxu0 %v5247_v35  ;;  %1376 = vmatprep.subr.bf16.mxu1 %v5249_v32  ;;  %7148 = vst [vmem:[#allocation50_spill] sm:$0xff] %v5259_v0  ;;  %7149 = vst [vmem:[#allocation51_spill] sm:$0xff] %v5261_v62  ;;  %v5271_v32 = vld [vmem:[#allocation9 + $0x44] ss:$16 sps:$4 sm:$0xff]   ;;  %v5277_v35 = vld [vmem:[#allocation9 + $0x48] ss:$16 sps:$4 sm:$0xff]  }
  0xce   :  { %7152 = vst [vmem:[#allocation54_spill] sm:$0xff] %v5271_v32  ;;  %7155 = vst [vmem:[#allocation57_spill] sm:$0xff] %v5277_v35 }
  0xcf   :  { %1065 = vmatmul.mubr.bf16.vlgmr.msra.gmra.mrb[20].mxu0 %v7143_v31  ;;  %1106 = vmatmul.mubr.bf16.vlgmr.msra.gmra.mrb[20].mxu1 %v7143_v31 }
  0xd0   :  { %1367 = vmatprep.mubr.bf16.mxu0 %v7143_v31  ;;  %1408 = vmatprep.mubr.bf16.mxu1 %v7143_v31 }
  0xd1   :  { %1336 = vmatpush1.bf16.msra.mxu0 %v5251_v30  ;;  %1377 = vmatpush1.bf16.msra.mxu1 %v5253_v44  ;;  %v5273_v30 = vld [vmem:[#allocation9 + $0x4c] ss:$16 sps:$4 sm:$0xff]   ;;  %v5275_v44 = vld [vmem:[#allocation9 + $0x40] ss:$16 sps:$4 sm:$0xff]  }
  0xd2   :  { %1337 = vmatprep.subr.bf16.mxu0 %v5259_v0  ;;  %1378 = vmatprep.subr.bf16.mxu1 %v5261_v62  ;;  %7153 = vst [vmem:[#allocation55_spill] sm:$0xff] %v5273_v30  ;;  %7154 = vst [vmem:[#allocation56_spill] sm:$0xff] %v5275_v44  ;;  %v5283_v62 = vld [vmem:[#allocation9 + $0x64] ss:$16 sps:$4 sm:$0xff]   ;;  %v5289_v0 = vld [vmem:[#allocation9 + $0x68] ss:$16 sps:$4 sm:$0xff]  }
  0xd3   :  { %7156 = vst [vmem:[#allocation58_spill] sm:$0xff] %v5283_v62  ;;  %7159 = vst [vmem:[#allocation61_spill] sm:$0xff] %v5289_v0 }
  0xd5   :  { %1338 = vmatpush1.bf16.msra.mxu0 %v5263_v53  ;;  %1379 = vmatpush1.bf16.msra.mxu1 %v5265_v29  ;;  %v5285_v53 = vld [vmem:[#allocation9 + $0x6c] ss:$16 sps:$4 sm:$0xff]   ;;  %v5287_v29 = vld [vmem:[#allocation9 + $0x60] ss:$16 sps:$4 sm:$0xff]  }
  0xd6   :  { %1339 = vmatprep.subr.bf16.mxu0 %v5271_v32  ;;  %1380 = vmatprep.subr.bf16.mxu1 %v5273_v30  ;;  %7157 = vst [vmem:[#allocation59_spill] sm:$0xff] %v5285_v53  ;;  %7158 = vst [vmem:[#allocation60_spill] sm:$0xff] %v5287_v29  ;;  %v5295_v30 = vld [vmem:[#allocation9 + $0x84] ss:$16 sps:$4 sm:$0xff]   ;;  %v5301_v32 = vld [vmem:[#allocation9 + $0x88] ss:$16 sps:$4 sm:$0xff]  }
  0xd7   :  { %7160 = vst [vmem:[#allocation62_spill] sm:$0xff] %v5295_v30  ;;  %7163 = vst [vmem:[#allocation65_spill] sm:$0xff] %v5301_v32 }
  0xd9   :  { %1340 = vmatpush1.bf16.msra.mxu0 %v5275_v44  ;;  %1381 = vmatpush1.bf16.msra.mxu1 %v5277_v35  ;;  %v5297_v44 = vld [vmem:[#allocation9 + $0x8c] ss:$16 sps:$4 sm:$0xff]   ;;  %v5299_v35 = vld [vmem:[#allocation9 + $0x80] ss:$16 sps:$4 sm:$0xff]  }
  0xda   :  { %1341 = vmatprep.subr.bf16.mxu0 %v5283_v62  ;;  %1382 = vmatprep.subr.bf16.mxu1 %v5285_v53  ;;  %7161 = vst [vmem:[#allocation63_spill] sm:$0xff] %v5297_v44  ;;  %7162 = vst [vmem:[#allocation64_spill] sm:$0xff] %v5299_v35  ;;  %v5307_v62 = vld [vmem:[#allocation9 + $0xac] ss:$16 sps:$4 sm:$0xff]   ;;  %v5317_v53 = vld [vmem:[#allocation9 + $0xc4] ss:$16 sps:$4 sm:$0xff]  }
  0xdb   :  { %7165 = vst [vmem:[#allocation67_spill] sm:$0xff] %v5307_v62  ;;  %7168 = vst [vmem:[#allocation70_spill] sm:$0xff] %v5317_v53 }
  0xdd   :  { %1342 = vmatpush1.bf16.msra.mxu0 %v5287_v29  ;;  %1383 = vmatpush1.bf16.msra.mxu1 %v5289_v0  ;;  %v5311_v0 = vld [vmem:[#allocation9 + $0xa0] ss:$16 sps:$4 sm:$0xff]   ;;  %v5313_v29 = vld [vmem:[#allocation9 + $0xa8] ss:$16 sps:$4 sm:$0xff]  }
  0xde   :  { %1343 = vmatprep.subr.bf16.mxu0 %v5295_v30  ;;  %1384 = vmatprep.subr.bf16.mxu1 %v5297_v44  ;;  %7166 = vst [vmem:[#allocation68_spill] sm:$0xff] %v5311_v0  ;;  %7167 = vst [vmem:[#allocation69_spill] sm:$0xff] %v5313_v29  ;;  %v5319_v30 = vld [vmem:[#allocation9 + $0xcc] ss:$16 sps:$4 sm:$0xff]   ;;  %v5323_v44 = vld [vmem:[#allocation9 + $0xc0] ss:$16 sps:$4 sm:$0xff]  }
  0xdf   :  { %7169 = vst [vmem:[#allocation71_spill] sm:$0xff] %v5319_v30  ;;  %7170 = vst [vmem:[#allocation72_spill] sm:$0xff] %v5323_v44 }
  0xe1   :  { %1344 = vmatpush1.bf16.msra.mxu0 %v5299_v35  ;;  %1385 = vmatpush1.bf16.msra.mxu1 %v5301_v32  ;;  %v5325_v35 = vld [vmem:[#allocation9 + $0xc8] ss:$16 sps:$4 sm:$0xff]   ;;  %v5329_v32 = vld [vmem:[#allocation9 + $0xe4] ss:$16 sps:$4 sm:$0xff]  }
  0xe2   :  { %1345 = vmatprep.subr.bf16.mxu0 %v5305_v28  ;;  %1386 = vmatprep.subr.bf16.mxu1 %v5307_v62  ;;  %7171 = vst [vmem:[#allocation73_spill] sm:$0xff] %v5325_v35  ;;  %7172 = vst [vmem:[#allocation74_spill] sm:$0xff] %v5329_v32  ;;  %v5331_v28 = vld [vmem:[#allocation9 + $0xec] ss:$16 sps:$4 sm:$0xff]   ;;  %v5335_v62 = vld [vmem:[#allocation9 + $0xe0] ss:$16 sps:$4 sm:$0xff]  }
  0xe3   :  { %7173 = vst [vmem:[#allocation75_spill] sm:$0xff] %v5331_v28  ;;  %7174 = vst [vmem:[#allocation76_spill] sm:$0xff] %v5335_v62 }
  0xe5   :  { %1346 = vmatpush1.bf16.msra.mxu0 %v5311_v0  ;;  %1387 = vmatpush1.bf16.msra.mxu1 %v5313_v29  ;;  %v5337_v0 = vld [vmem:[#allocation9 + $0xe8] ss:$16 sps:$4 sm:$0xff]  }
  0xe6   :  { %1347 = vmatprep.subr.bf16.mxu0 %v5317_v53  ;;  %1388 = vmatprep.subr.bf16.mxu1 %v5319_v30  ;;  %7175 = vst [vmem:[#allocation77_spill] sm:$0xff] %v5337_v0  ;;  %v158_v30 = vlaneseq }
  0xe9   :  { %1348 = vmatpush1.bf16.msra.mxu0 %v5323_v44  ;;  %1389 = vmatpush1.bf16.msra.mxu1 %v5325_v35  ;;  %v5345_v44 = vshrl.u32 %v158_v30, 7 }
  0xea   :  { %1349 = vmatprep.subr.bf16.mxu0 %v5329_v32  ;;  %1390 = vmatprep.subr.bf16.mxu1 %v5331_v28  ;;  %v156_v32 = vld [vmem:[%s6739_s3] sm:$0xf] }
  0xeb   :  { %v6837_v35 = vsub.s32 0, %v5345_v44  ;;  %v6839_v53 = vsub.s32 2, %v5345_v44  ;;  %v6842_v28 = vsub.s32 3, %v5345_v44 }
  0xed   :  { %1350 = vmatpush1.bf16.msra.mxu0 %v5335_v62  ;;  %1391 = vmatpush1.bf16.msra.mxu1 %v5337_v0  ;;  %v6846_v62 = vsub.s32 1, %v5345_v44  ;;  %v5364_v29 = vrot.slane %v156_v32, %v6842_v28 }
  0xee   :  { %1446 = vmatprep.subr.bf16.mxu0 %v5039_v33  ;;  %1487 = vmatprep.subr.bf16.mxu1 %v5041_v34  ;;  %v5356_v33 = vrot.slane %v156_v32, %v6837_v35  ;;  %v5360_v34 = vrot.slane %v156_v32, %v6839_v53 }
  0xef   :  { %v165_v25 = vrot.slane %v156_v32, %v6846_v62 }
 0x162   :  { %v396_v30 = vpop.f32.mrb[0].mxu0  ;;  %v469_v0 = vpop.f32.mrb[0].mxu1 }
 0x163   :  { %v398_v27 = vpop.f32.mrb[1].mxu0  ;;  %v471_v26 = vpop.f32.mrb[1].mxu1 }
 0x164   :  { %v400_v24 = vpop.f32.mrb[2].mxu0  ;;  %v473_v23 = vpop.f32.mrb[2].mxu1 }
 0x165   :  { %v5369_v35 = vadd.f32 %v400_v24, %v5356_v33  ;;  %v402_v22 = vpop.f32.mrb[3].mxu0  ;;  %v5372_v53 = vadd.f32 %v473_v23, %v5360_v34  ;;  %v475_v21 = vpop.f32.mrb[3].mxu1 }
 0x166   :  { %v5374_v20 = vadd.f32 %v402_v22, %v165_v25  ;;  %v5377_v28 = vadd.f32 %v475_v21, %v5364_v29 }
 0x167   :  { %7176 = vst [vmem:[#allocation78_spill] sm:$0xff] %v5369_v35  ;;  %7177 = vst [vmem:[#allocation79_spill] sm:$0xff] %v5372_v53 }
 0x168   :  { %7178 = vst [vmem:[#allocation80_spill] sm:$0xff] %v5374_v20  ;;  %7179 = vst [vmem:[#allocation81_spill] sm:$0xff] %v5377_v28 }
 0x16a   :  { %v406_v19 = vpop.f32.mrb[4].mxu0  ;;  %v479_v18 = vpop.f32.mrb[4].mxu1 }
 0x16b   :  { %v5380_v17 = vadd.f32 %v406_v19, %v5356_v33  ;;  %v408_v32 = vpop.f32.mrb[5].mxu0  ;;  %v5383_v62 = vadd.f32 %v479_v18, %v5360_v34  ;;  %v481_v24 = vpop.f32.mrb[5].mxu1 }
 0x16c   :  { %v5385_v35 = vadd.f32 %v408_v32, %v165_v25  ;;  %v410_v23 = vpop.f32.mrb[6].mxu0  ;;  %v5388_v53 = vadd.f32 %v481_v24, %v5364_v29  ;;  %v483_v22 = vpop.f32.mrb[6].mxu1 }
 0x16d   :  { %7180 = vst [vmem:[#allocation82_spill] sm:$0xff] %v5380_v17  ;;  %7181 = vst [vmem:[#allocation83_spill] sm:$0xff] %v5383_v62  ;;  %v5391_v21 = vadd.f32 %v410_v23, %v5356_v33  ;;  %v412_v28 = vpop.f32.mrb[7].mxu0  ;;  %v5394_v20 = vadd.f32 %v483_v22, %v5360_v34  ;;  %v485_v19 = vpop.f32.mrb[7].mxu1 }
 0x16e   :  { %7182 = vst [vmem:[#allocation84_spill] sm:$0xff] %v5385_v35  ;;  %7183 = vst [vmem:[#allocation85_spill] sm:$0xff] %v5388_v53  ;;  %v5396_v17 = vadd.f32 %v412_v28, %v165_v25  ;;  %v5399_v18 = vadd.f32 %v485_v19, %v5364_v29 }
 0x16f   :  { %7184 = vst [vmem:[#allocation86_spill] sm:$0xff] %v5391_v21  ;;  %7185 = vst [vmem:[#allocation87_spill] sm:$0xff] %v5394_v20 }
 0x170   :  { %7186 = vst [vmem:[#allocation88_spill] sm:$0xff] %v5396_v17  ;;  %7187 = vst [vmem:[#allocation89_spill] sm:$0xff] %v5399_v18 }
 0x172   :  { %v416_v32 = vpop.f32.mrb[8].mxu0  ;;  %v489_v35 = vpop.f32.mrb[8].mxu1 }
 0x173   :  { %v5402_v62 = vadd.f32 %v416_v32, %v5356_v33  ;;  %v418_v24 = vpop.f32.mrb[9].mxu0  ;;  %v5405_v53 = vadd.f32 %v489_v35, %v5360_v34  ;;  %v491_v23 = vpop.f32.mrb[9].mxu1 }
 0x174   :  { %v5407_v21 = vadd.f32 %v418_v24, %v165_v25  ;;  %v420_v22 = vpop.f32.mrb[10].mxu0  ;;  %v5410_v20 = vadd.f32 %v491_v23, %v5364_v29  ;;  %v493_v28 = vpop.f32.mrb[10].mxu1 }
 0x175   :  { %7188 = vst [vmem:[#allocation90_spill] sm:$0xff] %v5402_v62  ;;  %7189 = vst [vmem:[#allocation91_spill] sm:$0xff] %v5405_v53  ;;  %v5413_v19 = vadd.f32 %v420_v22, %v5356_v33  ;;  %v422_v18 = vpop.f32.mrb[11].mxu0  ;;  %v5416_v17 = vadd.f32 %v493_v28, %v5360_v34  ;;  %v495_v32 = vpop.f32.mrb[11].mxu1 }
 0x176   :  { %7190 = vst [vmem:[#allocation92_spill] sm:$0xff] %v5407_v21  ;;  %7191 = vst [vmem:[#allocation93_spill] sm:$0xff] %v5410_v20  ;;  %v5418_v62 = vadd.f32 %v422_v18, %v165_v25  ;;  %v5421_v35 = vadd.f32 %v495_v32, %v5364_v29 }
 0x177   :  { %7192 = vst [vmem:[#allocation94_spill] sm:$0xff] %v5413_v19  ;;  %7193 = vst [vmem:[#allocation95_spill] sm:$0xff] %v5416_v17 }
 0x178   :  { %7194 = vst [vmem:[#allocation96_spill] sm:$0xff] %v5418_v62  ;;  %7195 = vst [vmem:[#allocation97_spill] sm:$0xff] %v5421_v35 }
 0x17a   :  { %v426_v24 = vpop.f32.mrb[12].mxu0  ;;  %v499_v21 = vpop.f32.mrb[12].mxu1 }
 0x17b   :  { %v5424_v53 = vadd.f32 %v426_v24, %v5356_v33  ;;  %v428_v23 = vpop.f32.mrb[13].mxu0  ;;  %v5427_v20 = vadd.f32 %v499_v21, %v5360_v34  ;;  %v501_v22 = vpop.f32.mrb[13].mxu1 }
 0x17c   :  { %v5429_v19 = vadd.f32 %v428_v23, %v165_v25  ;;  %v430_v28 = vpop.f32.mrb[14].mxu0  ;;  %v5432_v17 = vadd.f32 %v501_v22, %v5364_v29  ;;  %v503_v18 = vpop.f32.mrb[14].mxu1  ;;  %v397_v23 = vadd.f32 %v396_v30, %v5356_v33  ;;  %v399_v22 = vadd.f32 %v398_v27, %v165_v25 }
 0x17d   :  { %7196 = vst [vmem:[#allocation98_spill] sm:$0xff] %v5424_v53  ;;  %7197 = vst [vmem:[#allocation99_spill] sm:$0xff] %v5427_v20  ;;  %v5435_v32 = vadd.f32 %v430_v28, %v5356_v33  ;;  %v432_v35 = vpop.f32.mrb[15].mxu0  ;;  %v5438_v62 = vadd.f32 %v503_v18, %v5360_v34  ;;  %v505_v24 = vpop.f32.mrb[15].mxu1 }
 0x17e   :  { %7198 = vst [vmem:[#allocation100_spill] sm:$0xff] %v5429_v19  ;;  %7199 = vst [vmem:[#allocation101_spill] sm:$0xff] %v5432_v17  ;;  %v5440_v53 = vadd.f32 %v432_v35, %v165_v25  ;;  %v5443_v21 = vadd.f32 %v505_v24, %v5364_v29  ;;  %v470_v19 = vadd.f32 %v469_v0, %v5360_v34 }
 0x17f   :  { %7200 = vst [vmem:[#allocation102_spill] sm:$0xff] %v5435_v32  ;;  %7201 = vst [vmem:[#allocation103_spill] sm:$0xff] %v5438_v62  ;;  %v472_v17 = vadd.f32 %v471_v26, %v5364_v29 }
 0x180   :  { %7202 = vst [vmem:[#allocation104_spill] sm:$0xff] %v5440_v53  ;;  %7203 = vst [vmem:[#allocation105_spill] sm:$0xff] %v5443_v21 }
 0x1a2   :  { %v1066_v20 = vpop.f32.mrb[20].mxu0  ;;  %v1107_v28 = vpop.f32.mrb[20].mxu1 }
 0x1a3   :  { %v1114_v32 = vadd.f32 %v1066_v20, %v397_v23  ;;  %v1116_v16 = vadd.f32 %v1107_v28, %v470_v19  ;;  %v1068_v15 = vpop.f32.mrb[21].mxu0  ;;  %v1109_v18 = vpop.f32.mrb[21].mxu1 }
 0x1a4   :  { %v1115_v62 = vadd.f32 %v1068_v15, %v399_v22  ;;  %v1117_v14 = vadd.f32 %v1109_v18, %v472_v17  ;;  %v1070_v35 = vpop.f32.mrb[22].mxu0  ;;  %v1111_v53 = vpop.f32.mrb[22].mxu1 }
 0x1a5   :  { %v3839_v13 = vmul.f32 -1.442695, %v1114_v32  ;;  %v1071_v24 = vpop.f32.mrb[23].mxu0  ;;  %v1112_v21 = vpop.f32.mrb[23].mxu1  ;;  %v7209_v35 = vld [vmem:[#allocation20_spill] sm:$0xff] }
 0x1a6   :  { %v3840_v12 = vmul.f32 -1.442695, %v1115_v62  ;;  %v3841_v0 = vmul.f32 -1.442695, %v1117_v14  ;;  %v7210_v24 = vld [vmem:[#allocation21_spill] sm:$0xff] }
 0x1a7   :  { %4271 = vpow2.f32 %v3839_v13 }
 0x1a8   :  { %4273 = vpow2.f32 %v3840_v12 }
 0x1a9   :  { %4275 = vpow2.f32 %v3841_v0  ;;  %v7211_v0 = vld [vmem:[#allocation22_spill] sm:$0xff] }
 0x1aa   :  { %4277 = vtanh.f32 %v1116_v16 }
 0x1b1   :  { %v4272_v25 = vpop.eup %4271 }
 0x1b2   :  { %v4274_v27 = vpop.eup %4273  ;;  %v1121_v26 = vadd.f32 1.0, %v4272_v25  ;;  %v7212_v25 = vld [vmem:[#allocation23_spill] sm:$0xff] }
 0x1b3   :  { %v1127_v20 = vadd.f32 1.0, %v4274_v27  ;;  %v4276_v29 = vpop.eup %4275  ;;  %v7213_v27 = vld [vmem:[#allocation24_spill] sm:$0xff] }
 0x1b4   :  { %4279 = vrcp.f32 %v1121_v26  ;;  %v4278_v15 = vpop.eup %4277  ;;  %v1134_v34 = vadd.f32 1.0, %v4276_v29  ;;  %v7218_v26 = vld [vmem:[#allocation29_spill] sm:$0xff]  ;;  %v7220_v29 = vld [vmem:[#allocation31_spill] sm:$0xff] }
 0x1b5   :  { %4281 = vrcp.f32 %v1127_v20  ;;  %v7219_v20 = vld [vmem:[#allocation30_spill] sm:$0xff] }
 0x1b6   :  { %4283 = vrcp.f32 %v1134_v34  ;;  %v7225_v34 = vld [vmem:[#allocation36_spill] sm:$0xff] }
 0x1be   :  { %v4280_v17 = vpop.eup %4279 }
 0x1bf   :  { %v4282_v33 = vpop.eup %4281  ;;  %v1138_v53 = vmul.f32 %v4280_v17, %v4278_v15  ;;  %v7221_v15 = vld [vmem:[#allocation32_spill] sm:$0xff]  ;;  %v7222_v17 = vld [vmem:[#allocation33_spill] sm:$0xff] }
 0x1c0   :  { %v1137_v30 = vmul.f32 0.0, %v4282_v33  ;;  %v4284_v12 = vpop.eup %4283  ;;  %v7223_v33 = vld [vmem:[#allocation34_spill] sm:$0xff] }
 0x1c2   :  { %v5448_v19 = vadd.f32 %v1138_v53, %v1137_v30  ;;  %v7224_v53 = vld [vmem:[#allocation35_spill] sm:$0xff]  ;;  %v7226_v30 = vld [vmem:[#allocation37_spill] sm:$0xff] }
 0x1c4   :  { %4285 = vtanh.f32 %v5448_v19 }
 0x1ce   :  { %v4286_v13 = vpop.eup %4285 }
 0x1cf   :  { %v1141_v14 = vmul.f32 %v4286_v13, %v4284_v12  ;;  %v7227_v12 = vld [vmem:[#allocation38_spill] sm:$0xff]  ;;  %v7228_v13 = vld [vmem:[#allocation39_spill] sm:$0xff] }
 0x1d1   :  { %v5451_v62 = vpack.c.bf16 %v1141_v14, %v1141_v14  ;;  %v7229_v14 = vld [vmem:[#allocation40_spill] sm:$0xff] }
 0x1d3   :  { %1368 = vmatmul.mubr.bf16.vlgmr.msra.gmra.mrb[16].mxu0 %v5451_v62  ;;  %1409 = vmatmul.mubr.bf16.vlgmr.msra.gmra.mrb[16].mxu1 %v5451_v62 }
 0x1d4   :  { %1447 = vmatpush1.bf16.msra.mxu0 %v5043_v36  ;;  %1488 = vmatpush1.bf16.msra.mxu1 %v5045_v37  ;;  %v540_v36 = vld [vmem:[%s6742_s6] sm:$0xf]  ;;  %v7204_v37 = vsub.s32 0, %v5345_v44 }
 0x1d5   :  { %1448 = vmatprep.subr.bf16.mxu0 %v5049_v38  ;;  %1489 = vmatprep.subr.bf16.mxu1 %v5051_v39  ;;  %v7206_v39 = vsub.s32 1, %v5345_v44 }
 0x1d6   :  { %1478 = vmatprep.mubr.bf16.mxu0 %v7143_v31  ;;  %1519 = vmatprep.mubr.bf16.mxu1 %v7143_v31  ;;  %v5494_v38 = vrot.slane %v540_v36, %v7204_v37  ;;  %v7231_v37 = vld [vmem:[#allocation42_spill] sm:$0xff] }
 0x1d8   :  { %1449 = vmatpush1.bf16.msra.mxu0 %v5053_v40  ;;  %1490 = vmatpush1.bf16.msra.mxu1 %v5057_v41  ;;  %7205 = vst [vmem:[#allocation106_spill] sm:$0xff] %v5494_v38  ;;  %v5498_v40 = vrot.slane %v540_v36, %v7206_v39  ;;  %v7232_v39 = vld [vmem:[#allocation43_spill] sm:$0xff] }
 0x1d9   :  { %1450 = vmatprep.subr.bf16.mxu0 %v5061_v42  ;;  %1491 = vmatprep.subr.bf16.mxu1 %v5063_v43 }
 0x1dc   :  { %1451 = vmatpush1.bf16.msra.mxu0 %v5067_v45  ;;  %1492 = vmatpush1.bf16.msra.mxu1 %v5069_v46 }
 0x1dd   :  { %1452 = vmatprep.subr.bf16.mxu0 %v5073_v47  ;;  %1493 = vmatprep.subr.bf16.mxu1 %v5077_v48 }
 0x1e0   :  { %1453 = vmatpush1.bf16.msra.mxu0 %v5079_v49  ;;  %1494 = vmatpush1.bf16.msra.mxu1 %v5081_v50 }
 0x1e1   :  { %1454 = vmatprep.subr.bf16.mxu0 %v5085_v51  ;;  %1495 = vmatprep.subr.bf16.mxu1 %v5089_v52 }
 0x1e4   :  { %1455 = vmatpush1.bf16.msra.mxu0 %v5093_v54  ;;  %1496 = vmatpush1.bf16.msra.mxu1 %v5097_v55  ;;  %v7207_v55 = vsub.s32 3, %v5345_v44 }
 0x1e5   :  { %1456 = vmatprep.subr.bf16.mxu0 %v5099_v56  ;;  %1497 = vmatprep.subr.bf16.mxu1 %v5103_v57 }
 0x1e6   :  { %v5504_v56 = vrot.slane %v540_v36, %v7207_v55  ;;  %v7246_v55 = vld [vmem:[#allocation57_spill] sm:$0xff] }
 0x1e8   :  { %1457 = vmatpush1.bf16.msra.mxu0 %v5105_v58  ;;  %1498 = vmatpush1.bf16.msra.mxu1 %v5107_v59  ;;  %v7208_v58 = vsub.s32 2, %v5345_v44 }
 0x1e9   :  { %1458 = vmatprep.subr.bf16.mxu0 %v5111_v60  ;;  %1499 = vmatprep.subr.bf16.mxu1 %v5115_v61 }
 0x1ea   :  { %v5509_v59 = vrot.slane %v540_v36, %v7208_v58  ;;  %v7230_v36 = vld [vmem:[#allocation41_spill] sm:$0xff]  ;;  %v7248_v58 = vld [vmem:[#allocation59_spill] sm:$0xff] }
 0x1ec   :  { %1459 = vmatpush1.bf16.msra.mxu0 %v5119_v63  ;;  %1500 = vmatpush1.bf16.msra.mxu1 %v5123_v1 }
 0x1ed   :  { %1460 = vmatprep.subr.bf16.mxu0 %v5125_v2  ;;  %1501 = vmatprep.subr.bf16.mxu1 %v5129_v3 }
 0x1f0   :  { %1461 = vmatpush1.bf16.msra.mxu0 %v5131_v4  ;;  %1502 = vmatpush1.bf16.msra.mxu1 %v5133_v5 }
 0x1f1   :  { %1533 = vmatprep.subr.bf16.mxu0 %v5137_v6  ;;  %1574 = vmatprep.subr.bf16.mxu1 %v5141_v7 }
 0x2a6   :  { %v1369_v41 = vpop.f32.mrb[16].mxu0  ;;  %v1410_v42 = vpop.f32.mrb[16].mxu1 }
 0x2a7   :  { %v3957_v43 = vadd.f32 %v1369_v41, %v5494_v38  ;;  %v1371_v45 = vpop.f32.mrb[17].mxu0  ;;  %v1412_v46 = vpop.f32.mrb[17].mxu1  ;;  %v3959_v61 = vadd.f32 %v1410_v42, %v5509_v59  ;;  %v7233_v41 = vld [vmem:[#allocation44_spill] sm:$0xff]  ;;  %v7234_v42 = vld [vmem:[#allocation45_spill] sm:$0xff] }
 0x2a8   :  { %v3958_v47 = vadd.f32 %v1371_v45, %v5498_v40  ;;  %v1373_v48 = vpop.f32.mrb[18].mxu0  ;;  %v1414_v49 = vpop.f32.mrb[18].mxu1  ;;  %v3960_v57 = vadd.f32 %v1412_v46, %v5504_v56  ;;  %v7236_v45 = vld [vmem:[#allocation47_spill] sm:$0xff]  ;;  %v7237_v46 = vld [vmem:[#allocation48_spill] sm:$0xff] }
 0x2a9   :  { %v3874_v50 = vmul.f32 -1.442695, %v3957_v43  ;;  %v1374_v51 = vpop.f32.mrb[19].mxu0  ;;  %v1415_v52 = vpop.f32.mrb[19].mxu1  ;;  %v7235_v43 = vld [vmem:[#allocation46_spill] sm:$0xff]  ;;  %v7240_v49 = vld [vmem:[#allocation51_spill] sm:$0xff] }
 0x2aa   :  { %v3875_v54 = vmul.f32 -1.442695, %v3958_v47  ;;  %v3876_v60 = vmul.f32 -1.442695, %v3960_v57  ;;  %v7238_v47 = vld [vmem:[#allocation49_spill] sm:$0xff]  ;;  %v7239_v48 = vld [vmem:[#allocation50_spill] sm:$0xff] }
 0x2ab   :  { %4287 = vpow2.f32 %v3874_v50  ;;  %v7241_v50 = vld [vmem:[#allocation52_spill] sm:$0xff]  ;;  %v7242_v51 = vld [vmem:[#allocation53_spill] sm:$0xff]  ;;  %v7243_v52 = vld [vmem:[#allocation54_spill] sm:$0xff] }
 0x2ac   :  { %4289 = vpow2.f32 %v3875_v54  ;;  %v7244_v54 = vld [vmem:[#allocation55_spill] sm:$0xff]  ;;  %v7247_v57 = vld [vmem:[#allocation58_spill] sm:$0xff] }
 0x2ad   :  { %4291 = vpow2.f32 %v3876_v60  ;;  %v7249_v60 = vld [vmem:[#allocation60_spill] sm:$0xff] }
 0x2ae   :  { %4293 = vtanh.f32 %v3959_v61  ;;  %v7250_v61 = vld [vmem:[#allocation61_spill] sm:$0xff] }
 0x2b5   :  { %v4288_v63 = vpop.eup %4287 }
 0x2b6   :  { %v4290_v1 = vpop.eup %4289  ;;  %v1424_v2 = vadd.f32 1.0, %v4288_v63  ;;  %v7251_v63 = vld [vmem:[#allocation62_spill] sm:$0xff] }
 0x2b7   :  { %v1430_v3 = vadd.f32 1.0, %v4290_v1  ;;  %v4292_v4 = vpop.eup %4291  ;;  %v7252_v1 = vld [vmem:[#allocation63_spill] sm:$0xff] }
 0x2b8   :  { %4295 = vrcp.f32 %v1424_v2  ;;  %v4294_v5 = vpop.eup %4293  ;;  %v1437_v32 = vadd.f32 1.0, %v4292_v4  ;;  %v7253_v2 = vld [vmem:[#allocation64_spill] sm:$0xff]  ;;  %v7255_v4 = vld [vmem:[#allocation66_spill] sm:$0xff] }
 0x2b9   :  { %4297 = vrcp.f32 %v1430_v3  ;;  %v7254_v3 = vld [vmem:[#allocation65_spill] sm:$0xff] }
 0x2ba   :  { %4299 = vrcp.f32 %v1437_v32  ;;  %v7260_v32 = vld [vmem:[#allocation71_spill] sm:$0xff] }
 0x2c2   :  { %v4296_v6 = vpop.eup %4295 }
 0x2c3   :  { %v4298_v7 = vpop.eup %4297  ;;  %v1441_v16 = vmul.f32 %v4296_v6, %v4294_v5  ;;  %v7256_v5 = vld [vmem:[#allocation67_spill] sm:$0xff]  ;;  %v7257_v6 = vld [vmem:[#allocation68_spill] sm:$0xff] }
 0x2c4   :  { %v1440_v44 = vmul.f32 0.0, %v4298_v7  ;;  %v4300_v23 = vpop.eup %4299  ;;  %v7258_v7 = vld [vmem:[#allocation69_spill] sm:$0xff] }
 0x2c6   :  { %v5512_v21 = vadd.f32 %v1441_v16, %v1440_v44  ;;  %v7259_v16 = vld [vmem:[#allocation70_spill] sm:$0xff]  ;;  %v7261_v44 = vld [vmem:[#allocation72_spill] sm:$0xff] }
 0x2c8   :  { %4301 = vtanh.f32 %v5512_v21 }
 0x2d2   :  { %v4302_v22 = vpop.eup %4301 }
 0x2d3   :  { %v1444_v28 = vmul.f32 %v4302_v22, %v4300_v23  ;;  %v7262_v23 = vld [vmem:[#allocation73_spill] sm:$0xff]  ;;  %v7263_v22 = vld [vmem:[#allocation74_spill] sm:$0xff] }
 0x2d5   :  { %v1445_v18 = vpack.c.bf16 %v1444_v28, %v1444_v28  ;;  %v7264_v28 = vld [vmem:[#allocation75_spill] sm:$0xff] }
 0x2d7   :  { %1479 = vmatmul.mubr.bf16.vlgmr.msra.gmra.mrb[24].mxu0 %v1445_v18  ;;  %1520 = vmatmul.mubr.bf16.vlgmr.msra.gmra.mrb[24].mxu1 %v1445_v18  ;;  %v7265_v18 = vld [vmem:[#allocation76_spill] sm:$0xff] }
 0x2d8   :  { %1534 = vmatpush1.bf16.msra.mxu0 %v5145_v8  ;;  %1575 = vmatpush1.bf16.msra.mxu1 %v5149_v9  ;;  %v7214_v8 = vld [vmem:[#allocation25_spill] sm:$0xff]  ;;  %v7215_v9 = vld [vmem:[#allocation26_spill] sm:$0xff] }
 0x2d9   :  { %1535 = vmatprep.subr.bf16.mxu0 %v5151_v10  ;;  %1576 = vmatprep.subr.bf16.mxu1 %v5155_v11  ;;  %v7216_v10 = vld [vmem:[#allocation27_spill] sm:$0xff]  ;;  %v7217_v11 = vld [vmem:[#allocation28_spill] sm:$0xff] }
 0x2da   :  { %1565 = vmatprep.mubr.bf16.mxu0 %v7143_v31  ;;  %1606 = vmatprep.mubr.bf16.mxu1 %v7143_v31 }
 0x2dc   :  { %1536 = vmatpush1.bf16.msra.mxu0 %v7209_v35  ;;  %1577 = vmatpush1.bf16.msra.mxu1 %v7210_v24  ;;  %v7266_v35 = vld [vmem:[#allocation77_spill] sm:$0xff] }
 0x2dd   :  { %1537 = vmatprep.subr.bf16.mxu0 %v7211_v0  ;;  %1578 = vmatprep.subr.bf16.mxu1 %v7212_v25  ;;  %v5583_v24 = vld [vmem:[#allocation11 + $0x4] ss:$16 sps:$4 sm:$0xff]   ;;  %v5586_v0 = vld [vmem:[#allocation11 + $0xc] ss:$16 sps:$4 sm:$0xff]  }
 0x2de   :  { %7267 = vst [vmem:[#allocation20_spill] sm:$0xff] %v5583_v24  ;;  %7268 = vst [vmem:[#allocation21_spill] sm:$0xff] %v5586_v0 }
 0x2e0   :  { %1538 = vmatpush1.bf16.msra.mxu0 %v7213_v27  ;;  %1579 = vmatpush1.bf16.msra.mxu1 %v7214_v8  ;;  %v7269_v8 = vld [vmem:[#allocation78_spill] sm:$0xff] }
 0x2e1   :  { %1539 = vmatprep.subr.bf16.mxu0 %v7215_v9  ;;  %1580 = vmatprep.subr.bf16.mxu1 %v7216_v10  ;;  %v7270_v10 = vld [vmem:[#allocation79_spill] sm:$0xff] }
 0x2e4   :  { %1540 = vmatpush1.bf16.msra.mxu0 %v7217_v11  ;;  %1581 = vmatpush1.bf16.msra.mxu1 %v7218_v26 }
 0x2e5   :  { %1541 = vmatprep.subr.bf16.mxu0 %v7219_v20  ;;  %1582 = vmatprep.subr.bf16.mxu1 %v7220_v29  ;;  %v7271_v29 = vld [vmem:[#allocation80_spill] sm:$0xff] }
 0x2e8   :  { %1542 = vmatpush1.bf16.msra.mxu0 %v7221_v15  ;;  %1583 = vmatpush1.bf16.msra.mxu1 %v7222_v17  ;;  %v7272_v17 = vld [vmem:[#allocation81_spill] sm:$0xff] }
 0x2e9   :  { %1543 = vmatprep.subr.bf16.mxu0 %v7223_v33  ;;  %1584 = vmatprep.subr.bf16.mxu1 %v7224_v53 }
 0x2ec   :  { %1544 = vmatpush1.bf16.msra.mxu0 %v7225_v34  ;;  %1585 = vmatpush1.bf16.msra.mxu1 %v7226_v30 }
 0x2ed   :  { %1545 = vmatprep.subr.bf16.mxu0 %v7227_v12  ;;  %1586 = vmatprep.subr.bf16.mxu1 %v7228_v13 }
 0x2f0   :  { %1546 = vmatpush1.bf16.msra.mxu0 %v7229_v14  ;;  %1587 = vmatpush1.bf16.msra.mxu1 %v7230_v36 }
 0x2f1   :  { %1547 = vmatprep.subr.bf16.mxu0 %v7231_v37  ;;  %1588 = vmatprep.subr.bf16.mxu1 %v7232_v39 }
 0x2f4   :  { %1548 = vmatpush1.bf16.msra.mxu0 %v7233_v41  ;;  %1589 = vmatpush1.bf16.msra.mxu1 %v7234_v42 }
 0x2f5   :  { %1644 = vmatprep.subr.bf16.mxu0 %v7235_v43  ;;  %1685 = vmatprep.subr.bf16.mxu1 %v7236_v45 }
 0x2f7   :  { %1566 = vmatmul.mubr.bf16.vlgmr.msra.gmra.mrb[28].mxu0 %v5451_v62  ;;  %1607 = vmatmul.mubr.bf16.vlgmr.msra.gmra.mrb[28].mxu1 %v5451_v62  ;;  %v7245_v62 = vld [vmem:[#allocation56_spill] sm:$0xff] }
 0x2f8   :  { %1645 = vmatpush1.bf16.msra.mxu0 %v7237_v46  ;;  %1686 = vmatpush1.bf16.msra.mxu1 %v7238_v47 }
 0x2f9   :  { %1646 = vmatprep.subr.bf16.mxu0 %v7239_v48  ;;  %1687 = vmatprep.subr.bf16.mxu1 %v7240_v49 }
 0x2fa   :  { %1676 = vmatprep.mubr.bf16.mxu0 %v7143_v31  ;;  %1717 = vmatprep.mubr.bf16.mxu1 %v7143_v31 }
 0x2fc   :  { %1647 = vmatpush1.bf16.msra.mxu0 %v7241_v50  ;;  %1688 = vmatpush1.bf16.msra.mxu1 %v7242_v51 }
 0x2fd   :  { %1648 = vmatprep.subr.bf16.mxu0 %v7243_v52  ;;  %1689 = vmatprep.subr.bf16.mxu1 %v7244_v54 }
 0x300   :  { %1649 = vmatpush1.bf16.msra.mxu0 %v7245_v62  ;;  %1690 = vmatpush1.bf16.msra.mxu1 %v7246_v55 }
 0x301   :  { %1650 = vmatprep.subr.bf16.mxu0 %v7247_v57  ;;  %1691 = vmatprep.subr.bf16.mxu1 %v7248_v58 }
 0x304   :  { %1651 = vmatpush1.bf16.msra.mxu0 %v7249_v60  ;;  %1692 = vmatpush1.bf16.msra.mxu1 %v7250_v61 }
 0x305   :  { %1652 = vmatprep.subr.bf16.mxu0 %v7251_v63  ;;  %1693 = vmatprep.subr.bf16.mxu1 %v7252_v1 }
 0x308   :  { %1653 = vmatpush1.bf16.msra.mxu0 %v7253_v2  ;;  %1694 = vmatpush1.bf16.msra.mxu1 %v7254_v3 }
 0x309   :  { %1654 = vmatprep.subr.bf16.mxu0 %v7255_v4  ;;  %1695 = vmatprep.subr.bf16.mxu1 %v7256_v5 }
 0x30c   :  { %1655 = vmatpush1.bf16.msra.mxu0 %v7257_v6  ;;  %1696 = vmatpush1.bf16.msra.mxu1 %v7258_v7 }
 0x30d   :  { %1656 = vmatprep.subr.bf16.mxu0 %v7259_v16  ;;  %1697 = vmatprep.subr.bf16.mxu1 %v7260_v32 }
 0x310   :  { %1657 = vmatpush1.bf16.msra.mxu0 %v7261_v44  ;;  %1698 = vmatpush1.bf16.msra.mxu1 %v7262_v23 }
 0x311   :  { %1658 = vmatprep.subr.bf16.mxu0 %v7263_v22  ;;  %1699 = vmatprep.subr.bf16.mxu1 %v7264_v28 }
 0x314   :  { %1659 = vmatpush1.bf16.msra.mxu0 %v7265_v18  ;;  %1700 = vmatpush1.bf16.msra.mxu1 %v7266_v35 }
 0x315   :  { %1755 = vmatprep.subr.bf16.mxu0 %v5583_v24  ;;  %1796 = vmatprep.subr.bf16.mxu1 %v5586_v0 }
 0x3ca   :  { %v1567_v25 = vpop.f32.mrb[28].mxu0  ;;  %v1608_v27 = vpop.f32.mrb[28].mxu1 }
 0x3cb   :  { %v1615_v9 = vadd.f32 %v1567_v25, %v7269_v8  ;;  %v1617_v11 = vadd.f32 %v1608_v27, %v7270_v10  ;;  %v1569_v26 = vpop.f32.mrb[29].mxu0  ;;  %v1610_v20 = vpop.f32.mrb[29].mxu1 }
 0x3cc   :  { %v1616_v15 = vadd.f32 %v1569_v26, %v7271_v29  ;;  %v1618_v33 = vadd.f32 %v1610_v20, %v7272_v17  ;;  %v1571_v53 = vpop.f32.mrb[30].mxu0  ;;  %v1612_v35 = vpop.f32.mrb[30].mxu1  ;;  %v5610_v29 = vld [vmem:[#allocation11 + $0x2c] ss:$16 sps:$4 sm:$0xff]   ;;  %v5618_v17 = vld [vmem:[#allocation11 + $0x28] ss:$16 sps:$4 sm:$0xff]  }
 0x3cd   :  { %v3877_v18 = vmul.f32 -1.442695, %v1615_v9  ;;  %v1572_v24 = vpop.f32.mrb[31].mxu0  ;;  %v1613_v28 = vpop.f32.mrb[31].mxu1  ;;  %7273 = vst [vmem:[#allocation22_spill] sm:$0xff] %v5610_v29  ;;  %7275 = vst [vmem:[#allocation24_spill] sm:$0xff] %v5618_v17 }
 0x3ce   :  { %v3878_v22 = vmul.f32 -1.442695, %v1616_v15  ;;  %v3879_v0 = vmul.f32 -1.442695, %v1618_v33  ;;  %v5615_v15 = vld [vmem:[#allocation11 + $0x20] ss:$16 sps:$4 sm:$0xff]  }
 0x3cf   :  { %4303 = vpow2.f32 %v3877_v18  ;;  %7274 = vst [vmem:[#allocation23_spill] sm:$0xff] %v5615_v15  ;;  %v5621_v33 = vld [vmem:[#allocation11 + $0x44] ss:$16 sps:$4 sm:$0xff]   ;;  %v5624_v53 = vld [vmem:[#allocation11 + $0x4c] ss:$16 sps:$4 sm:$0xff]  }
 0x3d0   :  { %4305 = vpow2.f32 %v3878_v22  ;;  %7276 = vst [vmem:[#allocation25_spill] sm:$0xff] %v5621_v33  ;;  %7277 = vst [vmem:[#allocation26_spill] sm:$0xff] %v5624_v53 }
 0x3d1   :  { %4307 = vpow2.f32 %v3879_v0 }
 0x3d2   :  { %4309 = vtanh.f32 %v1617_v11  ;;  %v5604_v11 = vld [vmem:[#allocation11 + $0x8] ss:$16 sps:$4 sm:$0xff]  }
 0x3d9   :  { %v4304_v23 = vpop.eup %4303 }
 0x3da   :  { %v4306_v44 = vpop.eup %4305  ;;  %v1622_v25 = vadd.f32 1.0, %v4304_v23 }
 0x3db   :  { %v1628_v27 = vadd.f32 1.0, %v4306_v44  ;;  %v4308_v8 = vpop.eup %4307  ;;  %v5601_v44 = vld [vmem:[#allocation11] ss:$16 sps:$4 sm:$0xff]  }
 0x3dc   :  { %4311 = vrcp.f32 %v1622_v25  ;;  %v4310_v10 = vpop.eup %4309  ;;  %v1635_v9 = vadd.f32 1.0, %v4308_v8  ;;  %v5627_v25 = vld [vmem:[#allocation11 + $0x40] ss:$16 sps:$4 sm:$0xff]   ;;  %v5633_v8 = vld [vmem:[#allocation11 + $0x64] ss:$16 sps:$4 sm:$0xff]  }
 0x3dd   :  { %4313 = vrcp.f32 %v1628_v27  ;;  %7278 = vst [vmem:[#allocation27_spill] sm:$0xff] %v5627_v25  ;;  %v5630_v27 = vld [vmem:[#allocation11 + $0x48] ss:$16 sps:$4 sm:$0xff]   ;;  %7280 = vst [vmem:[#allocation29_spill] sm:$0xff] %v5633_v8 }
 0x3de   :  { %4315 = vrcp.f32 %v1635_v9  ;;  %7279 = vst [vmem:[#allocation28_spill] sm:$0xff] %v5630_v27  ;;  %v5648_v9 = vld [vmem:[#allocation11 + $0x8c] ss:$16 sps:$4 sm:$0xff]  }
 0x3df   :  { %7285 = vst [vmem:[#allocation34_spill] sm:$0xff] %v5648_v9 }
 0x3e6   :  { %v4312_v26 = vpop.eup %4311 }
 0x3e7   :  { %v4314_v20 = vpop.eup %4313  ;;  %v1639_v35 = vmul.f32 %v4312_v26, %v4310_v10  ;;  %v5636_v10 = vld [vmem:[#allocation11 + $0x6c] ss:$16 sps:$4 sm:$0xff]   ;;  %v5639_v26 = vld [vmem:[#allocation11 + $0x60] ss:$16 sps:$4 sm:$0xff]  }
 0x3e8   :  { %v1638_v28 = vmul.f32 %v4314_v20, %v5448_v19  ;;  %v4316_v22 = vpop.eup %4315  ;;  %v5607_v19 = vld [vmem:[#allocation11 + $0x24] ss:$16 sps:$4 sm:$0xff]   ;;  %7281 = vst [vmem:[#allocation30_spill] sm:$0xff] %v5636_v10  ;;  %7282 = vst [vmem:[#allocation31_spill] sm:$0xff] %v5639_v26  ;;  %v5642_v20 = vld [vmem:[#allocation11 + $0x68] ss:$16 sps:$4 sm:$0xff]  }
 0x3e9   :  { %7283 = vst [vmem:[#allocation32_spill] sm:$0xff] %v5642_v20 }
 0x3ea   :  { %v5594_v24 = vadd.f32 %v1639_v35, %v1638_v28  ;;  %v5645_v35 = vld [vmem:[#allocation11 + $0x84] ss:$16 sps:$4 sm:$0xff]   ;;  %v5651_v28 = vld [vmem:[#allocation11 + $0x80] ss:$16 sps:$4 sm:$0xff]  }
 0x3eb   :  { %7284 = vst [vmem:[#allocation33_spill] sm:$0xff] %v5645_v35  ;;  %7286 = vst [vmem:[#allocation35_spill] sm:$0xff] %v5651_v28 }
 0x3ec   :  { %4317 = vtanh.f32 %v5594_v24 }
 0x3f6   :  { %v4318_v23 = vpop.eup %4317 }
 0x3f7   :  { %v1642_v18 = vmul.f32 %v4318_v23, %v4316_v22  ;;  %v5654_v22 = vld [vmem:[#allocation11 + $0x88] ss:$16 sps:$4 sm:$0xff]   ;;  %v5657_v23 = vld [vmem:[#allocation11 + $0xa4] ss:$16 sps:$4 sm:$0xff]  }
 0x3f8   :  { %7287 = vst [vmem:[#allocation36_spill] sm:$0xff] %v5654_v22  ;;  %7288 = vst [vmem:[#allocation37_spill] sm:$0xff] %v5657_v23 }
 0x3f9   :  { %v5597_v0 = vpack.c.bf16 %v1642_v18, %v1642_v18  ;;  %v5660_v18 = vld [vmem:[#allocation11 + $0xac] ss:$16 sps:$4 sm:$0xff]  }
 0x3fa   :  { %7289 = vst [vmem:[#allocation38_spill] sm:$0xff] %v5660_v18 }
 0x3fb   :  { %1677 = vmatmul.mubr.bf16.vlgmr.msra.gmra.mrb[24].mxu0 %v5597_v0  ;;  %1718 = vmatmul.mubr.bf16.vlgmr.msra.gmra.mrb[24].mxu1 %v5597_v0 }
 0x3fc   :  { %1756 = vmatpush1.bf16.msra.mxu0 %v5601_v44  ;;  %1797 = vmatpush1.bf16.msra.mxu1 %v5604_v11 }
 0x3fd   :  { %1757 = vmatprep.subr.bf16.mxu0 %v5607_v19  ;;  %1798 = vmatprep.subr.bf16.mxu1 %v5610_v29 }
 0x3fe   :  { %1787 = vmatprep.mubr.bf16.mxu0 %v7143_v31  ;;  %1828 = vmatprep.mubr.bf16.mxu1 %v7143_v31 }
 0x400   :  { %1758 = vmatpush1.bf16.msra.mxu0 %v5615_v15  ;;  %1799 = vmatpush1.bf16.msra.mxu1 %v5618_v17 }
 0x401   :  { %1759 = vmatprep.subr.bf16.mxu0 %v5621_v33  ;;  %1800 = vmatprep.subr.bf16.mxu1 %v5624_v53 }
 0x404   :  { %1760 = vmatpush1.bf16.msra.mxu0 %v5627_v25  ;;  %1801 = vmatpush1.bf16.msra.mxu1 %v5630_v27 }
 0x405   :  { %1761 = vmatprep.subr.bf16.mxu0 %v5633_v8  ;;  %1802 = vmatprep.subr.bf16.mxu1 %v5636_v10 }
 0x408   :  { %1762 = vmatpush1.bf16.msra.mxu0 %v5639_v26  ;;  %1803 = vmatpush1.bf16.msra.mxu1 %v5642_v20 }
 0x409   :  { %1763 = vmatprep.subr.bf16.mxu0 %v5645_v35  ;;  %1804 = vmatprep.subr.bf16.mxu1 %v5648_v9  ;;  %v5663_v35 = vld [vmem:[#allocation11 + $0xa0] ss:$16 sps:$4 sm:$0xff]   ;;  %v5666_v9 = vld [vmem:[#allocation11 + $0xa8] ss:$16 sps:$4 sm:$0xff]  }
 0x40a   :  { %7290 = vst [vmem:[#allocation39_spill] sm:$0xff] %v5663_v35  ;;  %7291 = vst [vmem:[#allocation40_spill] sm:$0xff] %v5666_v9 }
 0x40c   :  { %1764 = vmatpush1.bf16.msra.mxu0 %v5651_v28  ;;  %1805 = vmatpush1.bf16.msra.mxu1 %v5654_v22  ;;  %v5669_v28 = vld [vmem:[#allocation11 + $0xc4] ss:$16 sps:$4 sm:$0xff]   ;;  %v5672_v22 = vld [vmem:[#allocation11 + $0xcc] ss:$16 sps:$4 sm:$0xff]  }
 0x40d   :  { %1765 = vmatprep.subr.bf16.mxu0 %v5657_v23  ;;  %1806 = vmatprep.subr.bf16.mxu1 %v5660_v18  ;;  %7292 = vst [vmem:[#allocation41_spill] sm:$0xff] %v5669_v28  ;;  %7293 = vst [vmem:[#allocation42_spill] sm:$0xff] %v5672_v22  ;;  %v5675_v23 = vld [vmem:[#allocation11 + $0xc0] ss:$16 sps:$4 sm:$0xff]   ;;  %v5678_v18 = vld [vmem:[#allocation11 + $0xc8] ss:$16 sps:$4 sm:$0xff]  }
 0x40e   :  { %7294 = vst [vmem:[#allocation43_spill] sm:$0xff] %v5675_v23  ;;  %7295 = vst [vmem:[#allocation44_spill] sm:$0xff] %v5678_v18 }
 0x410   :  { %1766 = vmatpush1.bf16.msra.mxu0 %v5663_v35  ;;  %1807 = vmatpush1.bf16.msra.mxu1 %v5666_v9  ;;  %v5681_v35 = vld [vmem:[#allocation11 + $0xe4] ss:$16 sps:$4 sm:$0xff]   ;;  %v5684_v9 = vld [vmem:[#allocation11 + $0xec] ss:$16 sps:$4 sm:$0xff]  }
 0x411   :  { %1767 = vmatprep.subr.bf16.mxu0 %v5669_v28  ;;  %1808 = vmatprep.subr.bf16.mxu1 %v5672_v22  ;;  %7296 = vst [vmem:[#allocation45_spill] sm:$0xff] %v5681_v35  ;;  %7297 = vst [vmem:[#allocation46_spill] sm:$0xff] %v5684_v9  ;;  %v5687_v28 = vld [vmem:[#allocation11 + $0xe0] ss:$16 sps:$4 sm:$0xff]   ;;  %v5690_v22 = vld [vmem:[#allocation11 + $0xe8] ss:$16 sps:$4 sm:$0xff]  }
 0x412   :  { %7298 = vst [vmem:[#allocation47_spill] sm:$0xff] %v5687_v28  ;;  %7299 = vst [vmem:[#allocation48_spill] sm:$0xff] %v5690_v22 }
 0x414   :  { %1768 = vmatpush1.bf16.msra.mxu0 %v5675_v23  ;;  %1809 = vmatpush1.bf16.msra.mxu1 %v5678_v18  ;;  %v5693_v23 = vld [vmem:[#allocation8 + $0x4] ss:$16 sps:$4 sm:$0xff]   ;;  %v5696_v18 = vld [vmem:[#allocation8 + $0xc] ss:$16 sps:$4 sm:$0xff]  }
 0x415   :  { %1769 = vmatprep.subr.bf16.mxu0 %v5681_v35  ;;  %1810 = vmatprep.subr.bf16.mxu1 %v5684_v9  ;;  %7300 = vst [vmem:[#allocation49_spill] sm:$0xff] %v5693_v23  ;;  %7301 = vst [vmem:[#allocation50_spill] sm:$0xff] %v5696_v18 }
 0x418   :  { %1770 = vmatpush1.bf16.msra.mxu0 %v5687_v28  ;;  %1811 = vmatpush1.bf16.msra.mxu1 %v5690_v22 }
 0x419   :  { %1842 = vmatprep.subr.bf16.mxu0 %v5693_v23  ;;  %1883 = vmatprep.subr.bf16.mxu1 %v5696_v18 }
 0x4ce   :  { %v1678_v35 = vpop.f32.mrb[24].mxu0  ;;  %v1719_v20 = vpop.f32.mrb[24].mxu1 }
 0x4cf   :  { %v3961_v9 = vadd.f32 %v1678_v35, %v5494_v38  ;;  %v1680_v26 = vpop.f32.mrb[25].mxu0  ;;  %v1721_v10 = vpop.f32.mrb[25].mxu1  ;;  %v3963_v18 = vadd.f32 %v1719_v20, %v5509_v59 }
 0x4d0   :  { %v3962_v28 = vadd.f32 %v1680_v26, %v5498_v40  ;;  %v1682_v8 = vpop.f32.mrb[26].mxu0  ;;  %v1723_v27 = vpop.f32.mrb[26].mxu1  ;;  %v3964_v23 = vadd.f32 %v1721_v10, %v5504_v56 }
 0x4d1   :  { %v3880_v25 = vmul.f32 -1.442695, %v3961_v9  ;;  %v1683_v22 = vpop.f32.mrb[27].mxu0  ;;  %v1724_v53 = vpop.f32.mrb[27].mxu1 }
 0x4d2   :  { %v3881_v33 = vmul.f32 -1.442695, %v3962_v28  ;;  %v3882_v17 = vmul.f32 -1.442695, %v3964_v23  ;;  %v5716_v22 = vld [vmem:[#allocation8 + $0x2c] ss:$16 sps:$4 sm:$0xff]  }
 0x4d3   :  { %4319 = vpow2.f32 %v3880_v25  ;;  %v5721_v23 = vld [vmem:[#allocation8 + $0x20] ss:$16 sps:$4 sm:$0xff]  }
 0x4d4   :  { %4321 = vpow2.f32 %v3881_v33 }
 0x4d5   :  { %4323 = vpow2.f32 %v3882_v17 }
 0x4d6   :  { %4325 = vtanh.f32 %v3963_v18  ;;  %v5724_v18 = vld [vmem:[#allocation8 + $0x28] ss:$16 sps:$4 sm:$0xff]  }
 0x4dd   :  { %v4320_v15 = vpop.eup %4319 }
 0x4de   :  { %v4322_v29 = vpop.eup %4321  ;;  %v1733_v35 = vadd.f32 1.0, %v4320_v15 }
 0x4df   :  { %v1739_v38 = vadd.f32 1.0, %v4322_v29  ;;  %v4324_v27 = vpop.eup %4323  ;;  %v5710_v29 = vld [vmem:[#allocation8 + $0x8] ss:$16 sps:$4 sm:$0xff]  }
 0x4e0   :  { %4327 = vrcp.f32 %v1733_v35  ;;  %v4326_v8 = vpop.eup %4325  ;;  %v1746_v25 = vadd.f32 1.0, %v4324_v27  ;;  %v5727_v35 = vld [vmem:[#allocation8 + $0x44] ss:$16 sps:$4 sm:$0xff]   ;;  %v5730_v27 = vld [vmem:[#allocation8 + $0x4c] ss:$16 sps:$4 sm:$0xff]  }
 0x4e1   :  { %4329 = vrcp.f32 %v1739_v38  ;;  %v5707_v38 = vld [vmem:[#allocation8] ss:$16 sps:$4 sm:$0xff]  }
 0x4e2   :  { %4331 = vrcp.f32 %v1746_v25  ;;  %v5745_v25 = vld [vmem:[#allocation8 + $0x60] ss:$16 sps:$4 sm:$0xff]  }
 0x4e3   :  { %7302 = vst [vmem:[#allocation51_spill] sm:$0xff] %v5745_v25 }
 0x4ea   :  { %v4328_v26 = vpop.eup %4327 }
 0x4eb   :  { %v4330_v53 = vpop.eup %4329  ;;  %v1750_v9 = vmul.f32 %v4328_v26, %v4326_v8  ;;  %v5733_v8 = vld [vmem:[#allocation8 + $0x40] ss:$16 sps:$4 sm:$0xff]   ;;  %v5736_v26 = vld [vmem:[#allocation8 + $0x48] ss:$16 sps:$4 sm:$0xff]  }
 0x4ec   :  { %v1749_v33 = vmul.f32 %v4330_v53, %v5512_v21  ;;  %v4332_v20 = vpop.eup %4331  ;;  %v5713_v21 = vld [vmem:[#allocation8 + $0x24] ss:$16 sps:$4 sm:$0xff]  }
 0x4ed   :  { %v5739_v53 = vld [vmem:[#allocation8 + $0x64] ss:$16 sps:$4 sm:$0xff]  }
 0x4ee   :  { %v5704_v10 = vadd.f32 %v1750_v9, %v1749_v33  ;;  %v5742_v9 = vld [vmem:[#allocation8 + $0x6c] ss:$16 sps:$4 sm:$0xff]   ;;  %v5748_v33 = vld [vmem:[#allocation8 + $0x68] ss:$16 sps:$4 sm:$0xff]  }
 0x4ef   :  { %7303 = vst [vmem:[#allocation52_spill] sm:$0xff] %v5748_v33 }
 0x4f0   :  { %4333 = vtanh.f32 %v5704_v10 }
 0x4fa   :  { %v4334_v15 = vpop.eup %4333 }
 0x4fb   :  { %v1753_v17 = vmul.f32 %v4334_v15, %v4332_v20  ;;  %v5751_v20 = vld [vmem:[#allocation8 + $0x84] ss:$16 sps:$4 sm:$0xff]   ;;  %v5754_v15 = vld [vmem:[#allocation8 + $0x8c] ss:$16 sps:$4 sm:$0xff]  }
 0x4fd   :  { %v1754_v28 = vpack.c.bf16 %v1753_v17, %v1753_v17  ;;  %v5757_v17 = vld [vmem:[#allocation8 + $0x80] ss:$16 sps:$4 sm:$0xff]  }
 0x4ff   :  { %1788 = vmatmul.mubr.bf16.vlgmr.msra.gmra.mrb[32].mxu0 %v1754_v28  ;;  %1829 = vmatmul.mubr.bf16.vlgmr.msra.gmra.mrb[32].mxu1 %v1754_v28  ;;  %v5760_v28 = vld [vmem:[#allocation8 + $0x88] ss:$16 sps:$4 sm:$0xff]  }
 0x500   :  { %1843 = vmatpush1.bf16.msra.mxu0 %v5707_v38  ;;  %1884 = vmatpush1.bf16.msra.mxu1 %v5710_v29 }
 0x501   :  { %1844 = vmatprep.subr.bf16.mxu0 %v5713_v21  ;;  %1885 = vmatprep.subr.bf16.mxu1 %v5716_v22 }
 0x502   :  { %1874 = vmatprep.mubr.bf16.mxu0 %v7143_v31  ;;  %1915 = vmatprep.mubr.bf16.mxu1 %v7143_v31 }
 0x504   :  { %1845 = vmatpush1.bf16.msra.mxu0 %v5721_v23  ;;  %1886 = vmatpush1.bf16.msra.mxu1 %v5724_v18 }
 0x505   :  { %1846 = vmatprep.subr.bf16.mxu0 %v5727_v35  ;;  %1887 = vmatprep.subr.bf16.mxu1 %v5730_v27 }
 0x508   :  { %1847 = vmatpush1.bf16.msra.mxu0 %v5733_v8  ;;  %1888 = vmatpush1.bf16.msra.mxu1 %v5736_v26 }
 0x509   :  { %1848 = vmatprep.subr.bf16.mxu0 %v5739_v53  ;;  %1889 = vmatprep.subr.bf16.mxu1 %v5742_v9 }
 0x50c   :  { %1849 = vmatpush1.bf16.msra.mxu0 %v5745_v25  ;;  %1890 = vmatpush1.bf16.msra.mxu1 %v5748_v33  ;;  %v5763_v25 = vld [vmem:[#allocation8 + $0xa4] ss:$16 sps:$4 sm:$0xff]   ;;  %v5766_v33 = vld [vmem:[#allocation8 + $0xac] ss:$16 sps:$4 sm:$0xff]  }
 0x50d   :  { %1850 = vmatprep.subr.bf16.mxu0 %v5751_v20  ;;  %1891 = vmatprep.subr.bf16.mxu1 %v5754_v15  ;;  %7304 = vst [vmem:[#allocation53_spill] sm:$0xff] %v5763_v25  ;;  %7305 = vst [vmem:[#allocation54_spill] sm:$0xff] %v5766_v33 }
 0x510   :  { %1851 = vmatpush1.bf16.msra.mxu0 %v5757_v17  ;;  %1892 = vmatpush1.bf16.msra.mxu1 %v5760_v28 }
 0x511   :  { %1852 = vmatprep.subr.bf16.mxu0 %v5763_v25  ;;  %1893 = vmatprep.subr.bf16.mxu1 %v5766_v33 }
 0x514   :  { %1853 = vmatpush1.bf16.msra.mxu0 %v7225_v34  ;;  %1894 = vmatpush1.bf16.msra.mxu1 %v7226_v30  ;;  %v7306_v34 = vld [vmem:[#allocation72_spill] sm:$0xff]  ;;  %v7307_v30 = vld [vmem:[#allocation73_spill] sm:$0xff] }
 0x515   :  { %1854 = vmatprep.subr.bf16.mxu0 %v7227_v12  ;;  %1895 = vmatprep.subr.bf16.mxu1 %v7228_v13  ;;  %v7308_v12 = vld [vmem:[#allocation74_spill] sm:$0xff]  ;;  %v7309_v13 = vld [vmem:[#allocation75_spill] sm:$0xff] }
 0x518   :  { %1855 = vmatpush1.bf16.msra.mxu0 %v7229_v14  ;;  %1896 = vmatpush1.bf16.msra.mxu1 %v7230_v36  ;;  %v7310_v14 = vld [vmem:[#allocation76_spill] sm:$0xff]  ;;  %v7311_v36 = vld [vmem:[#allocation77_spill] sm:$0xff] }
 0x519   :  { %1856 = vmatprep.subr.bf16.mxu0 %v7231_v37  ;;  %1897 = vmatprep.subr.bf16.mxu1 %v7232_v39  ;;  %v7312_v37 = vld [vmem:[#allocation20_spill] sm:$0xff]  ;;  %v7313_v39 = vld [vmem:[#allocation21_spill] sm:$0xff] }
 0x51c   :  { %1857 = vmatpush1.bf16.msra.mxu0 %v7233_v41  ;;  %1898 = vmatpush1.bf16.msra.mxu1 %v7234_v42 }
 0x51d   :  { %1953 = vmatprep.subr.bf16.mxu0 %v7235_v43  ;;  %1994 = vmatprep.subr.bf16.mxu1 %v7236_v45  ;;  %v7314_v43 = vld [vmem:[#allocation82_spill] sm:$0xff] }
 0x51f   :  { %1875 = vmatmul.mubr.bf16.vlgmr.msra.gmra.mrb[36].mxu0 %v5597_v0  ;;  %1916 = vmatmul.mubr.bf16.vlgmr.msra.gmra.mrb[36].mxu1 %v5597_v0 }
 0x520   :  { %1954 = vmatpush1.bf16.msra.mxu0 %v7237_v46  ;;  %1995 = vmatpush1.bf16.msra.mxu1 %v7238_v47  ;;  %v7315_v46 = vld [vmem:[#allocation83_spill] sm:$0xff] }
 0x521   :  { %1955 = vmatprep.subr.bf16.mxu0 %v7239_v48  ;;  %1996 = vmatprep.subr.bf16.mxu1 %v7240_v49 }
 0x522   :  { %1985 = vmatprep.mubr.bf16.mxu0 %v7143_v31  ;;  %2026 = vmatprep.mubr.bf16.mxu1 %v7143_v31 }
 0x524   :  { %1956 = vmatpush1.bf16.msra.mxu0 %v7241_v50  ;;  %1997 = vmatpush1.bf16.msra.mxu1 %v7242_v51  ;;  %v7316_v50 = vld [vmem:[#allocation84_spill] sm:$0xff] }
 0x525   :  { %1957 = vmatprep.subr.bf16.mxu0 %v7243_v52  ;;  %1998 = vmatprep.subr.bf16.mxu1 %v7244_v54  ;;  %v7317_v52 = vld [vmem:[#allocation85_spill] sm:$0xff] }
 0x528   :  { %1958 = vmatpush1.bf16.msra.mxu0 %v7245_v62  ;;  %1999 = vmatpush1.bf16.msra.mxu1 %v7246_v55 }
 0x529   :  { %1959 = vmatprep.subr.bf16.mxu0 %v7247_v57  ;;  %2000 = vmatprep.subr.bf16.mxu1 %v7248_v58 }
 0x52c   :  { %1960 = vmatpush1.bf16.msra.mxu0 %v7249_v60  ;;  %2001 = vmatpush1.bf16.msra.mxu1 %v7250_v61 }
 0x52d   :  { %1961 = vmatprep.subr.bf16.mxu0 %v7251_v63  ;;  %2002 = vmatprep.subr.bf16.mxu1 %v7252_v1 }
 0x530   :  { %1962 = vmatpush1.bf16.msra.mxu0 %v7253_v2  ;;  %2003 = vmatpush1.bf16.msra.mxu1 %v7254_v3 }
 0x531   :  { %1963 = vmatprep.subr.bf16.mxu0 %v7255_v4  ;;  %2004 = vmatprep.subr.bf16.mxu1 %v7256_v5 }
 0x534   :  { %1964 = vmatpush1.bf16.msra.mxu0 %v7257_v6  ;;  %2005 = vmatpush1.bf16.msra.mxu1 %v7258_v7 }
 0x535   :  { %1965 = vmatprep.subr.bf16.mxu0 %v7259_v16  ;;  %2006 = vmatprep.subr.bf16.mxu1 %v7260_v32 }
 0x538   :  { %1966 = vmatpush1.bf16.msra.mxu0 %v7306_v34  ;;  %2007 = vmatpush1.bf16.msra.mxu1 %v7307_v30 }
 0x539   :  { %1967 = vmatprep.subr.bf16.mxu0 %v7308_v12  ;;  %2008 = vmatprep.subr.bf16.mxu1 %v7309_v13 }
 0x53c   :  { %1968 = vmatpush1.bf16.msra.mxu0 %v7310_v14  ;;  %2009 = vmatpush1.bf16.msra.mxu1 %v7311_v36 }
 0x53d   :  { %2064 = vmatprep.subr.bf16.mxu0 %v7312_v37  ;;  %2105 = vmatprep.subr.bf16.mxu1 %v7313_v39 }
 0x5f2   :  { %v1876_v41 = vpop.f32.mrb[36].mxu0  ;;  %v1917_v42 = vpop.f32.mrb[36].mxu1 }
 0x5f3   :  { %v1924_v45 = vadd.f32 %v1876_v41, %v7314_v43  ;;  %v1926_v47 = vadd.f32 %v1917_v42, %v7315_v46  ;;  %v1878_v48 = vpop.f32.mrb[37].mxu0  ;;  %v1919_v49 = vpop.f32.mrb[37].mxu1  ;;  %v7319_v41 = vld [vmem:[#allocation23_spill] sm:$0xff]  ;;  %v7320_v42 = vld [vmem:[#allocation24_spill] sm:$0xff]  ;;  %v7321_v43 = vld [vmem:[#allocation25_spill] sm:$0xff] }
 0x5f4   :  { %v1925_v51 = vadd.f32 %v1878_v48, %v7316_v50  ;;  %v1927_v54 = vadd.f32 %v1919_v49, %v7317_v52  ;;  %v1880_v62 = vpop.f32.mrb[38].mxu0  ;;  %v1921_v55 = vpop.f32.mrb[38].mxu1  ;;  %v7323_v46 = vld [vmem:[#allocation27_spill] sm:$0xff]  ;;  %v7325_v48 = vld [vmem:[#allocation29_spill] sm:$0xff]  ;;  %v7326_v49 = vld [vmem:[#allocation30_spill] sm:$0xff] }
 0x5f5   :  { %v3883_v57 = vmul.f32 -1.442695, %v1924_v45  ;;  %v1881_v58 = vpop.f32.mrb[39].mxu0  ;;  %v1922_v60 = vpop.f32.mrb[39].mxu1  ;;  %v7322_v45 = vld [vmem:[#allocation26_spill] sm:$0xff]  ;;  %v7327_v50 = vld [vmem:[#allocation31_spill] sm:$0xff] }
 0x5f6   :  { %v3884_v61 = vmul.f32 -1.442695, %v1925_v51  ;;  %v3885_v63 = vmul.f32 -1.442695, %v1927_v54  ;;  %v7328_v51 = vld [vmem:[#allocation32_spill] sm:$0xff]  ;;  %v7329_v52 = vld [vmem:[#allocation33_spill] sm:$0xff] }
 0x5f7   :  { %4335 = vpow2.f32 %v3883_v57  ;;  %v7330_v54 = vld [vmem:[#allocation34_spill] sm:$0xff]  ;;  %v7331_v62 = vld [vmem:[#allocation35_spill] sm:$0xff]  ;;  %v7332_v55 = vld [vmem:[#allocation36_spill] sm:$0xff] }
 0x5f8   :  { %4337 = vpow2.f32 %v3884_v61  ;;  %v7333_v57 = vld [vmem:[#allocation37_spill] sm:$0xff]  ;;  %v7334_v58 = vld [vmem:[#allocation38_spill] sm:$0xff]  ;;  %v7335_v60 = vld [vmem:[#allocation39_spill] sm:$0xff] }
 0x5f9   :  { %4339 = vpow2.f32 %v3885_v63  ;;  %v7336_v61 = vld [vmem:[#allocation40_spill] sm:$0xff]  ;;  %v7337_v63 = vld [vmem:[#allocation41_spill] sm:$0xff] }
 0x5fa   :  { %4341 = vtanh.f32 %v1926_v47  ;;  %v7324_v47 = vld [vmem:[#allocation28_spill] sm:$0xff] }
 0x601   :  { %v4336_v1 = vpop.eup %4335 }
 0x602   :  { %v4338_v2 = vpop.eup %4337  ;;  %v1931_v3 = vadd.f32 1.0, %v4336_v1  ;;  %v7338_v1 = vld [vmem:[#allocation42_spill] sm:$0xff] }
 0x603   :  { %v1937_v4 = vadd.f32 1.0, %v4338_v2  ;;  %v4340_v5 = vpop.eup %4339  ;;  %v7339_v2 = vld [vmem:[#allocation43_spill] sm:$0xff] }
 0x604   :  { %4343 = vrcp.f32 %v1931_v3  ;;  %v4342_v6 = vpop.eup %4341  ;;  %v1944_v0 = vadd.f32 1.0, %v4340_v5  ;;  %v7340_v3 = vld [vmem:[#allocation44_spill] sm:$0xff]  ;;  %v7342_v5 = vld [vmem:[#allocation46_spill] sm:$0xff] }
 0x605   :  { %4345 = vrcp.f32 %v1937_v4  ;;  %v7341_v4 = vld [vmem:[#allocation45_spill] sm:$0xff] }
 0x606   :  { %4347 = vrcp.f32 %v1944_v0 }
 0x60e   :  { %v4344_v7 = vpop.eup %4343 }
 0x60f   :  { %v4346_v16 = vpop.eup %4345  ;;  %v1948_v32 = vmul.f32 %v4344_v7, %v4342_v6  ;;  %v7343_v6 = vld [vmem:[#allocation47_spill] sm:$0xff]  ;;  %v7344_v7 = vld [vmem:[#allocation48_spill] sm:$0xff] }
 0x610   :  { %v1947_v34 = vmul.f32 %v4346_v16, %v5594_v24  ;;  %v4348_v12 = vpop.eup %4347  ;;  %v7318_v24 = vld [vmem:[#allocation22_spill] sm:$0xff]  ;;  %v7345_v16 = vld [vmem:[#allocation49_spill] sm:$0xff] }
 0x612   :  { %v5822_v30 = vadd.f32 %v1948_v32, %v1947_v34  ;;  %v7346_v32 = vld [vmem:[#allocation50_spill] sm:$0xff] }
 0x614   :  { %4349 = vtanh.f32 %v5822_v30 }
 0x61e   :  { %v4350_v13 = vpop.eup %4349 }
 0x61f   :  { %v1951_v14 = vmul.f32 %v4350_v13, %v4348_v12  ;;  %v7347_v12 = vld [vmem:[#allocation106_spill] sm:$0xff] }
 0x621   :  { %v5825_v36 = vpack.c.bf16 %v1951_v14, %v1951_v14 }
 0x623   :  { %1986 = vmatmul.mubr.bf16.vlgmr.msra.gmra.mrb[32].mxu0 %v5825_v36  ;;  %2027 = vmatmul.mubr.bf16.vlgmr.msra.gmra.mrb[32].mxu1 %v5825_v36 }
 0x624   :  { %2065 = vmatpush1.bf16.msra.mxu0 %v5601_v44  ;;  %2106 = vmatpush1.bf16.msra.mxu1 %v5604_v11 }
 0x625   :  { %2066 = vmatprep.subr.bf16.mxu0 %v5607_v19  ;;  %2107 = vmatprep.subr.bf16.mxu1 %v7318_v24 }
 0x626   :  { %2096 = vmatprep.mubr.bf16.mxu0 %v7143_v31  ;;  %2137 = vmatprep.mubr.bf16.mxu1 %v7143_v31 }
 0x628   :  { %2067 = vmatpush1.bf16.msra.mxu0 %v7319_v41  ;;  %2108 = vmatpush1.bf16.msra.mxu1 %v7320_v42 }
 0x629   :  { %2068 = vmatprep.subr.bf16.mxu0 %v7321_v43  ;;  %2109 = vmatprep.subr.bf16.mxu1 %v7322_v45 }
 0x62c   :  { %2069 = vmatpush1.bf16.msra.mxu0 %v7323_v46  ;;  %2110 = vmatpush1.bf16.msra.mxu1 %v7324_v47 }
 0x62d   :  { %2070 = vmatprep.subr.bf16.mxu0 %v7325_v48  ;;  %2111 = vmatprep.subr.bf16.mxu1 %v7326_v49 }
 0x630   :  { %2071 = vmatpush1.bf16.msra.mxu0 %v7327_v50  ;;  %2112 = vmatpush1.bf16.msra.mxu1 %v7328_v51 }
 0x631   :  { %2072 = vmatprep.subr.bf16.mxu0 %v7329_v52  ;;  %2113 = vmatprep.subr.bf16.mxu1 %v7330_v54 }
 0x634   :  { %2073 = vmatpush1.bf16.msra.mxu0 %v7331_v62  ;;  %2114 = vmatpush1.bf16.msra.mxu1 %v7332_v55 }
 0x635   :  { %2074 = vmatprep.subr.bf16.mxu0 %v7333_v57  ;;  %2115 = vmatprep.subr.bf16.mxu1 %v7334_v58 }
 0x638   :  { %2075 = vmatpush1.bf16.msra.mxu0 %v7335_v60  ;;  %2116 = vmatpush1.bf16.msra.mxu1 %v7336_v61 }
 0x639   :  { %2076 = vmatprep.subr.bf16.mxu0 %v7337_v63  ;;  %2117 = vmatprep.subr.bf16.mxu1 %v7338_v1 }
 0x63c   :  { %2077 = vmatpush1.bf16.msra.mxu0 %v7339_v2  ;;  %2118 = vmatpush1.bf16.msra.mxu1 %v7340_v3 }
 0x63d   :  { %2078 = vmatprep.subr.bf16.mxu0 %v7341_v4  ;;  %2119 = vmatprep.subr.bf16.mxu1 %v7342_v5 }
 0x640   :  { %2079 = vmatpush1.bf16.msra.mxu0 %v7343_v6  ;;  %2120 = vmatpush1.bf16.msra.mxu1 %v7344_v7 }
 0x641   :  { %2151 = vmatprep.subr.bf16.mxu0 %v7345_v16  ;;  %2192 = vmatprep.subr.bf16.mxu1 %v7346_v32 }
 0x6f6   :  { %v1987_v0 = vpop.f32.mrb[32].mxu0  ;;  %v2028_v34 = vpop.f32.mrb[32].mxu1 }
 0x6f7   :  { %v3965_v13 = vadd.f32 %v1987_v0, %v7347_v12  ;;  %v1989_v14 = vpop.f32.mrb[33].mxu0  ;;  %v2030_v2 = vpop.f32.mrb[33].mxu1  ;;  %v3967_v32 = vadd.f32 %v2028_v34, %v5509_v59  ;;  %v5893_v34 = vld [vmem:[#allocation8 + $0xa0] ss:$16 sps:$4 sm:$0xff]  }
 0x6f8   :  { %v3966_v3 = vadd.f32 %v1989_v14, %v5498_v40  ;;  %v1991_v1 = vpop.f32.mrb[34].mxu0  ;;  %v2032_v4 = vpop.f32.mrb[34].mxu1  ;;  %v3968_v16 = vadd.f32 %v2030_v2, %v5504_v56  ;;  %7350 = vst [vmem:[#allocation55_spill] sm:$0xff] %v5893_v34  ;;  %v5902_v14 = vld [vmem:[#allocation8 + $0xcc] ss:$16 sps:$4 sm:$0xff]  }
 0x6f9   :  { %v3886_v63 = vmul.f32 -1.442695, %v3965_v13  ;;  %v1992_v5 = vpop.f32.mrb[35].mxu0  ;;  %v2033_v61 = vpop.f32.mrb[35].mxu1  ;;  %v5899_v13 = vld [vmem:[#allocation8 + $0xc4] ss:$16 sps:$4 sm:$0xff]  }
 0x6fa   :  { %v3887_v6 = vmul.f32 -1.442695, %v3966_v3  ;;  %v3888_v7 = vmul.f32 -1.442695, %v3968_v16  ;;  %7352 = vst [vmem:[#allocation57_spill] sm:$0xff] %v5899_v13  ;;  %7353 = vst [vmem:[#allocation58_spill] sm:$0xff] %v5902_v14 }
 0x6fb   :  { %4351 = vpow2.f32 %v3886_v63 }
 0x6fc   :  { %4353 = vpow2.f32 %v3887_v6 }
 0x6fd   :  { %4355 = vpow2.f32 %v3888_v7 }
 0x6fe   :  { %4357 = vtanh.f32 %v3967_v32 }
 0x705   :  { %v4352_v60 = vpop.eup %4351 }
 0x706   :  { %v4354_v58 = vpop.eup %4353  ;;  %v2042_v0 = vadd.f32 1.0, %v4352_v60 }
 0x707   :  { %v2048_v12 = vadd.f32 1.0, %v4354_v58  ;;  %v4356_v1 = vpop.eup %4355  ;;  %v7349_v58 = vld [vmem:[#allocation52_spill] sm:$0xff] }
 0x708   :  { %4359 = vrcp.f32 %v2042_v0  ;;  %v4358_v4 = vpop.eup %4357  ;;  %v2055_v63 = vadd.f32 1.0, %v4356_v1  ;;  %v5905_v0 = vld [vmem:[#allocation8 + $0xc0] ss:$16 sps:$4 sm:$0xff]   ;;  %v5908_v1 = vld [vmem:[#allocation8 + $0xc8] ss:$16 sps:$4 sm:$0xff]  }
 0x709   :  { %4361 = vrcp.f32 %v2048_v12  ;;  %v5896_v12 = vld [vmem:[#allocation8 + $0xa8] ss:$16 sps:$4 sm:$0xff]   ;;  %7354 = vst [vmem:[#allocation59_spill] sm:$0xff] %v5905_v0  ;;  %7355 = vst [vmem:[#allocation60_spill] sm:$0xff] %v5908_v1 }
 0x70a   :  { %4363 = vrcp.f32 %v2055_v63  ;;  %7351 = vst [vmem:[#allocation56_spill] sm:$0xff] %v5896_v12  ;;  %v5923_v63 = vld [vmem:[#allocation9 + $0x4] ss:$16 sps:$4 sm:$0xff]  }
 0x70b   :  { %7360 = vst [vmem:[#allocation65_spill] sm:$0xff] %v5923_v63 }
 0x712   :  { %v4360_v5 = vpop.eup %4359 }
 0x713   :  { %v4362_v61 = vpop.eup %4361  ;;  %v2059_v3 = vmul.f32 %v4360_v5, %v4358_v4  ;;  %v5911_v4 = vld [vmem:[#allocation8 + $0xe4] ss:$16 sps:$4 sm:$0xff]   ;;  %v5914_v5 = vld [vmem:[#allocation8 + $0xec] ss:$16 sps:$4 sm:$0xff]  }
 0x714   :  { %v2058_v6 = vmul.f32 %v4362_v61, %v5704_v10  ;;  %v4364_v16 = vpop.eup %4363  ;;  %v7348_v10 = vld [vmem:[#allocation51_spill] sm:$0xff]  ;;  %7356 = vst [vmem:[#allocation61_spill] sm:$0xff] %v5911_v4  ;;  %7357 = vst [vmem:[#allocation62_spill] sm:$0xff] %v5914_v5 }
 0x715   :  { %v5917_v61 = vld [vmem:[#allocation8 + $0xe0] ss:$16 sps:$4 sm:$0xff]  }
 0x716   :  { %v5868_v2 = vadd.f32 %v2059_v3, %v2058_v6  ;;  %7358 = vst [vmem:[#allocation63_spill] sm:$0xff] %v5917_v61  ;;  %v5920_v3 = vld [vmem:[#allocation8 + $0xe8] ss:$16 sps:$4 sm:$0xff]   ;;  %v5926_v6 = vld [vmem:[#allocation9 + $0xc] ss:$16 sps:$4 sm:$0xff]  }
 0x717   :  { %7359 = vst [vmem:[#allocation64_spill] sm:$0xff] %v5920_v3  ;;  %7361 = vst [vmem:[#allocation66_spill] sm:$0xff] %v5926_v6 }
 0x718   :  { %4365 = vtanh.f32 %v5868_v2 }
 0x722   :  { %v4366_v60 = vpop.eup %4365 }
 0x723   :  { %v2062_v7 = vmul.f32 %v4366_v60, %v4364_v16  ;;  %v5931_v16 = vld [vmem:[#allocation9] ss:$16 sps:$4 sm:$0xff]   ;;  %v5934_v60 = vld [vmem:[#allocation9 + $0x8] ss:$16 sps:$4 sm:$0xff]  }
 0x724   :  { %7362 = vst [vmem:[#allocation67_spill] sm:$0xff] %v5931_v16  ;;  %7363 = vst [vmem:[#allocation68_spill] sm:$0xff] %v5934_v60 }
 0x725   :  { %v2063_v32 = vpack.c.bf16 %v2062_v7, %v2062_v7  ;;  %v5937_v7 = vld [vmem:[#allocation9 + $0x24] ss:$16 sps:$4 sm:$0xff]  }
 0x726   :  { %7364 = vst [vmem:[#allocation69_spill] sm:$0xff] %v5937_v7 }
 0x727   :  { %2097 = vmatmul.mubr.bf16.vlgmr.msra.gmra.mrb[40].mxu0 %v2063_v32  ;;  %2138 = vmatmul.mubr.bf16.vlgmr.msra.gmra.mrb[40].mxu1 %v2063_v32  ;;  %v5940_v32 = vld [vmem:[#allocation9 + $0x2c] ss:$16 sps:$4 sm:$0xff]  }
 0x728   :  { %2152 = vmatpush1.bf16.msra.mxu0 %v5707_v38  ;;  %2193 = vmatpush1.bf16.msra.mxu1 %v5710_v29  ;;  %7365 = vst [vmem:[#allocation70_spill] sm:$0xff] %v5940_v32 }
 0x729   :  { %2153 = vmatprep.subr.bf16.mxu0 %v5713_v21  ;;  %2194 = vmatprep.subr.bf16.mxu1 %v5716_v22 }
 0x72a   :  { %2183 = vmatprep.mubr.bf16.mxu0 %v7143_v31  ;;  %2224 = vmatprep.mubr.bf16.mxu1 %v7143_v31 }
 0x72c   :  { %2154 = vmatpush1.bf16.msra.mxu0 %v5721_v23  ;;  %2195 = vmatpush1.bf16.msra.mxu1 %v5724_v18 }
 0x72d   :  { %2155 = vmatprep.subr.bf16.mxu0 %v5727_v35  ;;  %2196 = vmatprep.subr.bf16.mxu1 %v5730_v27 }
 0x730   :  { %2156 = vmatpush1.bf16.msra.mxu0 %v5733_v8  ;;  %2197 = vmatpush1.bf16.msra.mxu1 %v5736_v26 }
 0x731   :  { %2157 = vmatprep.subr.bf16.mxu0 %v5739_v53  ;;  %2198 = vmatprep.subr.bf16.mxu1 %v5742_v9 }
 0x734   :  { %2158 = vmatpush1.bf16.msra.mxu0 %v7348_v10  ;;  %2199 = vmatpush1.bf16.msra.mxu1 %v7349_v58 }
 0x735   :  { %2159 = vmatprep.subr.bf16.mxu0 %v5751_v20  ;;  %2200 = vmatprep.subr.bf16.mxu1 %v5754_v15 }
 0x738   :  { %2160 = vmatpush1.bf16.msra.mxu0 %v5757_v17  ;;  %2201 = vmatpush1.bf16.msra.mxu1 %v5760_v28 }
 0x739   :  { %2161 = vmatprep.subr.bf16.mxu0 %v5763_v25  ;;  %2202 = vmatprep.subr.bf16.mxu1 %v5766_v33 }
 0x73c   :  { %2162 = vmatpush1.bf16.msra.mxu0 %v5893_v34  ;;  %2203 = vmatpush1.bf16.msra.mxu1 %v5896_v12 }
 0x73d   :  { %2163 = vmatprep.subr.bf16.mxu0 %v5899_v13  ;;  %2204 = vmatprep.subr.bf16.mxu1 %v5902_v14 }
 0x740   :  { %2164 = vmatpush1.bf16.msra.mxu0 %v5905_v0  ;;  %2205 = vmatpush1.bf16.msra.mxu1 %v5908_v1  ;;  %v7395_v0 = vld [vmem:[#allocation89_spill] sm:$0xff] }
 0x741   :  { %2165 = vmatprep.subr.bf16.mxu0 %v5911_v4  ;;  %2206 = vmatprep.subr.bf16.mxu1 %v5914_v5  ;;  %v7394_v4 = vld [vmem:[#allocation88_spill] sm:$0xff] }
 0x744   :  { %2166 = vmatpush1.bf16.msra.mxu0 %v5917_v61  ;;  %2207 = vmatpush1.bf16.msra.mxu1 %v5920_v3  ;;  %v7393_v3 = vld [vmem:[#allocation87_spill] sm:$0xff] }
 0x745   :  { %2262 = vmatprep.subr.bf16.mxu0 %v5923_v63  ;;  %2303 = vmatprep.subr.bf16.mxu1 %v5926_v6  ;;  %v5960_v6 = vld [vmem:[#allocation9 + $0x48] ss:$16 sps:$4 sm:$0xff]  }
 0x746   :  { %7371 = vst [vmem:[#allocation72_spill] sm:$0xff] %v5960_v6  ;;  %v7392_v63 = vld [vmem:[#allocation86_spill] sm:$0xff] }
 0x747   :  { %2184 = vmatmul.mubr.bf16.vlgmr.msra.gmra.mrb[44].mxu0 %v5825_v36  ;;  %2225 = vmatmul.mubr.bf16.vlgmr.msra.gmra.mrb[44].mxu1 %v5825_v36  ;;  %v5945_v36 = vld [vmem:[#allocation9 + $0x20] ss:$16 sps:$4 sm:$0xff]  }
 0x748   :  { %2263 = vmatpush1.bf16.msra.mxu0 %v5931_v16  ;;  %2304 = vmatpush1.bf16.msra.mxu1 %v5934_v60  ;;  %7366 = vst [vmem:[#allocation71_spill] sm:$0xff] %v5945_v36  ;;  %v5948_v16 = vld [vmem:[#allocation9 + $0x28] ss:$16 sps:$4 sm:$0xff]   ;;  %v5951_v60 = vld [vmem:[#allocation9 + $0x44] ss:$16 sps:$4 sm:$0xff]  }
 0x749   :  { %2264 = vmatprep.subr.bf16.mxu0 %v5937_v7  ;;  %2305 = vmatprep.subr.bf16.mxu1 %v5940_v32  ;;  %7367 = vst [vmem:[#allocation78_spill] sm:$0xff] %v5948_v16  ;;  %7368 = vst [vmem:[#allocation79_spill] sm:$0xff] %v5951_v60  ;;  %v5954_v7 = vld [vmem:[#allocation9 + $0x4c] ss:$16 sps:$4 sm:$0xff]   ;;  %v5957_v32 = vld [vmem:[#allocation9 + $0x40] ss:$16 sps:$4 sm:$0xff]  }
 0x74a   :  { %2294 = vmatprep.mubr.bf16.mxu0 %v7143_v31  ;;  %2335 = vmatprep.mubr.bf16.mxu1 %v7143_v31  ;;  %7369 = vst [vmem:[#allocation80_spill] sm:$0xff] %v5954_v7  ;;  %7370 = vst [vmem:[#allocation81_spill] sm:$0xff] %v5957_v32 }
 0x74c   :  { %2265 = vmatpush1.bf16.msra.mxu0 %v5945_v36  ;;  %2306 = vmatpush1.bf16.msra.mxu1 %v5948_v16  ;;  %v5963_v36 = vld [vmem:[#allocation9 + $0x64] ss:$16 sps:$4 sm:$0xff]   ;;  %v5966_v16 = vld [vmem:[#allocation9 + $0x6c] ss:$16 sps:$4 sm:$0xff]  }
 0x74d   :  { %2266 = vmatprep.subr.bf16.mxu0 %v5951_v60  ;;  %2307 = vmatprep.subr.bf16.mxu1 %v5954_v7  ;;  %7372 = vst [vmem:[#allocation73_spill] sm:$0xff] %v5963_v36  ;;  %7373 = vst [vmem:[#allocation74_spill] sm:$0xff] %v5966_v16  ;;  %v5969_v60 = vld [vmem:[#allocation9 + $0x60] ss:$16 sps:$4 sm:$0xff]   ;;  %v5972_v7 = vld [vmem:[#allocation9 + $0x68] ss:$16 sps:$4 sm:$0xff]  }
 0x74e   :  { %7374 = vst [vmem:[#allocation75_spill] sm:$0xff] %v5969_v60  ;;  %7375 = vst [vmem:[#allocation76_spill] sm:$0xff] %v5972_v7 }
 0x750   :  { %2267 = vmatpush1.bf16.msra.mxu0 %v5957_v32  ;;  %2308 = vmatpush1.bf16.msra.mxu1 %v5960_v6  ;;  %v5975_v32 = vld [vmem:[#allocation9 + $0x84] ss:$16 sps:$4 sm:$0xff]   ;;  %v5978_v6 = vld [vmem:[#allocation9 + $0x8c] ss:$16 sps:$4 sm:$0xff]  }
 0x751   :  { %2268 = vmatprep.subr.bf16.mxu0 %v5963_v36  ;;  %2309 = vmatprep.subr.bf16.mxu1 %v5966_v16  ;;  %7376 = vst [vmem:[#allocation77_spill] sm:$0xff] %v5975_v32  ;;  %7377 = vst [vmem:[#allocation20_spill] sm:$0xff] %v5978_v6  ;;  %v5981_v36 = vld [vmem:[#allocation9 + $0x80] ss:$16 sps:$4 sm:$0xff]   ;;  %v5984_v16 = vld [vmem:[#allocation9 + $0x88] ss:$16 sps:$4 sm:$0xff]  }
 0x752   :  { %7378 = vst [vmem:[#allocation21_spill] sm:$0xff] %v5981_v36  ;;  %7379 = vst [vmem:[#allocation82_spill] sm:$0xff] %v5984_v16 }
 0x754   :  { %2269 = vmatpush1.bf16.msra.mxu0 %v5969_v60  ;;  %2310 = vmatpush1.bf16.msra.mxu1 %v5972_v7  ;;  %v5987_v60 = vld [vmem:[#allocation9 + $0xa4] ss:$16 sps:$4 sm:$0xff]   ;;  %v5990_v7 = vld [vmem:[#allocation9 + $0xac] ss:$16 sps:$4 sm:$0xff]  }
 0x755   :  { %2270 = vmatprep.subr.bf16.mxu0 %v5975_v32  ;;  %2311 = vmatprep.subr.bf16.mxu1 %v5978_v6  ;;  %7380 = vst [vmem:[#allocation83_spill] sm:$0xff] %v5987_v60  ;;  %7381 = vst [vmem:[#allocation84_spill] sm:$0xff] %v5990_v7  ;;  %v5993_v32 = vld [vmem:[#allocation9 + $0xa0] ss:$16 sps:$4 sm:$0xff]   ;;  %v5996_v6 = vld [vmem:[#allocation9 + $0xa8] ss:$16 sps:$4 sm:$0xff]  }
 0x756   :  { %7382 = vst [vmem:[#allocation85_spill] sm:$0xff] %v5993_v32  ;;  %7383 = vst [vmem:[#allocation22_spill] sm:$0xff] %v5996_v6 }
 0x758   :  { %2271 = vmatpush1.bf16.msra.mxu0 %v5981_v36  ;;  %2312 = vmatpush1.bf16.msra.mxu1 %v5984_v16  ;;  %v5999_v36 = vld [vmem:[#allocation9 + $0xc4] ss:$16 sps:$4 sm:$0xff]   ;;  %v6002_v16 = vld [vmem:[#allocation9 + $0xcc] ss:$16 sps:$4 sm:$0xff]  }
 0x759   :  { %2272 = vmatprep.subr.bf16.mxu0 %v5987_v60  ;;  %2313 = vmatprep.subr.bf16.mxu1 %v5990_v7  ;;  %7384 = vst [vmem:[#allocation23_spill] sm:$0xff] %v5999_v36  ;;  %7385 = vst [vmem:[#allocation24_spill] sm:$0xff] %v6002_v16  ;;  %v6005_v60 = vld [vmem:[#allocation9 + $0xc0] ss:$16 sps:$4 sm:$0xff]   ;;  %v6008_v7 = vld [vmem:[#allocation9 + $0xc8] ss:$16 sps:$4 sm:$0xff]  }
 0x75a   :  { %7386 = vst [vmem:[#allocation25_spill] sm:$0xff] %v6005_v60  ;;  %7387 = vst [vmem:[#allocation26_spill] sm:$0xff] %v6008_v7 }
 0x75c   :  { %2273 = vmatpush1.bf16.msra.mxu0 %v5993_v32  ;;  %2314 = vmatpush1.bf16.msra.mxu1 %v5996_v6  ;;  %v6011_v32 = vld [vmem:[#allocation9 + $0xe4] ss:$16 sps:$4 sm:$0xff]   ;;  %v6014_v6 = vld [vmem:[#allocation9 + $0xec] ss:$16 sps:$4 sm:$0xff]  }
 0x75d   :  { %2274 = vmatprep.subr.bf16.mxu0 %v5999_v36  ;;  %2315 = vmatprep.subr.bf16.mxu1 %v6002_v16  ;;  %7388 = vst [vmem:[#allocation27_spill] sm:$0xff] %v6011_v32  ;;  %7389 = vst [vmem:[#allocation28_spill] sm:$0xff] %v6014_v6  ;;  %v6017_v36 = vld [vmem:[#allocation9 + $0xe0] ss:$16 sps:$4 sm:$0xff]   ;;  %v6020_v16 = vld [vmem:[#allocation9 + $0xe8] ss:$16 sps:$4 sm:$0xff]  }
 0x75e   :  { %7390 = vst [vmem:[#allocation29_spill] sm:$0xff] %v6017_v36  ;;  %7391 = vst [vmem:[#allocation30_spill] sm:$0xff] %v6020_v16 }
 0x760   :  { %2275 = vmatpush1.bf16.msra.mxu0 %v6005_v60  ;;  %2316 = vmatpush1.bf16.msra.mxu1 %v6008_v7 }
 0x761   :  { %2276 = vmatprep.subr.bf16.mxu0 %v6011_v32  ;;  %2317 = vmatprep.subr.bf16.mxu1 %v6014_v6 }
 0x764   :  { %2277 = vmatpush1.bf16.msra.mxu0 %v6017_v36  ;;  %2318 = vmatpush1.bf16.msra.mxu1 %v6020_v16 }
 0x765   :  { %2373 = vmatprep.subr.bf16.mxu0 %v7312_v37  ;;  %2414 = vmatprep.subr.bf16.mxu1 %v7313_v39 }
 0x81a   :  { %v2185_v7 = vpop.f32.mrb[44].mxu0  ;;  %v2226_v60 = vpop.f32.mrb[44].mxu1 }
 0x81b   :  { %v2233_v32 = vadd.f32 %v2185_v7, %v7392_v63  ;;  %v2235_v61 = vadd.f32 %v2226_v60, %v7393_v3  ;;  %v2187_v5 = vpop.f32.mrb[45].mxu0  ;;  %v2228_v6 = vpop.f32.mrb[45].mxu1 }
 0x81c   :  { %v2234_v1 = vadd.f32 %v2187_v5, %v7394_v4  ;;  %v2236_v36 = vadd.f32 %v2228_v6, %v7395_v0  ;;  %v2189_v14 = vpop.f32.mrb[46].mxu0  ;;  %v2230_v13 = vpop.f32.mrb[46].mxu1 }
 0x81d   :  { %v3889_v12 = vmul.f32 -1.442695, %v2233_v32  ;;  %v2190_v16 = vpop.f32.mrb[47].mxu0  ;;  %v2231_v34 = vpop.f32.mrb[47].mxu1 }
 0x81e   :  { %v3890_v37 = vmul.f32 -1.442695, %v2234_v1  ;;  %v3891_v39 = vmul.f32 -1.442695, %v2236_v36 }
 0x81f   :  { %4367 = vpow2.f32 %v3889_v12 }
 0x820   :  { %4369 = vpow2.f32 %v3890_v37 }
 0x821   :  { %4371 = vpow2.f32 %v3891_v39 }
 0x822   :  { %4373 = vtanh.f32 %v2235_v61 }
 0x829   :  { %v4368_v33 = vpop.eup %4367 }
 0x82a   :  { %v4370_v25 = vpop.eup %4369  ;;  %v2240_v63 = vadd.f32 1.0, %v4368_v33 }
 0x82b   :  { %v2246_v3 = vadd.f32 1.0, %v4370_v25  ;;  %v4372_v4 = vpop.eup %4371  ;;  %v7399_v25 = vld [vmem:[#allocation41_spill] sm:$0xff] }
 0x82c   :  { %4375 = vrcp.f32 %v2240_v63  ;;  %v4374_v5 = vpop.eup %4373  ;;  %v2253_v6 = vadd.f32 1.0, %v4372_v4 }
 0x82d   :  { %4377 = vrcp.f32 %v2246_v3 }
 0x82e   :  { %4379 = vrcp.f32 %v2253_v6 }
 0x836   :  { %v4376_v0 = vpop.eup %4375 }
 0x837   :  { %v4378_v14 = vpop.eup %4377  ;;  %v2257_v13 = vmul.f32 %v4376_v0, %v4374_v5 }
 0x838   :  { %v2256_v34 = vmul.f32 %v4378_v14, %v5822_v30  ;;  %v4380_v12 = vpop.eup %4379  ;;  %v7400_v30 = vld [vmem:[#allocation42_spill] sm:$0xff] }
 0x83a   :  { %v6030_v1 = vadd.f32 %v2257_v13, %v2256_v34 }
 0x83c   :  { %4381 = vtanh.f32 %v6030_v1 }
 0x846   :  { %v4382_v33 = vpop.eup %4381 }
 0x847   :  { %v2260_v16 = vmul.f32 %v4382_v33, %v4380_v12 }
 0x849   :  { %v6033_v61 = vpack.c.bf16 %v2260_v16, %v2260_v16 }
 0x84b   :  { %2295 = vmatmul.mubr.bf16.vlgmr.msra.gmra.mrb[40].mxu0 %v6033_v61  ;;  %2336 = vmatmul.mubr.bf16.vlgmr.msra.gmra.mrb[40].mxu1 %v6033_v61 }
 0x84c   :  { %2374 = vmatpush1.bf16.msra.mxu0 %v5601_v44  ;;  %2415 = vmatpush1.bf16.msra.mxu1 %v5604_v11  ;;  %v7396_v44 = vld [vmem:[#allocation38_spill] sm:$0xff]  ;;  %v7397_v11 = vld [vmem:[#allocation39_spill] sm:$0xff] }
 0x84d   :  { %2375 = vmatprep.subr.bf16.mxu0 %v5607_v19  ;;  %2416 = vmatprep.subr.bf16.mxu1 %v7318_v24  ;;  %v7398_v19 = vld [vmem:[#allocation40_spill] sm:$0xff]  ;;  %v7401_v24 = vld [vmem:[#allocation43_spill] sm:$0xff] }
 0x84e   :  { %2405 = vmatprep.mubr.bf16.mxu0 %v7143_v31  ;;  %2446 = vmatprep.mubr.bf16.mxu1 %v7143_v31 }
 0x850   :  { %2376 = vmatpush1.bf16.msra.mxu0 %v7319_v41  ;;  %2417 = vmatpush1.bf16.msra.mxu1 %v7320_v42  ;;  %v7402_v41 = vld [vmem:[#allocation44_spill] sm:$0xff]  ;;  %v7403_v42 = vld [vmem:[#allocation45_spill] sm:$0xff] }
 0x851   :  { %2377 = vmatprep.subr.bf16.mxu0 %v7321_v43  ;;  %2418 = vmatprep.subr.bf16.mxu1 %v7322_v45  ;;  %v7404_v43 = vld [vmem:[#allocation46_spill] sm:$0xff]  ;;  %v7405_v45 = vld [vmem:[#allocation47_spill] sm:$0xff] }
 0x854   :  { %2378 = vmatpush1.bf16.msra.mxu0 %v7323_v46  ;;  %2419 = vmatpush1.bf16.msra.mxu1 %v7324_v47  ;;  %v7406_v46 = vld [vmem:[#allocation48_spill] sm:$0xff]  ;;  %v7407_v47 = vld [vmem:[#allocation49_spill] sm:$0xff] }
 0x855   :  { %2379 = vmatprep.subr.bf16.mxu0 %v7325_v48  ;;  %2420 = vmatprep.subr.bf16.mxu1 %v7326_v49  ;;  %v7408_v48 = vld [vmem:[#allocation50_spill] sm:$0xff] }
 0x858   :  { %2380 = vmatpush1.bf16.msra.mxu0 %v7327_v50  ;;  %2421 = vmatpush1.bf16.msra.mxu1 %v7328_v51  ;;  %v7409_v51 = vld [vmem:[#allocation106_spill] sm:$0xff] }
 0x859   :  { %2381 = vmatprep.subr.bf16.mxu0 %v7329_v52  ;;  %2422 = vmatprep.subr.bf16.mxu1 %v7330_v54 }
 0x85c   :  { %2382 = vmatpush1.bf16.msra.mxu0 %v7331_v62  ;;  %2423 = vmatpush1.bf16.msra.mxu1 %v7332_v55 }
 0x85d   :  { %2383 = vmatprep.subr.bf16.mxu0 %v7333_v57  ;;  %2424 = vmatprep.subr.bf16.mxu1 %v7396_v44 }
 0x860   :  { %2384 = vmatpush1.bf16.msra.mxu0 %v7397_v11  ;;  %2425 = vmatpush1.bf16.msra.mxu1 %v7398_v19 }
 0x861   :  { %2385 = vmatprep.subr.bf16.mxu0 %v7399_v25  ;;  %2426 = vmatprep.subr.bf16.mxu1 %v7400_v30 }
 0x864   :  { %2386 = vmatpush1.bf16.msra.mxu0 %v7401_v24  ;;  %2427 = vmatpush1.bf16.msra.mxu1 %v7402_v41  ;;  %v7429_v41 = vld [vmem:[#allocation78_spill] sm:$0xff] }
 0x865   :  { %2387 = vmatprep.subr.bf16.mxu0 %v7403_v42  ;;  %2428 = vmatprep.subr.bf16.mxu1 %v7404_v43  ;;  %v7430_v42 = vld [vmem:[#allocation79_spill] sm:$0xff]  ;;  %v7431_v43 = vld [vmem:[#allocation80_spill] sm:$0xff] }
 0x868   :  { %2388 = vmatpush1.bf16.msra.mxu0 %v7405_v45  ;;  %2429 = vmatpush1.bf16.msra.mxu1 %v7406_v46  ;;  %v7433_v45 = vld [vmem:[#allocation72_spill] sm:$0xff]  ;;  %v7434_v46 = vld [vmem:[#allocation73_spill] sm:$0xff] }
 0x869   :  { %2460 = vmatprep.subr.bf16.mxu0 %v7407_v47  ;;  %2501 = vmatprep.subr.bf16.mxu1 %v7408_v48  ;;  %v7435_v47 = vld [vmem:[#allocation74_spill] sm:$0xff]  ;;  %v7436_v48 = vld [vmem:[#allocation75_spill] sm:$0xff] }
 0x91e   :  { %v2296_v49 = vpop.f32.mrb[40].mxu0  ;;  %v2337_v50 = vpop.f32.mrb[40].mxu1 }
 0x91f   :  { %v3969_v52 = vadd.f32 %v2296_v49, %v7409_v51  ;;  %v2298_v54 = vpop.f32.mrb[41].mxu0  ;;  %v2339_v62 = vpop.f32.mrb[41].mxu1  ;;  %v3971_v3 = vadd.f32 %v2337_v50, %v5509_v59  ;;  %v7437_v49 = vld [vmem:[#allocation76_spill] sm:$0xff]  ;;  %v7438_v50 = vld [vmem:[#allocation77_spill] sm:$0xff] }
 0x920   :  { %v3970_v55 = vadd.f32 %v2298_v54, %v5498_v40  ;;  %v2300_v57 = vpop.f32.mrb[42].mxu0  ;;  %v2341_v60 = vpop.f32.mrb[42].mxu1  ;;  %v3972_v39 = vadd.f32 %v2339_v62, %v5504_v56  ;;  %v7440_v54 = vld [vmem:[#allocation21_spill] sm:$0xff]  ;;  %v7441_v62 = vld [vmem:[#allocation82_spill] sm:$0xff] }
 0x921   :  { %v3892_v7 = vmul.f32 -1.442695, %v3969_v52  ;;  %v2301_v32 = vpop.f32.mrb[43].mxu0  ;;  %v2342_v36 = vpop.f32.mrb[43].mxu1  ;;  %v7439_v52 = vld [vmem:[#allocation20_spill] sm:$0xff]  ;;  %v7444_v60 = vld [vmem:[#allocation85_spill] sm:$0xff] }
 0x922   :  { %v3893_v37 = vmul.f32 -1.442695, %v3970_v55  ;;  %v3894_v63 = vmul.f32 -1.442695, %v3972_v39  ;;  %v7442_v55 = vld [vmem:[#allocation83_spill] sm:$0xff]  ;;  %v7443_v57 = vld [vmem:[#allocation84_spill] sm:$0xff] }
 0x923   :  { %4383 = vpow2.f32 %v3892_v7  ;;  %v7445_v7 = vld [vmem:[#allocation22_spill] sm:$0xff]  ;;  %v7446_v32 = vld [vmem:[#allocation23_spill] sm:$0xff]  ;;  %v7447_v36 = vld [vmem:[#allocation24_spill] sm:$0xff] }
 0x924   :  { %4385 = vpow2.f32 %v3893_v37  ;;  %v7448_v37 = vld [vmem:[#allocation25_spill] sm:$0xff]  ;;  %v7449_v39 = vld [vmem:[#allocation26_spill] sm:$0xff] }
 0x925   :  { %4387 = vpow2.f32 %v3894_v63  ;;  %v7450_v63 = vld [vmem:[#allocation27_spill] sm:$0xff] }
 0x926   :  { %4389 = vtanh.f32 %v3971_v3  ;;  %v7451_v3 = vld [vmem:[#allocation28_spill] sm:$0xff] }
 0x92d   :  { %v4384_v4 = vpop.eup %4383 }
 0x92e   :  { %v4386_v5 = vpop.eup %4385  ;;  %v2351_v0 = vadd.f32 1.0, %v4384_v4  ;;  %v7452_v4 = vld [vmem:[#allocation29_spill] sm:$0xff] }
 0x92f   :  { %v2357_v14 = vadd.f32 1.0, %v4386_v5  ;;  %v4388_v13 = vpop.eup %4387  ;;  %v7453_v5 = vld [vmem:[#allocation30_spill] sm:$0xff] }
 0x930   :  { %4391 = vrcp.f32 %v2351_v0  ;;  %v4390_v6 = vpop.eup %4389  ;;  %v2364_v16 = vadd.f32 1.0, %v4388_v13  ;;  %v6147_v0 = vld [vmem:[#allocation11 + $0x4] ss:$16 sps:$4 sm:$0xff]  }
 0x931   :  { %4393 = vrcp.f32 %v2357_v14  ;;  %7454 = vst [vmem:[#allocation31_spill] sm:$0xff] %v6147_v0  ;;  %v6150_v14 = vld [vmem:[#allocation11 + $0xc] ss:$16 sps:$4 sm:$0xff]  }
 0x932   :  { %4395 = vrcp.f32 %v2364_v16  ;;  %7455 = vst [vmem:[#allocation32_spill] sm:$0xff] %v6150_v14 }
 0x93a   :  { %v4392_v34 = vpop.eup %4391 }
 0x93b   :  { %v4394_v12 = vpop.eup %4393  ;;  %v2368_v33 = vmul.f32 %v4392_v34, %v4390_v6  ;;  %v7456_v34 = vld [vmem:[#allocation90_spill] sm:$0xff] }
 0x93c   :  { %v2367_v44 = vmul.f32 %v4394_v12, %v5868_v2  ;;  %v4396_v19 = vpop.eup %4395  ;;  %v7426_v2 = vld [vmem:[#allocation69_spill] sm:$0xff] }
 0x93e   :  { %v6076_v11 = vadd.f32 %v2368_v33, %v2367_v44  ;;  %v7457_v33 = vld [vmem:[#allocation91_spill] sm:$0xff] }
 0x940   :  { %4397 = vtanh.f32 %v6076_v11 }
 0x94a   :  { %v4398_v25 = vpop.eup %4397 }
 0x94b   :  { %v2371_v30 = vmul.f32 %v4398_v25, %v4396_v19  ;;  %v7458_v25 = vld [vmem:[#allocation92_spill] sm:$0xff] }
 0x94d   :  { %v2372_v24 = vpack.c.bf16 %v2371_v30, %v2371_v30 }
 0x94f   :  { %2406 = vmatmul.mubr.bf16.vlgmr.msra.gmra.mrb[48].mxu0 %v2372_v24  ;;  %2447 = vmatmul.mubr.bf16.vlgmr.msra.gmra.mrb[48].mxu1 %v2372_v24  ;;  %v7459_v24 = vld [vmem:[#allocation93_spill] sm:$0xff] }
 0x950   :  { %2461 = vmatpush1.bf16.msra.mxu0 %v5707_v38  ;;  %2502 = vmatpush1.bf16.msra.mxu1 %v5710_v29  ;;  %v7410_v38 = vld [vmem:[#allocation53_spill] sm:$0xff]  ;;  %v7411_v29 = vld [vmem:[#allocation54_spill] sm:$0xff] }
 0x951   :  { %2462 = vmatprep.subr.bf16.mxu0 %v5713_v21  ;;  %2503 = vmatprep.subr.bf16.mxu1 %v5716_v22  ;;  %v7412_v21 = vld [vmem:[#allocation55_spill] sm:$0xff]  ;;  %v7413_v22 = vld [vmem:[#allocation56_spill] sm:$0xff] }
 0x952   :  { %2492 = vmatprep.mubr.bf16.mxu0 %v7143_v31  ;;  %2533 = vmatprep.mubr.bf16.mxu1 %v7143_v31 }
 0x954   :  { %2463 = vmatpush1.bf16.msra.mxu0 %v5721_v23  ;;  %2504 = vmatpush1.bf16.msra.mxu1 %v5724_v18  ;;  %v7414_v23 = vld [vmem:[#allocation57_spill] sm:$0xff]  ;;  %v7415_v18 = vld [vmem:[#allocation58_spill] sm:$0xff] }
 0x955   :  { %2464 = vmatprep.subr.bf16.mxu0 %v5727_v35  ;;  %2505 = vmatprep.subr.bf16.mxu1 %v5730_v27  ;;  %v7416_v35 = vld [vmem:[#allocation59_spill] sm:$0xff]  ;;  %v7417_v27 = vld [vmem:[#allocation60_spill] sm:$0xff] }
 0x958   :  { %2465 = vmatpush1.bf16.msra.mxu0 %v5733_v8  ;;  %2506 = vmatpush1.bf16.msra.mxu1 %v5736_v26  ;;  %v7418_v8 = vld [vmem:[#allocation61_spill] sm:$0xff]  ;;  %v7419_v26 = vld [vmem:[#allocation62_spill] sm:$0xff] }
 0x959   :  { %2466 = vmatprep.subr.bf16.mxu0 %v5739_v53  ;;  %2507 = vmatprep.subr.bf16.mxu1 %v5742_v9  ;;  %v7420_v53 = vld [vmem:[#allocation63_spill] sm:$0xff]  ;;  %v7421_v9 = vld [vmem:[#allocation64_spill] sm:$0xff] }
 0x95c   :  { %2467 = vmatpush1.bf16.msra.mxu0 %v7348_v10  ;;  %2508 = vmatpush1.bf16.msra.mxu1 %v7349_v58  ;;  %v7427_v10 = vld [vmem:[#allocation70_spill] sm:$0xff]  ;;  %v7428_v58 = vld [vmem:[#allocation71_spill] sm:$0xff] }
 0x95d   :  { %2468 = vmatprep.subr.bf16.mxu0 %v5751_v20  ;;  %2509 = vmatprep.subr.bf16.mxu1 %v5754_v15  ;;  %v7422_v20 = vld [vmem:[#allocation65_spill] sm:$0xff]  ;;  %v7423_v15 = vld [vmem:[#allocation66_spill] sm:$0xff] }
 0x960   :  { %2469 = vmatpush1.bf16.msra.mxu0 %v5757_v17  ;;  %2510 = vmatpush1.bf16.msra.mxu1 %v5760_v28  ;;  %v7424_v17 = vld [vmem:[#allocation67_spill] sm:$0xff]  ;;  %v7425_v28 = vld [vmem:[#allocation68_spill] sm:$0xff] }
 0x961   :  { %2470 = vmatprep.subr.bf16.mxu0 %v7410_v38  ;;  %2511 = vmatprep.subr.bf16.mxu1 %v7411_v29 }
 0x964   :  { %2471 = vmatpush1.bf16.msra.mxu0 %v7412_v21  ;;  %2512 = vmatpush1.bf16.msra.mxu1 %v7413_v22 }
 0x965   :  { %2472 = vmatprep.subr.bf16.mxu0 %v7414_v23  ;;  %2513 = vmatprep.subr.bf16.mxu1 %v7415_v18 }
 0x968   :  { %2473 = vmatpush1.bf16.msra.mxu0 %v7416_v35  ;;  %2514 = vmatpush1.bf16.msra.mxu1 %v7417_v27 }
 0x969   :  { %2474 = vmatprep.subr.bf16.mxu0 %v7418_v8  ;;  %2515 = vmatprep.subr.bf16.mxu1 %v7419_v26 }
 0x96c   :  { %2475 = vmatpush1.bf16.msra.mxu0 %v7420_v53  ;;  %2516 = vmatpush1.bf16.msra.mxu1 %v7421_v9 }
 0x96d   :  { %2571 = vmatprep.subr.bf16.mxu0 %v7422_v20  ;;  %2612 = vmatprep.subr.bf16.mxu1 %v7423_v15 }
 0x96f   :  { %2493 = vmatmul.mubr.bf16.vlgmr.msra.gmra.mrb[52].mxu0 %v6033_v61  ;;  %2534 = vmatmul.mubr.bf16.vlgmr.msra.gmra.mrb[52].mxu1 %v6033_v61  ;;  %v7432_v61 = vld [vmem:[#allocation81_spill] sm:$0xff] }
 0x970   :  { %2572 = vmatpush1.bf16.msra.mxu0 %v7424_v17  ;;  %2613 = vmatpush1.bf16.msra.mxu1 %v7425_v28 }
 0x971   :  { %2573 = vmatprep.subr.bf16.mxu0 %v7426_v2  ;;  %2614 = vmatprep.subr.bf16.mxu1 %v7427_v10 }
 0x972   :  { %2603 = vmatprep.mubr.bf16.mxu0 %v7143_v31  ;;  %2644 = vmatprep.mubr.bf16.mxu1 %v7143_v31 }
 0x974   :  { %2574 = vmatpush1.bf16.msra.mxu0 %v7428_v58  ;;  %2615 = vmatpush1.bf16.msra.mxu1 %v7429_v41 }
 0x975   :  { %2575 = vmatprep.subr.bf16.mxu0 %v7430_v42  ;;  %2616 = vmatprep.subr.bf16.mxu1 %v7431_v43 }
 0x978   :  { %2576 = vmatpush1.bf16.msra.mxu0 %v7432_v61  ;;  %2617 = vmatpush1.bf16.msra.mxu1 %v7433_v45 }
 0x979   :  { %2577 = vmatprep.subr.bf16.mxu0 %v7434_v46  ;;  %2618 = vmatprep.subr.bf16.mxu1 %v7435_v47 }
 0x97c   :  { %2578 = vmatpush1.bf16.msra.mxu0 %v7436_v48  ;;  %2619 = vmatpush1.bf16.msra.mxu1 %v7437_v49 }
 0x97d   :  { %2579 = vmatprep.subr.bf16.mxu0 %v7438_v50  ;;  %2620 = vmatprep.subr.bf16.mxu1 %v7439_v52 }
 0x980   :  { %2580 = vmatpush1.bf16.msra.mxu0 %v7440_v54  ;;  %2621 = vmatpush1.bf16.msra.mxu1 %v7441_v62 }
 0x981   :  { %2581 = vmatprep.subr.bf16.mxu0 %v7442_v55  ;;  %2622 = vmatprep.subr.bf16.mxu1 %v7443_v57 }
 0x984   :  { %2582 = vmatpush1.bf16.msra.mxu0 %v7444_v60  ;;  %2623 = vmatpush1.bf16.msra.mxu1 %v7445_v7 }
 0x985   :  { %2583 = vmatprep.subr.bf16.mxu0 %v7446_v32  ;;  %2624 = vmatprep.subr.bf16.mxu1 %v7447_v36 }
 0x988   :  { %2584 = vmatpush1.bf16.msra.mxu0 %v7448_v37  ;;  %2625 = vmatpush1.bf16.msra.mxu1 %v7449_v39 }
 0x989   :  { %2585 = vmatprep.subr.bf16.mxu0 %v7450_v63  ;;  %2626 = vmatprep.subr.bf16.mxu1 %v7451_v3 }
 0x98c   :  { %2586 = vmatpush1.bf16.msra.mxu0 %v7452_v4  ;;  %2627 = vmatpush1.bf16.msra.mxu1 %v7453_v5 }
 0x98d   :  { %2682 = vmatprep.subr.bf16.mxu0 %v6147_v0  ;;  %2723 = vmatprep.subr.bf16.mxu1 %v6150_v14 }
 0xa42   :  { %v2494_v13 = vpop.f32.mrb[52].mxu0  ;;  %v2535_v6 = vpop.f32.mrb[52].mxu1 }
 0xa43   :  { %v2542_v12 = vadd.f32 %v2494_v13, %v7456_v34  ;;  %v2544_v16 = vadd.f32 %v2535_v6, %v7457_v33  ;;  %v2496_v44 = vpop.f32.mrb[53].mxu0  ;;  %v2537_v19 = vpop.f32.mrb[53].mxu1 }
 0xa44   :  { %v2543_v30 = vadd.f32 %v2496_v44, %v7458_v25  ;;  %v2545_v38 = vadd.f32 %v2537_v19, %v7459_v24  ;;  %v2498_v29 = vpop.f32.mrb[54].mxu0  ;;  %v2539_v5 = vpop.f32.mrb[54].mxu1  ;;  %v6174_v25 = vld [vmem:[#allocation11 + $0x2c] ss:$16 sps:$4 sm:$0xff]   ;;  %v6182_v24 = vld [vmem:[#allocation11 + $0x28] ss:$16 sps:$4 sm:$0xff]  }
 0xa45   :  { %v3895_v4 = vmul.f32 -1.442695, %v2542_v12  ;;  %v2499_v0 = vpop.f32.mrb[55].mxu0  ;;  %v2540_v3 = vpop.f32.mrb[55].mxu1  ;;  %7460 = vst [vmem:[#allocation33_spill] sm:$0xff] %v6174_v25  ;;  %7462 = vst [vmem:[#allocation35_spill] sm:$0xff] %v6182_v24 }
 0xa46   :  { %v3896_v63 = vmul.f32 -1.442695, %v2543_v30  ;;  %v3897_v14 = vmul.f32 -1.442695, %v2545_v38  ;;  %v6179_v30 = vld [vmem:[#allocation11 + $0x20] ss:$16 sps:$4 sm:$0xff]  }
 0xa47   :  { %4399 = vpow2.f32 %v3895_v4  ;;  %7461 = vst [vmem:[#allocation34_spill] sm:$0xff] %v6179_v30  ;;  %v6185_v38 = vld [vmem:[#allocation11 + $0x44] ss:$16 sps:$4 sm:$0xff]   ;;  %v6188_v29 = vld [vmem:[#allocation11 + $0x4c] ss:$16 sps:$4 sm:$0xff]  }
 0xa48   :  { %4401 = vpow2.f32 %v3896_v63  ;;  %7463 = vst [vmem:[#allocation36_spill] sm:$0xff] %v6185_v38  ;;  %7464 = vst [vmem:[#allocation37_spill] sm:$0xff] %v6188_v29 }
 0xa49   :  { %4403 = vpow2.f32 %v3897_v14 }
 0xa4a   :  { %4405 = vtanh.f32 %v2544_v16  ;;  %v6168_v16 = vld [vmem:[#allocation11 + $0x8] ss:$16 sps:$4 sm:$0xff]  }
 0xa51   :  { %v4400_v39 = vpop.eup %4399 }
 0xa52   :  { %v4402_v37 = vpop.eup %4401  ;;  %v2549_v13 = vadd.f32 1.0, %v4400_v39 }
 0xa53   :  { %v2555_v6 = vadd.f32 1.0, %v4402_v37  ;;  %v4404_v34 = vpop.eup %4403  ;;  %v6165_v37 = vld [vmem:[#allocation11] ss:$16 sps:$4 sm:$0xff]  }
 0xa54   :  { %4407 = vrcp.f32 %v2549_v13  ;;  %v4406_v33 = vpop.eup %4405  ;;  %v2562_v12 = vadd.f32 1.0, %v4404_v34  ;;  %v6191_v13 = vld [vmem:[#allocation11 + $0x40] ss:$16 sps:$4 sm:$0xff]   ;;  %v6197_v34 = vld [vmem:[#allocation11 + $0x64] ss:$16 sps:$4 sm:$0xff]  }
 0xa55   :  { %4409 = vrcp.f32 %v2555_v6  ;;  %7465 = vst [vmem:[#allocation51_spill] sm:$0xff] %v6191_v13  ;;  %v6194_v6 = vld [vmem:[#allocation11 + $0x48] ss:$16 sps:$4 sm:$0xff]   ;;  %7467 = vst [vmem:[#allocation86_spill] sm:$0xff] %v6197_v34 }
 0xa56   :  { %4411 = vrcp.f32 %v2562_v12  ;;  %7466 = vst [vmem:[#allocation52_spill] sm:$0xff] %v6194_v6  ;;  %v6212_v12 = vld [vmem:[#allocation11 + $0x8c] ss:$16 sps:$4 sm:$0xff]  }
 0xa57   :  { %7472 = vst [vmem:[#allocation39_spill] sm:$0xff] %v6212_v12 }
 0xa5e   :  { %v4408_v44 = vpop.eup %4407 }
 0xa5f   :  { %v4410_v19 = vpop.eup %4409  ;;  %v2566_v5 = vmul.f32 %v4408_v44, %v4406_v33  ;;  %v6200_v33 = vld [vmem:[#allocation11 + $0x6c] ss:$16 sps:$4 sm:$0xff]   ;;  %v6203_v44 = vld [vmem:[#allocation11 + $0x60] ss:$16 sps:$4 sm:$0xff]  }
 0xa60   :  { %v2565_v3 = vmul.f32 %v4410_v19, %v6030_v1  ;;  %v4412_v63 = vpop.eup %4411  ;;  %v6171_v1 = vld [vmem:[#allocation11 + $0x24] ss:$16 sps:$4 sm:$0xff]   ;;  %7468 = vst [vmem:[#allocation87_spill] sm:$0xff] %v6200_v33  ;;  %7469 = vst [vmem:[#allocation88_spill] sm:$0xff] %v6203_v44  ;;  %v6206_v19 = vld [vmem:[#allocation11 + $0x68] ss:$16 sps:$4 sm:$0xff]  }
 0xa61   :  { %7470 = vst [vmem:[#allocation89_spill] sm:$0xff] %v6206_v19 }
 0xa62   :  { %v6158_v0 = vadd.f32 %v2566_v5, %v2565_v3  ;;  %v6209_v5 = vld [vmem:[#allocation11 + $0x84] ss:$16 sps:$4 sm:$0xff]   ;;  %v6215_v3 = vld [vmem:[#allocation11 + $0x80] ss:$16 sps:$4 sm:$0xff]  }
 0xa63   :  { %7471 = vst [vmem:[#allocation38_spill] sm:$0xff] %v6209_v5  ;;  %7473 = vst [vmem:[#allocation40_spill] sm:$0xff] %v6215_v3 }
 0xa64   :  { %4413 = vtanh.f32 %v6158_v0 }
 0xa6e   :  { %v4414_v39 = vpop.eup %4413 }
 0xa6f   :  { %v2569_v4 = vmul.f32 %v4414_v39, %v4412_v63  ;;  %v6218_v63 = vld [vmem:[#allocation11 + $0x88] ss:$16 sps:$4 sm:$0xff]   ;;  %v6221_v39 = vld [vmem:[#allocation11 + $0xa4] ss:$16 sps:$4 sm:$0xff]  }
 0xa70   :  { %7474 = vst [vmem:[#allocation41_spill] sm:$0xff] %v6218_v63  ;;  %7475 = vst [vmem:[#allocation42_spill] sm:$0xff] %v6221_v39 }
 0xa71   :  { %v6161_v14 = vpack.c.bf16 %v2569_v4, %v2569_v4  ;;  %v6224_v4 = vld [vmem:[#allocation11 + $0xac] ss:$16 sps:$4 sm:$0xff]  }
 0xa72   :  { %7476 = vst [vmem:[#allocation43_spill] sm:$0xff] %v6224_v4 }
 0xa73   :  { %2604 = vmatmul.mubr.bf16.vlgmr.msra.gmra.mrb[48].mxu0 %v6161_v14  ;;  %2645 = vmatmul.mubr.bf16.vlgmr.msra.gmra.mrb[48].mxu1 %v6161_v14 }
 0xa74   :  { %2683 = vmatpush1.bf16.msra.mxu0 %v6165_v37  ;;  %2724 = vmatpush1.bf16.msra.mxu1 %v6168_v16 }
 0xa75   :  { %2684 = vmatprep.subr.bf16.mxu0 %v6171_v1  ;;  %2725 = vmatprep.subr.bf16.mxu1 %v6174_v25 }
 0xa76   :  { %2714 = vmatprep.mubr.bf16.mxu0 %v7143_v31  ;;  %2755 = vmatprep.mubr.bf16.mxu1 %v7143_v31 }
 0xa78   :  { %2685 = vmatpush1.bf16.msra.mxu0 %v6179_v30  ;;  %2726 = vmatpush1.bf16.msra.mxu1 %v6182_v24 }
 0xa79   :  { %2686 = vmatprep.subr.bf16.mxu0 %v6185_v38  ;;  %2727 = vmatprep.subr.bf16.mxu1 %v6188_v29 }
 0xa7c   :  { %2687 = vmatpush1.bf16.msra.mxu0 %v6191_v13  ;;  %2728 = vmatpush1.bf16.msra.mxu1 %v6194_v6 }
 0xa7d   :  { %2688 = vmatprep.subr.bf16.mxu0 %v6197_v34  ;;  %2729 = vmatprep.subr.bf16.mxu1 %v6200_v33 }
 0xa80   :  { %2689 = vmatpush1.bf16.msra.mxu0 %v6203_v44  ;;  %2730 = vmatpush1.bf16.msra.mxu1 %v6206_v19 }
 0xa81   :  { %2690 = vmatprep.subr.bf16.mxu0 %v6209_v5  ;;  %2731 = vmatprep.subr.bf16.mxu1 %v6212_v12  ;;  %v6227_v5 = vld [vmem:[#allocation11 + $0xa0] ss:$16 sps:$4 sm:$0xff]   ;;  %v6230_v12 = vld [vmem:[#allocation11 + $0xa8] ss:$16 sps:$4 sm:$0xff]  }
 0xa82   :  { %7477 = vst [vmem:[#allocation44_spill] sm:$0xff] %v6227_v5  ;;  %7478 = vst [vmem:[#allocation45_spill] sm:$0xff] %v6230_v12 }
 0xa84   :  { %2691 = vmatpush1.bf16.msra.mxu0 %v6215_v3  ;;  %2732 = vmatpush1.bf16.msra.mxu1 %v6218_v63  ;;  %v6233_v3 = vld [vmem:[#allocation11 + $0xc4] ss:$16 sps:$4 sm:$0xff]   ;;  %v6236_v63 = vld [vmem:[#allocation11 + $0xcc] ss:$16 sps:$4 sm:$0xff]  }
 0xa85   :  { %2692 = vmatprep.subr.bf16.mxu0 %v6221_v39  ;;  %2733 = vmatprep.subr.bf16.mxu1 %v6224_v4  ;;  %7479 = vst [vmem:[#allocation46_spill] sm:$0xff] %v6233_v3  ;;  %7480 = vst [vmem:[#allocation47_spill] sm:$0xff] %v6236_v63  ;;  %v6239_v39 = vld [vmem:[#allocation11 + $0xc0] ss:$16 sps:$4 sm:$0xff]   ;;  %v6242_v4 = vld [vmem:[#allocation11 + $0xc8] ss:$16 sps:$4 sm:$0xff]  }
 0xa86   :  { %7481 = vst [vmem:[#allocation48_spill] sm:$0xff] %v6239_v39  ;;  %7482 = vst [vmem:[#allocation49_spill] sm:$0xff] %v6242_v4 }
 0xa88   :  { %2693 = vmatpush1.bf16.msra.mxu0 %v6227_v5  ;;  %2734 = vmatpush1.bf16.msra.mxu1 %v6230_v12  ;;  %v6245_v5 = vld [vmem:[#allocation11 + $0xe4] ss:$16 sps:$4 sm:$0xff]   ;;  %v6248_v12 = vld [vmem:[#allocation11 + $0xec] ss:$16 sps:$4 sm:$0xff]  }
 0xa89   :  { %2694 = vmatprep.subr.bf16.mxu0 %v6233_v3  ;;  %2735 = vmatprep.subr.bf16.mxu1 %v6236_v63  ;;  %7483 = vst [vmem:[#allocation50_spill] sm:$0xff] %v6245_v5  ;;  %7484 = vst [vmem:[#allocation53_spill] sm:$0xff] %v6248_v12  ;;  %v6251_v3 = vld [vmem:[#allocation11 + $0xe0] ss:$16 sps:$4 sm:$0xff]   ;;  %v6254_v63 = vld [vmem:[#allocation11 + $0xe8] ss:$16 sps:$4 sm:$0xff]  }
 0xa8a   :  { %7485 = vst [vmem:[#allocation54_spill] sm:$0xff] %v6251_v3  ;;  %7486 = vst [vmem:[#allocation55_spill] sm:$0xff] %v6254_v63 }
 0xa8c   :  { %2695 = vmatpush1.bf16.msra.mxu0 %v6239_v39  ;;  %2736 = vmatpush1.bf16.msra.mxu1 %v6242_v4  ;;  %v6257_v39 = vld [vmem:[#allocation8 + $0x4] ss:$16 sps:$4 sm:$0xff]   ;;  %v6260_v4 = vld [vmem:[#allocation8 + $0xc] ss:$16 sps:$4 sm:$0xff]  }
 0xa8d   :  { %2696 = vmatprep.subr.bf16.mxu0 %v6245_v5  ;;  %2737 = vmatprep.subr.bf16.mxu1 %v6248_v12  ;;  %7487 = vst [vmem:[#allocation56_spill] sm:$0xff] %v6257_v39  ;;  %7488 = vst [vmem:[#allocation57_spill] sm:$0xff] %v6260_v4 }
 0xa90   :  { %2697 = vmatpush1.bf16.msra.mxu0 %v6251_v3  ;;  %2738 = vmatpush1.bf16.msra.mxu1 %v6254_v63 }
 0xa91   :  { %2769 = vmatprep.subr.bf16.mxu0 %v6257_v39  ;;  %2810 = vmatprep.subr.bf16.mxu1 %v6260_v4 }
 0xb46   :  { %v2605_v5 = vpop.f32.mrb[48].mxu0  ;;  %v2646_v19 = vpop.f32.mrb[48].mxu1 }
 0xb47   :  { %v3973_v12 = vadd.f32 %v2605_v5, %v7409_v51  ;;  %v2607_v44 = vpop.f32.mrb[49].mxu0  ;;  %v2648_v33 = vpop.f32.mrb[49].mxu1  ;;  %v3975_v4 = vadd.f32 %v2646_v19, %v5509_v59 }
 0xb48   :  { %v3974_v3 = vadd.f32 %v2607_v44, %v5498_v40  ;;  %v2609_v34 = vpop.f32.mrb[50].mxu0  ;;  %v2650_v6 = vpop.f32.mrb[50].mxu1  ;;  %v3976_v39 = vadd.f32 %v2648_v33, %v5504_v56 }
 0xb49   :  { %v3898_v13 = vmul.f32 -1.442695, %v3973_v12  ;;  %v2610_v63 = vpop.f32.mrb[51].mxu0  ;;  %v2651_v29 = vpop.f32.mrb[51].mxu1 }
 0xb4a   :  { %v3899_v38 = vmul.f32 -1.442695, %v3974_v3  ;;  %v3900_v24 = vmul.f32 -1.442695, %v3976_v39  ;;  %v6280_v63 = vld [vmem:[#allocation8 + $0x2c] ss:$16 sps:$4 sm:$0xff]  }
 0xb4b   :  { %4415 = vpow2.f32 %v3898_v13  ;;  %v6285_v39 = vld [vmem:[#allocation8 + $0x20] ss:$16 sps:$4 sm:$0xff]  }
 0xb4c   :  { %4417 = vpow2.f32 %v3899_v38 }
 0xb4d   :  { %4419 = vpow2.f32 %v3900_v24 }
 0xb4e   :  { %4421 = vtanh.f32 %v3975_v4  ;;  %v6288_v4 = vld [vmem:[#allocation8 + $0x28] ss:$16 sps:$4 sm:$0xff]  }
 0xb55   :  { %v4416_v30 = vpop.eup %4415 }
 0xb56   :  { %v4418_v25 = vpop.eup %4417  ;;  %v2660_v5 = vadd.f32 1.0, %v4416_v30 }
 0xb57   :  { %v2666_v51 = vadd.f32 1.0, %v4418_v25  ;;  %v4420_v6 = vpop.eup %4419  ;;  %v6274_v25 = vld [vmem:[#allocation8 + $0x8] ss:$16 sps:$4 sm:$0xff]  }
 0xb58   :  { %4423 = vrcp.f32 %v2660_v5  ;;  %v4422_v34 = vpop.eup %4421  ;;  %v2673_v13 = vadd.f32 1.0, %v4420_v6  ;;  %v6291_v5 = vld [vmem:[#allocation8 + $0x44] ss:$16 sps:$4 sm:$0xff]   ;;  %v6294_v6 = vld [vmem:[#allocation8 + $0x4c] ss:$16 sps:$4 sm:$0xff]  }
 0xb59   :  { %4425 = vrcp.f32 %v2666_v51  ;;  %v6271_v51 = vld [vmem:[#allocation8] ss:$16 sps:$4 sm:$0xff]  }
 0xb5a   :  { %4427 = vrcp.f32 %v2673_v13  ;;  %v6309_v13 = vld [vmem:[#allocation8 + $0x60] ss:$16 sps:$4 sm:$0xff]  }
 0xb5b   :  { %7489 = vst [vmem:[#allocation58_spill] sm:$0xff] %v6309_v13 }
 0xb62   :  { %v4424_v44 = vpop.eup %4423 }
 0xb63   :  { %v4426_v29 = vpop.eup %4425  ;;  %v2677_v12 = vmul.f32 %v4424_v44, %v4422_v34  ;;  %v6297_v34 = vld [vmem:[#allocation8 + $0x40] ss:$16 sps:$4 sm:$0xff]   ;;  %v6300_v44 = vld [vmem:[#allocation8 + $0x48] ss:$16 sps:$4 sm:$0xff]  }
 0xb64   :  { %v2676_v38 = vmul.f32 %v4426_v29, %v6076_v11  ;;  %v4428_v19 = vpop.eup %4427  ;;  %v6277_v11 = vld [vmem:[#allocation8 + $0x24] ss:$16 sps:$4 sm:$0xff]  }
 0xb65   :  { %v6303_v29 = vld [vmem:[#allocation8 + $0x64] ss:$16 sps:$4 sm:$0xff]  }
 0xb66   :  { %v6268_v33 = vadd.f32 %v2677_v12, %v2676_v38  ;;  %v6306_v12 = vld [vmem:[#allocation8 + $0x6c] ss:$16 sps:$4 sm:$0xff]   ;;  %v6312_v38 = vld [vmem:[#allocation8 + $0x68] ss:$16 sps:$4 sm:$0xff]  }
 0xb67   :  { %7490 = vst [vmem:[#allocation59_spill] sm:$0xff] %v6312_v38 }
 0xb68   :  { %4429 = vtanh.f32 %v6268_v33 }
 0xb72   :  { %v4430_v30 = vpop.eup %4429 }
 0xb73   :  { %v2680_v24 = vmul.f32 %v4430_v30, %v4428_v19  ;;  %v6315_v19 = vld [vmem:[#allocation8 + $0x84] ss:$16 sps:$4 sm:$0xff]   ;;  %v6318_v30 = vld [vmem:[#allocation8 + $0x8c] ss:$16 sps:$4 sm:$0xff]  }
 0xb75   :  { %v2681_v3 = vpack.c.bf16 %v2680_v24, %v2680_v24  ;;  %v6321_v24 = vld [vmem:[#allocation8 + $0x80] ss:$16 sps:$4 sm:$0xff]  }
 0xb77   :  { %2715 = vmatmul.mubr.bf16.vlgmr.msra.gmra.mrb[56].mxu0 %v2681_v3  ;;  %2756 = vmatmul.mubr.bf16.vlgmr.msra.gmra.mrb[56].mxu1 %v2681_v3  ;;  %v6324_v3 = vld [vmem:[#allocation8 + $0x88] ss:$16 sps:$4 sm:$0xff]  }
 0xb78   :  { %2770 = vmatpush1.bf16.msra.mxu0 %v6271_v51  ;;  %2811 = vmatpush1.bf16.msra.mxu1 %v6274_v25 }
 0xb79   :  { %2771 = vmatprep.subr.bf16.mxu0 %v6277_v11  ;;  %2812 = vmatprep.subr.bf16.mxu1 %v6280_v63 }
 0xb7a   :  { %2801 = vmatprep.mubr.bf16.mxu0 %v7143_v31  ;;  %2842 = vmatprep.mubr.bf16.mxu1 %v7143_v31 }
 0xb7c   :  { %2772 = vmatpush1.bf16.msra.mxu0 %v6285_v39  ;;  %2813 = vmatpush1.bf16.msra.mxu1 %v6288_v4 }
 0xb7d   :  { %2773 = vmatprep.subr.bf16.mxu0 %v6291_v5  ;;  %2814 = vmatprep.subr.bf16.mxu1 %v6294_v6 }
 0xb80   :  { %2774 = vmatpush1.bf16.msra.mxu0 %v6297_v34  ;;  %2815 = vmatpush1.bf16.msra.mxu1 %v6300_v44 }
 0xb81   :  { %2775 = vmatprep.subr.bf16.mxu0 %v6303_v29  ;;  %2816 = vmatprep.subr.bf16.mxu1 %v6306_v12 }
 0xb84   :  { %2776 = vmatpush1.bf16.msra.mxu0 %v6309_v13  ;;  %2817 = vmatpush1.bf16.msra.mxu1 %v6312_v38  ;;  %v6327_v13 = vld [vmem:[#allocation8 + $0xa4] ss:$16 sps:$4 sm:$0xff]   ;;  %v6330_v38 = vld [vmem:[#allocation8 + $0xac] ss:$16 sps:$4 sm:$0xff]  }
 0xb85   :  { %2777 = vmatprep.subr.bf16.mxu0 %v6315_v19  ;;  %2818 = vmatprep.subr.bf16.mxu1 %v6318_v30  ;;  %7491 = vst [vmem:[#allocation60_spill] sm:$0xff] %v6327_v13  ;;  %7492 = vst [vmem:[#allocation61_spill] sm:$0xff] %v6330_v38 }
 0xb88   :  { %2778 = vmatpush1.bf16.msra.mxu0 %v6321_v24  ;;  %2819 = vmatpush1.bf16.msra.mxu1 %v6324_v3 }
 0xb89   :  { %2779 = vmatprep.subr.bf16.mxu0 %v6327_v13  ;;  %2820 = vmatprep.subr.bf16.mxu1 %v6330_v38 }
 0xb8c   :  { %2780 = vmatpush1.bf16.msra.mxu0 %v7412_v21  ;;  %2821 = vmatpush1.bf16.msra.mxu1 %v7413_v22  ;;  %v7493_v21 = vld [vmem:[#allocation25_spill] sm:$0xff]  ;;  %v7494_v22 = vld [vmem:[#allocation26_spill] sm:$0xff] }
 0xb8d   :  { %2781 = vmatprep.subr.bf16.mxu0 %v7414_v23  ;;  %2822 = vmatprep.subr.bf16.mxu1 %v7415_v18  ;;  %v7495_v23 = vld [vmem:[#allocation27_spill] sm:$0xff]  ;;  %v7496_v18 = vld [vmem:[#allocation28_spill] sm:$0xff] }
 0xb90   :  { %2782 = vmatpush1.bf16.msra.mxu0 %v7416_v35  ;;  %2823 = vmatpush1.bf16.msra.mxu1 %v7417_v27  ;;  %v7497_v35 = vld [vmem:[#allocation29_spill] sm:$0xff]  ;;  %v7498_v27 = vld [vmem:[#allocation30_spill] sm:$0xff] }
 0xb91   :  { %2783 = vmatprep.subr.bf16.mxu0 %v7418_v8  ;;  %2824 = vmatprep.subr.bf16.mxu1 %v7419_v26  ;;  %v7499_v8 = vld [vmem:[#allocation31_spill] sm:$0xff]  ;;  %v7500_v26 = vld [vmem:[#allocation32_spill] sm:$0xff] }
 0xb94   :  { %2784 = vmatpush1.bf16.msra.mxu0 %v7420_v53  ;;  %2825 = vmatpush1.bf16.msra.mxu1 %v7421_v9 }
 0xb95   :  { %2880 = vmatprep.subr.bf16.mxu0 %v7422_v20  ;;  %2921 = vmatprep.subr.bf16.mxu1 %v7423_v15  ;;  %v7501_v20 = vld [vmem:[#allocation94_spill] sm:$0xff] }
 0xb97   :  { %2802 = vmatmul.mubr.bf16.vlgmr.msra.gmra.mrb[60].mxu0 %v6161_v14  ;;  %2843 = vmatmul.mubr.bf16.vlgmr.msra.gmra.mrb[60].mxu1 %v6161_v14 }
 0xb98   :  { %2881 = vmatpush1.bf16.msra.mxu0 %v7424_v17  ;;  %2922 = vmatpush1.bf16.msra.mxu1 %v7425_v28  ;;  %v7502_v17 = vld [vmem:[#allocation95_spill] sm:$0xff] }
 0xb99   :  { %2882 = vmatprep.subr.bf16.mxu0 %v7426_v2  ;;  %2923 = vmatprep.subr.bf16.mxu1 %v7427_v10 }
 0xb9a   :  { %2912 = vmatprep.mubr.bf16.mxu0 %v7143_v31  ;;  %2953 = vmatprep.mubr.bf16.mxu1 %v7143_v31 }
 0xb9c   :  { %2883 = vmatpush1.bf16.msra.mxu0 %v7428_v58  ;;  %2924 = vmatpush1.bf16.msra.mxu1 %v7429_v41  ;;  %v7503_v58 = vld [vmem:[#allocation96_spill] sm:$0xff] }
 0xb9d   :  { %2884 = vmatprep.subr.bf16.mxu0 %v7430_v42  ;;  %2925 = vmatprep.subr.bf16.mxu1 %v7431_v43  ;;  %v7504_v42 = vld [vmem:[#allocation97_spill] sm:$0xff] }
 0xba0   :  { %2885 = vmatpush1.bf16.msra.mxu0 %v7432_v61  ;;  %2926 = vmatpush1.bf16.msra.mxu1 %v7433_v45 }
 0xba1   :  { %2886 = vmatprep.subr.bf16.mxu0 %v7434_v46  ;;  %2927 = vmatprep.subr.bf16.mxu1 %v7435_v47 }
 0xba4   :  { %2887 = vmatpush1.bf16.msra.mxu0 %v7436_v48  ;;  %2928 = vmatpush1.bf16.msra.mxu1 %v7437_v49 }
 0xba5   :  { %2888 = vmatprep.subr.bf16.mxu0 %v7438_v50  ;;  %2929 = vmatprep.subr.bf16.mxu1 %v7439_v52 }
 0xba8   :  { %2889 = vmatpush1.bf16.msra.mxu0 %v7440_v54  ;;  %2930 = vmatpush1.bf16.msra.mxu1 %v7441_v62 }
 0xba9   :  { %2890 = vmatprep.subr.bf16.mxu0 %v7442_v55  ;;  %2931 = vmatprep.subr.bf16.mxu1 %v7443_v57 }
 0xbac   :  { %2891 = vmatpush1.bf16.msra.mxu0 %v7444_v60  ;;  %2932 = vmatpush1.bf16.msra.mxu1 %v7445_v7 }
 0xbad   :  { %2892 = vmatprep.subr.bf16.mxu0 %v7446_v32  ;;  %2933 = vmatprep.subr.bf16.mxu1 %v7447_v36 }
 0xbb0   :  { %2893 = vmatpush1.bf16.msra.mxu0 %v7493_v21  ;;  %2934 = vmatpush1.bf16.msra.mxu1 %v7494_v22 }
 0xbb1   :  { %2894 = vmatprep.subr.bf16.mxu0 %v7495_v23  ;;  %2935 = vmatprep.subr.bf16.mxu1 %v7496_v18 }
 0xbb4   :  { %2895 = vmatpush1.bf16.msra.mxu0 %v7497_v35  ;;  %2936 = vmatpush1.bf16.msra.mxu1 %v7498_v27 }
 0xbb5   :  { %2991 = vmatprep.subr.bf16.mxu0 %v7499_v8  ;;  %3032 = vmatprep.subr.bf16.mxu1 %v7500_v26 }
 0xc6a   :  { %v2803_v53 = vpop.f32.mrb[60].mxu0  ;;  %v2844_v9 = vpop.f32.mrb[60].mxu1 }
 0xc6b   :  { %v2851_v15 = vadd.f32 %v2803_v53, %v7501_v20  ;;  %v2853_v28 = vadd.f32 %v2844_v9, %v7502_v17  ;;  %v2805_v2 = vpop.f32.mrb[61].mxu0  ;;  %v2846_v10 = vpop.f32.mrb[61].mxu1  ;;  %v7506_v53 = vld [vmem:[#allocation34_spill] sm:$0xff]  ;;  %v7507_v9 = vld [vmem:[#allocation35_spill] sm:$0xff]  ;;  %v7508_v20 = vld [vmem:[#allocation36_spill] sm:$0xff] }
 0xc6c   :  { %v2852_v41 = vadd.f32 %v2805_v2, %v7503_v58  ;;  %v2854_v43 = vadd.f32 %v2846_v10, %v7504_v42  ;;  %v2807_v61 = vpop.f32.mrb[62].mxu0  ;;  %v2848_v45 = vpop.f32.mrb[62].mxu1  ;;  %v7510_v17 = vld [vmem:[#allocation51_spill] sm:$0xff]  ;;  %v7512_v2 = vld [vmem:[#allocation86_spill] sm:$0xff]  ;;  %v7514_v58 = vld [vmem:[#allocation88_spill] sm:$0xff] }
 0xc6d   :  { %v3901_v46 = vmul.f32 -1.442695, %v2851_v15  ;;  %v2808_v47 = vpop.f32.mrb[63].mxu0  ;;  %v2849_v48 = vpop.f32.mrb[63].mxu1  ;;  %v7509_v15 = vld [vmem:[#allocation37_spill] sm:$0xff]  ;;  %v7513_v10 = vld [vmem:[#allocation87_spill] sm:$0xff] }
 0xc6e   :  { %v3902_v49 = vmul.f32 -1.442695, %v2852_v41  ;;  %v3903_v50 = vmul.f32 -1.442695, %v2854_v43  ;;  %v7515_v41 = vld [vmem:[#allocation89_spill] sm:$0xff]  ;;  %v7516_v42 = vld [vmem:[#allocation38_spill] sm:$0xff] }
 0xc6f   :  { %4431 = vpow2.f32 %v3901_v46  ;;  %v7517_v43 = vld [vmem:[#allocation39_spill] sm:$0xff]  ;;  %v7518_v61 = vld [vmem:[#allocation40_spill] sm:$0xff]  ;;  %v7519_v45 = vld [vmem:[#allocation41_spill] sm:$0xff] }
 0xc70   :  { %4433 = vpow2.f32 %v3902_v49  ;;  %v7520_v46 = vld [vmem:[#allocation42_spill] sm:$0xff]  ;;  %v7521_v47 = vld [vmem:[#allocation43_spill] sm:$0xff]  ;;  %v7522_v48 = vld [vmem:[#allocation44_spill] sm:$0xff] }
 0xc71   :  { %4435 = vpow2.f32 %v3903_v50  ;;  %v7523_v49 = vld [vmem:[#allocation45_spill] sm:$0xff]  ;;  %v7524_v50 = vld [vmem:[#allocation46_spill] sm:$0xff] }
 0xc72   :  { %4437 = vtanh.f32 %v2853_v28  ;;  %v7511_v28 = vld [vmem:[#allocation52_spill] sm:$0xff] }
 0xc79   :  { %v4432_v52 = vpop.eup %4431 }
 0xc7a   :  { %v4434_v54 = vpop.eup %4433  ;;  %v2858_v62 = vadd.f32 1.0, %v4432_v52  ;;  %v7525_v52 = vld [vmem:[#allocation47_spill] sm:$0xff] }
 0xc7b   :  { %v2864_v55 = vadd.f32 1.0, %v4434_v54  ;;  %v4436_v57 = vpop.eup %4435  ;;  %v7526_v54 = vld [vmem:[#allocation48_spill] sm:$0xff] }
 0xc7c   :  { %4439 = vrcp.f32 %v2858_v62  ;;  %v4438_v60 = vpop.eup %4437  ;;  %v2871_v14 = vadd.f32 1.0, %v4436_v57  ;;  %v7527_v62 = vld [vmem:[#allocation49_spill] sm:$0xff] }
 0xc7d   :  { %4441 = vrcp.f32 %v2864_v55  ;;  %v7528_v55 = vld [vmem:[#allocation50_spill] sm:$0xff]  ;;  %v7529_v57 = vld [vmem:[#allocation53_spill] sm:$0xff] }
 0xc7e   :  { %4443 = vrcp.f32 %v2871_v14 }
 0xc86   :  { %v4440_v7 = vpop.eup %4439 }
 0xc87   :  { %v4442_v32 = vpop.eup %4441  ;;  %v2875_v36 = vmul.f32 %v4440_v7, %v4438_v60  ;;  %v7530_v60 = vld [vmem:[#allocation54_spill] sm:$0xff]  ;;  %v7531_v7 = vld [vmem:[#allocation55_spill] sm:$0xff] }
 0xc88   :  { %v2874_v21 = vmul.f32 %v4442_v32, %v6158_v0  ;;  %v4444_v23 = vpop.eup %4443  ;;  %v7505_v0 = vld [vmem:[#allocation33_spill] sm:$0xff]  ;;  %v7532_v32 = vld [vmem:[#allocation56_spill] sm:$0xff] }
 0xc8a   :  { %v6386_v22 = vadd.f32 %v2875_v36, %v2874_v21  ;;  %v7533_v36 = vld [vmem:[#allocation57_spill] sm:$0xff] }
 0xc8c   :  { %4445 = vtanh.f32 %v6386_v22 }
 0xc96   :  { %v4446_v18 = vpop.eup %4445 }
 0xc97   :  { %v2878_v35 = vmul.f32 %v4446_v18, %v4444_v23  ;;  %v7534_v23 = vld [vmem:[#allocation106_spill] sm:$0xff] }
 0xc99   :  { %v6389_v27 = vpack.c.bf16 %v2878_v35, %v2878_v35 }
 0xc9b   :  { %2913 = vmatmul.mubr.bf16.vlgmr.msra.gmra.mrb[56].mxu0 %v6389_v27  ;;  %2954 = vmatmul.mubr.bf16.vlgmr.msra.gmra.mrb[56].mxu1 %v6389_v27 }
 0xc9c   :  { %2992 = vmatpush1.bf16.msra.mxu0 %v6165_v37  ;;  %3033 = vmatpush1.bf16.msra.mxu1 %v6168_v16 }
 0xc9d   :  { %2993 = vmatprep.subr.bf16.mxu0 %v6171_v1  ;;  %3034 = vmatprep.subr.bf16.mxu1 %v7505_v0 }
 0xc9e   :  { %3023 = vmatprep.mubr.bf16.mxu0 %v7143_v31  ;;  %3064 = vmatprep.mubr.bf16.mxu1 %v7143_v31 }
 0xca0   :  { %2994 = vmatpush1.bf16.msra.mxu0 %v7506_v53  ;;  %3035 = vmatpush1.bf16.msra.mxu1 %v7507_v9 }
 0xca1   :  { %2995 = vmatprep.subr.bf16.mxu0 %v7508_v20  ;;  %3036 = vmatprep.subr.bf16.mxu1 %v7509_v15 }
 0xca4   :  { %2996 = vmatpush1.bf16.msra.mxu0 %v7510_v17  ;;  %3037 = vmatpush1.bf16.msra.mxu1 %v7511_v28 }
 0xca5   :  { %2997 = vmatprep.subr.bf16.mxu0 %v7512_v2  ;;  %3038 = vmatprep.subr.bf16.mxu1 %v7513_v10 }
 0xca8   :  { %2998 = vmatpush1.bf16.msra.mxu0 %v7514_v58  ;;  %3039 = vmatpush1.bf16.msra.mxu1 %v7515_v41 }
 0xca9   :  { %2999 = vmatprep.subr.bf16.mxu0 %v7516_v42  ;;  %3040 = vmatprep.subr.bf16.mxu1 %v7517_v43 }
 0xcac   :  { %3000 = vmatpush1.bf16.msra.mxu0 %v7518_v61  ;;  %3041 = vmatpush1.bf16.msra.mxu1 %v7519_v45 }
 0xcad   :  { %3001 = vmatprep.subr.bf16.mxu0 %v7520_v46  ;;  %3042 = vmatprep.subr.bf16.mxu1 %v7521_v47 }
 0xcb0   :  { %3002 = vmatpush1.bf16.msra.mxu0 %v7522_v48  ;;  %3043 = vmatpush1.bf16.msra.mxu1 %v7523_v49 }
 0xcb1   :  { %3003 = vmatprep.subr.bf16.mxu0 %v7524_v50  ;;  %3044 = vmatprep.subr.bf16.mxu1 %v7525_v52 }
 0xcb4   :  { %3004 = vmatpush1.bf16.msra.mxu0 %v7526_v54  ;;  %3045 = vmatpush1.bf16.msra.mxu1 %v7527_v62 }
 0xcb5   :  { %3005 = vmatprep.subr.bf16.mxu0 %v7528_v55  ;;  %3046 = vmatprep.subr.bf16.mxu1 %v7529_v57 }
 0xcb8   :  { %3006 = vmatpush1.bf16.msra.mxu0 %v7530_v60  ;;  %3047 = vmatpush1.bf16.msra.mxu1 %v7531_v7 }
 0xcb9   :  { %3078 = vmatprep.subr.bf16.mxu0 %v7532_v32  ;;  %3119 = vmatprep.subr.bf16.mxu1 %v7533_v36 }
 0xd6e   :  { %v2914_v14 = vpop.f32.mrb[56].mxu0  ;;  %v2955_v21 = vpop.f32.mrb[56].mxu1 }
 0xd6f   :  { %v3977_v18 = vadd.f32 %v2914_v14, %v7534_v23  ;;  %v2916_v35 = vpop.f32.mrb[57].mxu0  ;;  %v2957_v54 = vpop.f32.mrb[57].mxu1  ;;  %v3979_v36 = vadd.f32 %v2955_v21, %v5509_v59  ;;  %v6457_v21 = vld [vmem:[#allocation8 + $0xa0] ss:$16 sps:$4 sm:$0xff]  }
 0xd70   :  { %v3978_v62 = vadd.f32 %v2916_v35, %v5498_v40  ;;  %v2918_v52 = vpop.f32.mrb[58].mxu0  ;;  %v2959_v55 = vpop.f32.mrb[58].mxu1  ;;  %v3980_v32 = vadd.f32 %v2957_v54, %v5504_v56  ;;  %7537 = vst [vmem:[#allocation62_spill] sm:$0xff] %v6457_v21  ;;  %v6466_v35 = vld [vmem:[#allocation8 + $0xcc] ss:$16 sps:$4 sm:$0xff]  }
 0xd71   :  { %v3904_v50 = vmul.f32 -1.442695, %v3977_v18  ;;  %v2919_v57 = vpop.f32.mrb[59].mxu0  ;;  %v2960_v49 = vpop.f32.mrb[59].mxu1  ;;  %v6463_v18 = vld [vmem:[#allocation8 + $0xc4] ss:$16 sps:$4 sm:$0xff]  }
 0xd72   :  { %v3905_v60 = vmul.f32 -1.442695, %v3978_v62  ;;  %v3906_v7 = vmul.f32 -1.442695, %v3980_v32  ;;  %7539 = vst [vmem:[#allocation64_spill] sm:$0xff] %v6463_v18  ;;  %7540 = vst [vmem:[#allocation65_spill] sm:$0xff] %v6466_v35 }
 0xd73   :  { %4447 = vpow2.f32 %v3904_v50 }
 0xd74   :  { %4449 = vpow2.f32 %v3905_v60 }
 0xd75   :  { %4451 = vpow2.f32 %v3906_v7 }
 0xd76   :  { %4453 = vtanh.f32 %v3979_v36 }
 0xd7d   :  { %v4448_v48 = vpop.eup %4447 }
 0xd7e   :  { %v4450_v47 = vpop.eup %4449  ;;  %v2969_v14 = vadd.f32 1.0, %v4448_v48 }
 0xd7f   :  { %v2975_v23 = vadd.f32 1.0, %v4450_v47  ;;  %v4452_v52 = vpop.eup %4451  ;;  %v7536_v47 = vld [vmem:[#allocation59_spill] sm:$0xff] }
 0xd80   :  { %4455 = vrcp.f32 %v2969_v14  ;;  %v4454_v55 = vpop.eup %4453  ;;  %v2982_v50 = vadd.f32 1.0, %v4452_v52  ;;  %v6469_v14 = vld [vmem:[#allocation8 + $0xc0] ss:$16 sps:$4 sm:$0xff]   ;;  %v6472_v52 = vld [vmem:[#allocation8 + $0xc8] ss:$16 sps:$4 sm:$0xff]  }
 0xd81   :  { %4457 = vrcp.f32 %v2975_v23  ;;  %v6460_v23 = vld [vmem:[#allocation8 + $0xa8] ss:$16 sps:$4 sm:$0xff]   ;;  %7541 = vst [vmem:[#allocation66_spill] sm:$0xff] %v6469_v14  ;;  %7542 = vst [vmem:[#allocation67_spill] sm:$0xff] %v6472_v52 }
 0xd82   :  { %4459 = vrcp.f32 %v2982_v50  ;;  %7538 = vst [vmem:[#allocation63_spill] sm:$0xff] %v6460_v23  ;;  %v6487_v50 = vld [vmem:[#allocation9 + $0x4] ss:$16 sps:$4 sm:$0xff]  }
 0xd83   :  { %7547 = vst [vmem:[#allocation78_spill] sm:$0xff] %v6487_v50 }
 0xd8a   :  { %v4456_v57 = vpop.eup %4455 }
 0xd8b   :  { %v4458_v49 = vpop.eup %4457  ;;  %v2986_v62 = vmul.f32 %v4456_v57, %v4454_v55  ;;  %v6475_v55 = vld [vmem:[#allocation8 + $0xe4] ss:$16 sps:$4 sm:$0xff]   ;;  %v6478_v57 = vld [vmem:[#allocation8 + $0xec] ss:$16 sps:$4 sm:$0xff]  }
 0xd8c   :  { %v2985_v60 = vmul.f32 %v4458_v49, %v6268_v33  ;;  %v4460_v32 = vpop.eup %4459  ;;  %v7535_v33 = vld [vmem:[#allocation58_spill] sm:$0xff]  ;;  %7543 = vst [vmem:[#allocation68_spill] sm:$0xff] %v6475_v55  ;;  %7544 = vst [vmem:[#allocation69_spill] sm:$0xff] %v6478_v57  ;;  %v6481_v49 = vld [vmem:[#allocation8 + $0xe0] ss:$16 sps:$4 sm:$0xff]  }
 0xd8d   :  { %7545 = vst [vmem:[#allocation70_spill] sm:$0xff] %v6481_v49 }
 0xd8e   :  { %v6432_v54 = vadd.f32 %v2986_v62, %v2985_v60  ;;  %v6484_v62 = vld [vmem:[#allocation8 + $0xe8] ss:$16 sps:$4 sm:$0xff]   ;;  %v6490_v60 = vld [vmem:[#allocation9 + $0xc] ss:$16 sps:$4 sm:$0xff]  }
 0xd8f   :  { %7546 = vst [vmem:[#allocation71_spill] sm:$0xff] %v6484_v62  ;;  %7548 = vst [vmem:[#allocation79_spill] sm:$0xff] %v6490_v60 }
 0xd90   :  { %4461 = vtanh.f32 %v6432_v54 }
 0xd9a   :  { %v4462_v48 = vpop.eup %4461 }
 0xd9b   :  { %v2989_v7 = vmul.f32 %v4462_v48, %v4460_v32  ;;  %v6495_v32 = vld [vmem:[#allocation9] ss:$16 sps:$4 sm:$0xff]   ;;  %v6498_v48 = vld [vmem:[#allocation9 + $0x8] ss:$16 sps:$4 sm:$0xff]  }
 0xd9c   :  { %7549 = vst [vmem:[#allocation80_spill] sm:$0xff] %v6495_v32  ;;  %7550 = vst [vmem:[#allocation81_spill] sm:$0xff] %v6498_v48 }
 0xd9d   :  { %v2990_v36 = vpack.c.bf16 %v2989_v7, %v2989_v7  ;;  %v6501_v7 = vld [vmem:[#allocation9 + $0x24] ss:$16 sps:$4 sm:$0xff]  }
 0xd9e   :  { %7551 = vst [vmem:[#allocation72_spill] sm:$0xff] %v6501_v7 }
 0xd9f   :  { %3024 = vmatmul.mubr.bf16.vlgmr.msra.gmra.mrb[64].mxu0 %v2990_v36  ;;  %3065 = vmatmul.mubr.bf16.vlgmr.msra.gmra.mrb[64].mxu1 %v2990_v36  ;;  %v6504_v36 = vld [vmem:[#allocation9 + $0x2c] ss:$16 sps:$4 sm:$0xff]  }
 0xda0   :  { %3079 = vmatpush1.bf16.msra.mxu0 %v6271_v51  ;;  %3120 = vmatpush1.bf16.msra.mxu1 %v6274_v25  ;;  %7552 = vst [vmem:[#allocation73_spill] sm:$0xff] %v6504_v36 }
 0xda1   :  { %3080 = vmatprep.subr.bf16.mxu0 %v6277_v11  ;;  %3121 = vmatprep.subr.bf16.mxu1 %v6280_v63 }
 0xda2   :  { %3110 = vmatprep.mubr.bf16.mxu0 %v7143_v31  ;;  %3151 = vmatprep.mubr.bf16.mxu1 %v7143_v31 }
 0xda4   :  { %3081 = vmatpush1.bf16.msra.mxu0 %v6285_v39  ;;  %3122 = vmatpush1.bf16.msra.mxu1 %v6288_v4 }
 0xda5   :  { %3082 = vmatprep.subr.bf16.mxu0 %v6291_v5  ;;  %3123 = vmatprep.subr.bf16.mxu1 %v6294_v6 }
 0xda8   :  { %3083 = vmatpush1.bf16.msra.mxu0 %v6297_v34  ;;  %3124 = vmatpush1.bf16.msra.mxu1 %v6300_v44 }
 0xda9   :  { %3084 = vmatprep.subr.bf16.mxu0 %v6303_v29  ;;  %3125 = vmatprep.subr.bf16.mxu1 %v6306_v12 }
 0xdac   :  { %3085 = vmatpush1.bf16.msra.mxu0 %v7535_v33  ;;  %3126 = vmatpush1.bf16.msra.mxu1 %v7536_v47 }
 0xdad   :  { %3086 = vmatprep.subr.bf16.mxu0 %v6315_v19  ;;  %3127 = vmatprep.subr.bf16.mxu1 %v6318_v30 }
 0xdb0   :  { %3087 = vmatpush1.bf16.msra.mxu0 %v6321_v24  ;;  %3128 = vmatpush1.bf16.msra.mxu1 %v6324_v3 }
 0xdb1   :  { %3088 = vmatprep.subr.bf16.mxu0 %v6327_v13  ;;  %3129 = vmatprep.subr.bf16.mxu1 %v6330_v38 }
 0xdb4   :  { %3089 = vmatpush1.bf16.msra.mxu0 %v6457_v21  ;;  %3130 = vmatpush1.bf16.msra.mxu1 %v6460_v23 }
 0xdb5   :  { %3090 = vmatprep.subr.bf16.mxu0 %v6463_v18  ;;  %3131 = vmatprep.subr.bf16.mxu1 %v6466_v35 }
 0xdb8   :  { %3091 = vmatpush1.bf16.msra.mxu0 %v6469_v14  ;;  %3132 = vmatpush1.bf16.msra.mxu1 %v6472_v52  ;;  %v7582_v14 = vld [vmem:[#allocation101_spill] sm:$0xff] }
 0xdb9   :  { %3092 = vmatprep.subr.bf16.mxu0 %v6475_v55  ;;  %3133 = vmatprep.subr.bf16.mxu1 %v6478_v57  ;;  %v7581_v55 = vld [vmem:[#allocation100_spill] sm:$0xff] }
 0xdbc   :  { %3093 = vmatpush1.bf16.msra.mxu0 %v6481_v49  ;;  %3134 = vmatpush1.bf16.msra.mxu1 %v6484_v62  ;;  %v7580_v62 = vld [vmem:[#allocation99_spill] sm:$0xff] }
 0xdbd   :  { %3189 = vmatprep.subr.bf16.mxu0 %v6487_v50  ;;  %3230 = vmatprep.subr.bf16.mxu1 %v6490_v60  ;;  %v6524_v60 = vld [vmem:[#allocation9 + $0x48] ss:$16 sps:$4 sm:$0xff]  }
 0xdbe   :  { %7558 = vst [vmem:[#allocation21_spill] sm:$0xff] %v6524_v60  ;;  %v7579_v50 = vld [vmem:[#allocation98_spill] sm:$0xff] }
 0xdbf   :  { %3111 = vmatmul.mubr.bf16.vlgmr.msra.gmra.mrb[68].mxu0 %v6389_v27  ;;  %3152 = vmatmul.mubr.bf16.vlgmr.msra.gmra.mrb[68].mxu1 %v6389_v27  ;;  %v6509_v27 = vld [vmem:[#allocation9 + $0x20] ss:$16 sps:$4 sm:$0xff]  }
 0xdc0   :  { %3190 = vmatpush1.bf16.msra.mxu0 %v6495_v32  ;;  %3231 = vmatpush1.bf16.msra.mxu1 %v6498_v48  ;;  %7553 = vst [vmem:[#allocation74_spill] sm:$0xff] %v6509_v27  ;;  %v6512_v32 = vld [vmem:[#allocation9 + $0x28] ss:$16 sps:$4 sm:$0xff]   ;;  %v6515_v48 = vld [vmem:[#allocation9 + $0x44] ss:$16 sps:$4 sm:$0xff]  }
 0xdc1   :  { %3191 = vmatprep.subr.bf16.mxu0 %v6501_v7  ;;  %3232 = vmatprep.subr.bf16.mxu1 %v6504_v36  ;;  %7554 = vst [vmem:[#allocation75_spill] sm:$0xff] %v6512_v32  ;;  %7555 = vst [vmem:[#allocation76_spill] sm:$0xff] %v6515_v48  ;;  %v6518_v7 = vld [vmem:[#allocation9 + $0x4c] ss:$16 sps:$4 sm:$0xff]   ;;  %v6521_v36 = vld [vmem:[#allocation9 + $0x40] ss:$16 sps:$4 sm:$0xff]  }
 0xdc2   :  { %3221 = vmatprep.mubr.bf16.mxu0 %v7143_v31  ;;  %3262 = vmatprep.mubr.bf16.mxu1 %v7143_v31  ;;  %7556 = vst [vmem:[#allocation77_spill] sm:$0xff] %v6518_v7  ;;  %7557 = vst [vmem:[#allocation20_spill] sm:$0xff] %v6521_v36 }
 0xdc4   :  { %3192 = vmatpush1.bf16.msra.mxu0 %v6509_v27  ;;  %3233 = vmatpush1.bf16.msra.mxu1 %v6512_v32  ;;  %v6527_v27 = vld [vmem:[#allocation9 + $0x64] ss:$16 sps:$4 sm:$0xff]   ;;  %v6530_v32 = vld [vmem:[#allocation9 + $0x6c] ss:$16 sps:$4 sm:$0xff]  }
 0xdc5   :  { %3193 = vmatprep.subr.bf16.mxu0 %v6515_v48  ;;  %3234 = vmatprep.subr.bf16.mxu1 %v6518_v7  ;;  %7559 = vst [vmem:[#allocation82_spill] sm:$0xff] %v6527_v27  ;;  %7560 = vst [vmem:[#allocation83_spill] sm:$0xff] %v6530_v32  ;;  %v6533_v48 = vld [vmem:[#allocation9 + $0x60] ss:$16 sps:$4 sm:$0xff]   ;;  %v6536_v7 = vld [vmem:[#allocation9 + $0x68] ss:$16 sps:$4 sm:$0xff]  }
 0xdc6   :  { %7561 = vst [vmem:[#allocation84_spill] sm:$0xff] %v6533_v48  ;;  %7562 = vst [vmem:[#allocation85_spill] sm:$0xff] %v6536_v7 }
 0xdc8   :  { %3194 = vmatpush1.bf16.msra.mxu0 %v6521_v36  ;;  %3235 = vmatpush1.bf16.msra.mxu1 %v6524_v60  ;;  %v6539_v36 = vld [vmem:[#allocation9 + $0x84] ss:$16 sps:$4 sm:$0xff]   ;;  %v6542_v60 = vld [vmem:[#allocation9 + $0x8c] ss:$16 sps:$4 sm:$0xff]  }
 0xdc9   :  { %3195 = vmatprep.subr.bf16.mxu0 %v6527_v27  ;;  %3236 = vmatprep.subr.bf16.mxu1 %v6530_v32  ;;  %7563 = vst [vmem:[#allocation22_spill] sm:$0xff] %v6539_v36  ;;  %7564 = vst [vmem:[#allocation23_spill] sm:$0xff] %v6542_v60  ;;  %v6545_v27 = vld [vmem:[#allocation9 + $0x80] ss:$16 sps:$4 sm:$0xff]   ;;  %v6548_v32 = vld [vmem:[#allocation9 + $0x88] ss:$16 sps:$4 sm:$0xff]  }
 0xdca   :  { %7565 = vst [vmem:[#allocation24_spill] sm:$0xff] %v6545_v27  ;;  %7566 = vst [vmem:[#allocation90_spill] sm:$0xff] %v6548_v32 }
 0xdcc   :  { %3196 = vmatpush1.bf16.msra.mxu0 %v6533_v48  ;;  %3237 = vmatpush1.bf16.msra.mxu1 %v6536_v7  ;;  %v6551_v48 = vld [vmem:[#allocation9 + $0xa4] ss:$16 sps:$4 sm:$0xff]   ;;  %v6554_v7 = vld [vmem:[#allocation9 + $0xac] ss:$16 sps:$4 sm:$0xff]  }
 0xdcd   :  { %3197 = vmatprep.subr.bf16.mxu0 %v6539_v36  ;;  %3238 = vmatprep.subr.bf16.mxu1 %v6542_v60  ;;  %7567 = vst [vmem:[#allocation91_spill] sm:$0xff] %v6551_v48  ;;  %7568 = vst [vmem:[#allocation92_spill] sm:$0xff] %v6554_v7  ;;  %v6557_v36 = vld [vmem:[#allocation9 + $0xa0] ss:$16 sps:$4 sm:$0xff]   ;;  %v6560_v60 = vld [vmem:[#allocation9 + $0xa8] ss:$16 sps:$4 sm:$0xff]  }
 0xdce   :  { %7569 = vst [vmem:[#allocation93_spill] sm:$0xff] %v6557_v36  ;;  %7570 = vst [vmem:[#allocation25_spill] sm:$0xff] %v6560_v60 }
 0xdd0   :  { %3198 = vmatpush1.bf16.msra.mxu0 %v6545_v27  ;;  %3239 = vmatpush1.bf16.msra.mxu1 %v6548_v32  ;;  %v6563_v27 = vld [vmem:[#allocation9 + $0xc4] ss:$16 sps:$4 sm:$0xff]   ;;  %v6566_v32 = vld [vmem:[#allocation9 + $0xcc] ss:$16 sps:$4 sm:$0xff]  }
 0xdd1   :  { %3199 = vmatprep.subr.bf16.mxu0 %v6551_v48  ;;  %3240 = vmatprep.subr.bf16.mxu1 %v6554_v7  ;;  %7571 = vst [vmem:[#allocation26_spill] sm:$0xff] %v6563_v27  ;;  %7572 = vst [vmem:[#allocation27_spill] sm:$0xff] %v6566_v32  ;;  %v6569_v48 = vld [vmem:[#allocation9 + $0xc0] ss:$16 sps:$4 sm:$0xff]   ;;  %v6572_v7 = vld [vmem:[#allocation9 + $0xc8] ss:$16 sps:$4 sm:$0xff]  }
 0xdd2   :  { %7573 = vst [vmem:[#allocation28_spill] sm:$0xff] %v6569_v48  ;;  %7574 = vst [vmem:[#allocation29_spill] sm:$0xff] %v6572_v7 }
 0xdd4   :  { %3200 = vmatpush1.bf16.msra.mxu0 %v6557_v36  ;;  %3241 = vmatpush1.bf16.msra.mxu1 %v6560_v60  ;;  %v6575_v36 = vld [vmem:[#allocation9 + $0xe4] ss:$16 sps:$4 sm:$0xff]   ;;  %v6578_v60 = vld [vmem:[#allocation9 + $0xec] ss:$16 sps:$4 sm:$0xff]  }
 0xdd5   :  { %3201 = vmatprep.subr.bf16.mxu0 %v6563_v27  ;;  %3242 = vmatprep.subr.bf16.mxu1 %v6566_v32  ;;  %7575 = vst [vmem:[#allocation30_spill] sm:$0xff] %v6575_v36  ;;  %7576 = vst [vmem:[#allocation31_spill] sm:$0xff] %v6578_v60  ;;  %v6581_v27 = vld [vmem:[#allocation9 + $0xe0] ss:$16 sps:$4 sm:$0xff]   ;;  %v6584_v32 = vld [vmem:[#allocation9 + $0xe8] ss:$16 sps:$4 sm:$0xff]  }
 0xdd6   :  { %7577 = vst [vmem:[#allocation32_spill] sm:$0xff] %v6581_v27  ;;  %7578 = vst [vmem:[#allocation94_spill] sm:$0xff] %v6584_v32 }
 0xdd8   :  { %3202 = vmatpush1.bf16.msra.mxu0 %v6569_v48  ;;  %3243 = vmatpush1.bf16.msra.mxu1 %v6572_v7 }
 0xdd9   :  { %3203 = vmatprep.subr.bf16.mxu0 %v6575_v36  ;;  %3244 = vmatprep.subr.bf16.mxu1 %v6578_v60 }
 0xddc   :  { %3204 = vmatpush1.bf16.msra.mxu0 %v6581_v27  ;;  %3245 = vmatpush1.bf16.msra.mxu1 %v6584_v32 }
 0xddd   :  { %3300 = vmatprep.subr.bf16.mxu0 %v7499_v8  ;;  %3341 = vmatprep.subr.bf16.mxu1 %v7500_v26 }
 0xe92   :  { %v3112_v7 = vpop.f32.mrb[68].mxu0  ;;  %v3153_v48 = vpop.f32.mrb[68].mxu1 }
 0xe93   :  { %v3160_v36 = vadd.f32 %v3112_v7, %v7579_v50  ;;  %v3162_v49 = vadd.f32 %v3153_v48, %v7580_v62  ;;  %v3114_v57 = vpop.f32.mrb[69].mxu0  ;;  %v3155_v60 = vpop.f32.mrb[69].mxu1 }
 0xe94   :  { %v3161_v52 = vadd.f32 %v3114_v57, %v7581_v55  ;;  %v3163_v27 = vadd.f32 %v3155_v60, %v7582_v14  ;;  %v3116_v35 = vpop.f32.mrb[70].mxu0  ;;  %v3157_v18 = vpop.f32.mrb[70].mxu1 }
 0xe95   :  { %v3907_v23 = vmul.f32 -1.442695, %v3160_v36  ;;  %v3117_v32 = vpop.f32.mrb[71].mxu0  ;;  %v3158_v21 = vpop.f32.mrb[71].mxu1 }
 0xe96   :  { %v3908_v8 = vmul.f32 -1.442695, %v3161_v52  ;;  %v3909_v26 = vmul.f32 -1.442695, %v3163_v27 }
 0xe97   :  { %4463 = vpow2.f32 %v3907_v23 }
 0xe98   :  { %4465 = vpow2.f32 %v3908_v8 }
 0xe99   :  { %4467 = vpow2.f32 %v3909_v26 }
 0xe9a   :  { %4469 = vtanh.f32 %v3162_v49 }
 0xea1   :  { %v4464_v38 = vpop.eup %4463 }
 0xea2   :  { %v4466_v13 = vpop.eup %4465  ;;  %v3167_v50 = vadd.f32 1.0, %v4464_v38 }
 0xea3   :  { %v3173_v62 = vadd.f32 1.0, %v4466_v13  ;;  %v4468_v55 = vpop.eup %4467  ;;  %v7586_v13 = vld [vmem:[#allocation46_spill] sm:$0xff] }
 0xea4   :  { %4471 = vrcp.f32 %v3167_v50  ;;  %v4470_v57 = vpop.eup %4469  ;;  %v3180_v60 = vadd.f32 1.0, %v4468_v55 }
 0xea5   :  { %4473 = vrcp.f32 %v3173_v62 }
 0xea6   :  { %4475 = vrcp.f32 %v3180_v60 }
 0xeae   :  { %v4472_v14 = vpop.eup %4471 }
 0xeaf   :  { %v4474_v35 = vpop.eup %4473  ;;  %v3184_v18 = vmul.f32 %v4472_v14, %v4470_v57 }
 0xeb0   :  { %v3183_v21 = vmul.f32 %v4474_v35, %v6386_v22  ;;  %v4476_v23 = vpop.eup %4475  ;;  %v7587_v22 = vld [vmem:[#allocation47_spill] sm:$0xff] }
 0xeb2   :  { %v6594_v52 = vadd.f32 %v3184_v18, %v3183_v21 }
 0xeb4   :  { %4477 = vtanh.f32 %v6594_v52 }
 0xebe   :  { %v4478_v38 = vpop.eup %4477 }
 0xebf   :  { %v3187_v32 = vmul.f32 %v4478_v38, %v4476_v23 }
 0xec1   :  { %v6597_v49 = vpack.c.bf16 %v3187_v32, %v3187_v32 }
 0xec3   :  { %3222 = vmatmul.mubr.bf16.vlgmr.msra.gmra.mrb[64].mxu0 %v6597_v49  ;;  %3263 = vmatmul.mubr.bf16.vlgmr.msra.gmra.mrb[64].mxu1 %v6597_v49 }
 0xec4   :  { %3301 = vmatpush1.bf16.msra.mxu0 %v6165_v37  ;;  %3342 = vmatpush1.bf16.msra.mxu1 %v6168_v16  ;;  %v7583_v37 = vld [vmem:[#allocation43_spill] sm:$0xff]  ;;  %v7584_v16 = vld [vmem:[#allocation44_spill] sm:$0xff] }
 0xec5   :  { %3302 = vmatprep.subr.bf16.mxu0 %v6171_v1  ;;  %3343 = vmatprep.subr.bf16.mxu1 %v7505_v0  ;;  %v7585_v1 = vld [vmem:[#allocation45_spill] sm:$0xff]  ;;  %v7588_v0 = vld [vmem:[#allocation48_spill] sm:$0xff] }
 0xec6   :  { %3332 = vmatprep.mubr.bf16.mxu0 %v7143_v31  ;;  %3373 = vmatprep.mubr.bf16.mxu1 %v7143_v31 }
 0xec8   :  { %3303 = vmatpush1.bf16.msra.mxu0 %v7506_v53  ;;  %3344 = vmatpush1.bf16.msra.mxu1 %v7507_v9  ;;  %v7589_v53 = vld [vmem:[#allocation49_spill] sm:$0xff]  ;;  %v7590_v9 = vld [vmem:[#allocation50_spill] sm:$0xff] }
 0xec9   :  { %3304 = vmatprep.subr.bf16.mxu0 %v7508_v20  ;;  %3345 = vmatprep.subr.bf16.mxu1 %v7509_v15  ;;  %v7591_v20 = vld [vmem:[#allocation53_spill] sm:$0xff]  ;;  %v7592_v15 = vld [vmem:[#allocation54_spill] sm:$0xff] }
 0xecc   :  { %3305 = vmatpush1.bf16.msra.mxu0 %v7510_v17  ;;  %3346 = vmatpush1.bf16.msra.mxu1 %v7511_v28  ;;  %v7593_v17 = vld [vmem:[#allocation55_spill] sm:$0xff]  ;;  %v7594_v28 = vld [vmem:[#allocation56_spill] sm:$0xff] }
 0xecd   :  { %3306 = vmatprep.subr.bf16.mxu0 %v7512_v2  ;;  %3347 = vmatprep.subr.bf16.mxu1 %v7513_v10  ;;  %v7595_v2 = vld [vmem:[#allocation57_spill] sm:$0xff] }
 0xed0   :  { %3307 = vmatpush1.bf16.msra.mxu0 %v7514_v58  ;;  %3348 = vmatpush1.bf16.msra.mxu1 %v7515_v41  ;;  %v7596_v41 = vld [vmem:[#allocation106_spill] sm:$0xff] }
 0xed1   :  { %3308 = vmatprep.subr.bf16.mxu0 %v7516_v42  ;;  %3349 = vmatprep.subr.bf16.mxu1 %v7517_v43 }
 0xed4   :  { %3309 = vmatpush1.bf16.msra.mxu0 %v7518_v61  ;;  %3350 = vmatpush1.bf16.msra.mxu1 %v7519_v45 }
 0xed5   :  { %3310 = vmatprep.subr.bf16.mxu0 %v7520_v46  ;;  %3351 = vmatprep.subr.bf16.mxu1 %v7583_v37 }
 0xed8   :  { %3311 = vmatpush1.bf16.msra.mxu0 %v7584_v16  ;;  %3352 = vmatpush1.bf16.msra.mxu1 %v7585_v1 }
 0xed9   :  { %3312 = vmatprep.subr.bf16.mxu0 %v7586_v13  ;;  %3353 = vmatprep.subr.bf16.mxu1 %v7587_v22 }
 0xedc   :  { %3313 = vmatpush1.bf16.msra.mxu0 %v7588_v0  ;;  %3354 = vmatpush1.bf16.msra.mxu1 %v7589_v53  ;;  %v7616_v53 = vld [vmem:[#allocation75_spill] sm:$0xff] }
 0xedd   :  { %3314 = vmatprep.subr.bf16.mxu0 %v7590_v9  ;;  %3355 = vmatprep.subr.bf16.mxu1 %v7591_v20  ;;  %v7617_v9 = vld [vmem:[#allocation76_spill] sm:$0xff]  ;;  %v7618_v20 = vld [vmem:[#allocation77_spill] sm:$0xff] }
 0xee0   :  { %3315 = vmatpush1.bf16.msra.mxu0 %v7592_v15  ;;  %3356 = vmatpush1.bf16.msra.mxu1 %v7593_v17  ;;  %v7620_v15 = vld [vmem:[#allocation21_spill] sm:$0xff]  ;;  %v7621_v17 = vld [vmem:[#allocation82_spill] sm:$0xff] }
 0xee1   :  { %3387 = vmatprep.subr.bf16.mxu0 %v7594_v28  ;;  %3428 = vmatprep.subr.bf16.mxu1 %v7595_v2  ;;  %v7622_v28 = vld [vmem:[#allocation83_spill] sm:$0xff]  ;;  %v7623_v2 = vld [vmem:[#allocation84_spill] sm:$0xff] }
 0xf96   :  { %v3223_v10 = vpop.f32.mrb[64].mxu0  ;;  %v3264_v58 = vpop.f32.mrb[64].mxu1 }
 0xf97   :  { %v3981_v42 = vadd.f32 %v3223_v10, %v7596_v41  ;;  %v3225_v43 = vpop.f32.mrb[65].mxu0  ;;  %v3266_v61 = vpop.f32.mrb[65].mxu1  ;;  %v3983_v62 = vadd.f32 %v3264_v58, %v5509_v59  ;;  %v7624_v10 = vld [vmem:[#allocation85_spill] sm:$0xff]  ;;  %v7626_v58 = vld [vmem:[#allocation23_spill] sm:$0xff] }
 0xf98   :  { %v3982_v45 = vadd.f32 %v3225_v43, %v5498_v40  ;;  %v3227_v46 = vpop.f32.mrb[66].mxu0  ;;  %v3268_v48 = vpop.f32.mrb[66].mxu1  ;;  %v3984_v26 = vadd.f32 %v3266_v61, %v5504_v56  ;;  %v7628_v43 = vld [vmem:[#allocation90_spill] sm:$0xff]  ;;  %v7629_v61 = vld [vmem:[#allocation91_spill] sm:$0xff] }
 0xf99   :  { %v3910_v7 = vmul.f32 -1.442695, %v3981_v42  ;;  %v3228_v36 = vpop.f32.mrb[67].mxu0  ;;  %v3269_v27 = vpop.f32.mrb[67].mxu1  ;;  %v7627_v42 = vld [vmem:[#allocation24_spill] sm:$0xff]  ;;  %v7631_v46 = vld [vmem:[#allocation93_spill] sm:$0xff] }
 0xf9a   :  { %v3911_v8 = vmul.f32 -1.442695, %v3982_v45  ;;  %v3912_v50 = vmul.f32 -1.442695, %v3984_v26  ;;  %v7630_v45 = vld [vmem:[#allocation92_spill] sm:$0xff]  ;;  %v7632_v48 = vld [vmem:[#allocation25_spill] sm:$0xff] }
 0xf9b   :  { %4479 = vpow2.f32 %v3910_v7  ;;  %v7633_v7 = vld [vmem:[#allocation26_spill] sm:$0xff]  ;;  %v7634_v36 = vld [vmem:[#allocation27_spill] sm:$0xff]  ;;  %v7635_v27 = vld [vmem:[#allocation28_spill] sm:$0xff] }
 0xf9c   :  { %4481 = vpow2.f32 %v3911_v8  ;;  %v7636_v8 = vld [vmem:[#allocation29_spill] sm:$0xff]  ;;  %v7637_v26 = vld [vmem:[#allocation30_spill] sm:$0xff] }
 0xf9d   :  { %4483 = vpow2.f32 %v3912_v50  ;;  %v7638_v50 = vld [vmem:[#allocation31_spill] sm:$0xff] }
 0xf9e   :  { %4485 = vtanh.f32 %v3983_v62  ;;  %v7639_v62 = vld [vmem:[#allocation32_spill] sm:$0xff] }
 0xfa5   :  { %v4480_v55 = vpop.eup %4479 }
 0xfa6   :  { %v4482_v57 = vpop.eup %4481  ;;  %v3278_v14 = vadd.f32 1.0, %v4480_v55  ;;  %v7640_v55 = vld [vmem:[#allocation94_spill] sm:$0xff] }
 0xfa7   :  { %v3284_v35 = vadd.f32 1.0, %v4482_v57  ;;  %v4484_v18 = vpop.eup %4483 }
 0xfa8   :  { %4487 = vrcp.f32 %v3278_v14  ;;  %v4486_v60 = vpop.eup %4485  ;;  %v3291_v32 = vadd.f32 1.0, %v4484_v18 }
 0xfa9   :  { %4489 = vrcp.f32 %v3284_v35  ;;  %v7641_v35 = vld [vmem:[#allocation102_spill] sm:$0xff] }
 0xfaa   :  { %4491 = vrcp.f32 %v3291_v32  ;;  %v7643_v32 = vld [vmem:[#allocation104_spill] sm:$0xff] }
 0xfb2   :  { %v4488_v21 = vpop.eup %4487 }
 0xfb3   :  { %v4490_v23 = vpop.eup %4489  ;;  %v3295_v38 = vmul.f32 %v4488_v21, %v4486_v60  ;;  %v7642_v60 = vld [vmem:[#allocation103_spill] sm:$0xff] }
 0xfb4   :  { %v3294_v37 = vmul.f32 %v4490_v23, %v6432_v54  ;;  %v4492_v1 = vpop.eup %4491  ;;  %v7613_v54 = vld [vmem:[#allocation72_spill] sm:$0xff] }
 0xfb6   :  { %v6640_v16 = vadd.f32 %v3295_v38, %v3294_v37 }
 0xfb8   :  { %4493 = vtanh.f32 %v6640_v16 }
 0xfc2   :  { %v4494_v13 = vpop.eup %4493 }
 0xfc3   :  { %v3298_v22 = vmul.f32 %v4494_v13, %v4492_v1  ;;  %v7644_v1 = vld [vmem:[#allocation105_spill] sm:$0xff] }
 0xfc5   :  { %v3299_v0 = vpack.c.bf16 %v3298_v22, %v3298_v22 }
 0xfc7   :  { %3333 = vmatmul.mubr.bf16.vlgmr.msra.gmra.mrb[72].mxu0 %v3299_v0  ;;  %3374 = vmatmul.mubr.bf16.vlgmr.msra.gmra.mrb[72].mxu1 %v3299_v0 }
 0xfc8   :  { %3388 = vmatpush1.bf16.msra.mxu0 %v6271_v51  ;;  %3429 = vmatpush1.bf16.msra.mxu1 %v6274_v25  ;;  %v7597_v51 = vld [vmem:[#allocation60_spill] sm:$0xff]  ;;  %v7598_v25 = vld [vmem:[#allocation61_spill] sm:$0xff] }
 0xfc9   :  { %3389 = vmatprep.subr.bf16.mxu0 %v6277_v11  ;;  %3430 = vmatprep.subr.bf16.mxu1 %v6280_v63  ;;  %v7599_v11 = vld [vmem:[#allocation62_spill] sm:$0xff]  ;;  %v7600_v63 = vld [vmem:[#allocation63_spill] sm:$0xff] }
 0xfca   :  { %3419 = vmatprep.mubr.bf16.mxu0 %v7143_v31  ;;  %3460 = vmatprep.mubr.bf16.mxu1 %v7143_v31 }
 0xfcc   :  { %3390 = vmatpush1.bf16.msra.mxu0 %v6285_v39  ;;  %3431 = vmatpush1.bf16.msra.mxu1 %v6288_v4  ;;  %v7601_v39 = vld [vmem:[#allocation64_spill] sm:$0xff]  ;;  %v7602_v4 = vld [vmem:[#allocation65_spill] sm:$0xff] }
 0xfcd   :  { %3391 = vmatprep.subr.bf16.mxu0 %v6291_v5  ;;  %3432 = vmatprep.subr.bf16.mxu1 %v6294_v6  ;;  %v7603_v5 = vld [vmem:[#allocation66_spill] sm:$0xff]  ;;  %v7604_v6 = vld [vmem:[#allocation67_spill] sm:$0xff] }
 0xfd0   :  { %3392 = vmatpush1.bf16.msra.mxu0 %v6297_v34  ;;  %3433 = vmatpush1.bf16.msra.mxu1 %v6300_v44  ;;  %v7605_v34 = vld [vmem:[#allocation68_spill] sm:$0xff]  ;;  %v7606_v44 = vld [vmem:[#allocation69_spill] sm:$0xff] }
 0xfd1   :  { %3393 = vmatprep.subr.bf16.mxu0 %v6303_v29  ;;  %3434 = vmatprep.subr.bf16.mxu1 %v6306_v12  ;;  %v7607_v29 = vld [vmem:[#allocation70_spill] sm:$0xff]  ;;  %v7608_v12 = vld [vmem:[#allocation71_spill] sm:$0xff] }
 0xfd4   :  { %3394 = vmatpush1.bf16.msra.mxu0 %v7535_v33  ;;  %3435 = vmatpush1.bf16.msra.mxu1 %v7536_v47  ;;  %v7614_v33 = vld [vmem:[#allocation73_spill] sm:$0xff]  ;;  %v7615_v47 = vld [vmem:[#allocation74_spill] sm:$0xff] }
 0xfd5   :  { %3395 = vmatprep.subr.bf16.mxu0 %v6315_v19  ;;  %3436 = vmatprep.subr.bf16.mxu1 %v6318_v30  ;;  %v7609_v19 = vld [vmem:[#allocation78_spill] sm:$0xff]  ;;  %v7610_v30 = vld [vmem:[#allocation79_spill] sm:$0xff] }
 0xfd8   :  { %3396 = vmatpush1.bf16.msra.mxu0 %v6321_v24  ;;  %3437 = vmatpush1.bf16.msra.mxu1 %v6324_v3  ;;  %v7611_v24 = vld [vmem:[#allocation80_spill] sm:$0xff]  ;;  %v7612_v3 = vld [vmem:[#allocation81_spill] sm:$0xff] }
 0xfd9   :  { %3397 = vmatprep.subr.bf16.mxu0 %v7597_v51  ;;  %3438 = vmatprep.subr.bf16.mxu1 %v7598_v25 }
 0xfdc   :  { %3398 = vmatpush1.bf16.msra.mxu0 %v7599_v11  ;;  %3439 = vmatpush1.bf16.msra.mxu1 %v7600_v63 }
 0xfdd   :  { %3399 = vmatprep.subr.bf16.mxu0 %v7601_v39  ;;  %3440 = vmatprep.subr.bf16.mxu1 %v7602_v4 }
 0xfe0   :  { %3400 = vmatpush1.bf16.msra.mxu0 %v7603_v5  ;;  %3441 = vmatpush1.bf16.msra.mxu1 %v7604_v6 }
 0xfe1   :  { %3401 = vmatprep.subr.bf16.mxu0 %v7605_v34  ;;  %3442 = vmatprep.subr.bf16.mxu1 %v7606_v44 }
 0xfe4   :  { %3402 = vmatpush1.bf16.msra.mxu0 %v7607_v29  ;;  %3443 = vmatpush1.bf16.msra.mxu1 %v7608_v12 }
 0xfe5   :  { %3498 = vmatprep.subr.bf16.mxu0 %v7609_v19  ;;  %3539 = vmatprep.subr.bf16.mxu1 %v7610_v30 }
 0xfe7   :  { %3420 = vmatmul.mubr.bf16.vlgmr.msra.gmra.mrb[76].mxu0 %v6597_v49  ;;  %3461 = vmatmul.mubr.bf16.vlgmr.msra.gmra.mrb[76].mxu1 %v6597_v49  ;;  %v7619_v49 = vld [vmem:[#allocation20_spill] sm:$0xff] }
 0xfe8   :  { %3499 = vmatpush1.bf16.msra.mxu0 %v7611_v24  ;;  %3540 = vmatpush1.bf16.msra.mxu1 %v7612_v3 }
 0xfe9   :  { %3500 = vmatprep.subr.bf16.mxu0 %v7613_v54  ;;  %3541 = vmatprep.subr.bf16.mxu1 %v7614_v33 }
 0xfea   :  { %3530 = vmatprep.mubr.bf16.mxu0 %v7143_v31  ;;  %3571 = vmatprep.mubr.bf16.mxu1 %v7143_v31  ;;  %v7625_v31 = vld [vmem:[#allocation22_spill] sm:$0xff] }
 0xfec   :  { %3501 = vmatpush1.bf16.msra.mxu0 %v7615_v47  ;;  %3542 = vmatpush1.bf16.msra.mxu1 %v7616_v53 }
 0xfed   :  { %3502 = vmatprep.subr.bf16.mxu0 %v7617_v9  ;;  %3543 = vmatprep.subr.bf16.mxu1 %v7618_v20  ;;  %v4263_v20 = vld [vmem:[#allocation12] sm:$0xff]  }
 0xff0   :  { %3503 = vmatpush1.bf16.msra.mxu0 %v7619_v49  ;;  %3544 = vmatpush1.bf16.msra.mxu1 %v7620_v15  ;;  %v4894_v49 = vmov 0.0   ;;  %v4264_v15 = vld [vmem:[#allocation12 + $0x8] sm:$0xff]  }
 0xff1   :  { %3504 = vmatprep.subr.bf16.mxu0 %v7621_v17  ;;  %3545 = vmatprep.subr.bf16.mxu1 %v7622_v28  ;;  %v4265_v17 = vld [vmem:[#allocation12 + $0x10] sm:$0xff]   ;;  %v4267_v28 = vld [vmem:[#allocation12 + $0x20] sm:$0xff]  }
 0xff4   :  { %3505 = vmatpush1.bf16.msra.mxu0 %v7623_v2  ;;  %3546 = vmatpush1.bf16.msra.mxu1 %v7624_v10  ;;  %v4268_v2 = vld [vmem:[#allocation12 + $0x28] sm:$0xff]   ;;  %v4269_v10 = vld [vmem:[#allocation12 + $0x30] sm:$0xff]  }
 0xff5   :  { %3506 = vmatprep.subr.bf16.mxu0 %v7625_v31  ;;  %3547 = vmatprep.subr.bf16.mxu1 %v7626_v58  ;;  %v4270_v31 = vld [vmem:[#allocation12 + $0x38] sm:$0xff]  }
 0xff8   :  { %3507 = vmatpush1.bf16.msra.mxu0 %v7627_v42  ;;  %3548 = vmatpush1.bf16.msra.mxu1 %v7628_v43 }
 0xff9   :  { %3508 = vmatprep.subr.bf16.mxu0 %v7629_v61  ;;  %3549 = vmatprep.subr.bf16.mxu1 %v7630_v45 }
 0xffc   :  { %3509 = vmatpush1.bf16.msra.mxu0 %v7631_v46  ;;  %3550 = vmatpush1.bf16.msra.mxu1 %v7632_v48 }
 0xffd   :  { %3510 = vmatprep.subr.bf16.mxu0 %v7633_v7  ;;  %3551 = vmatprep.subr.bf16.mxu1 %v7634_v36 }
0x1000   :  { %3511 = vmatpush1.bf16.msra.mxu0 %v7635_v27  ;;  %3552 = vmatpush1.bf16.msra.mxu1 %v7636_v8 }
0x1001   :  { %3512 = vmatprep.subr.bf16.mxu0 %v7637_v26  ;;  %3553 = vmatprep.subr.bf16.mxu1 %v7638_v50 }
0x1004   :  { %3513 = vmatpush1.bf16.msra.mxu0 %v7639_v62  ;;  %3554 = vmatpush1.bf16.msra.mxu1 %v7640_v55 }
0x1005   :  { %3937 = vmatprep.subr.bf16.mxu0 %v4894_v49 }
0x10ba   :  { %v3421_v57 = vpop.f32.mrb[76].mxu0  ;;  %v3462_v14 = vpop.f32.mrb[76].mxu1 }
0x10bb   :  { %v3469_v18 = vadd.f32 %v3421_v57, %v7641_v35  ;;  %v3471_v21 = vadd.f32 %v3462_v14, %v7642_v60  ;;  %v3423_v23 = vpop.f32.mrb[77].mxu0  ;;  %v3464_v38 = vpop.f32.mrb[77].mxu1 }
0x10bc   :  { %v3470_v37 = vadd.f32 %v3423_v23, %v7643_v32  ;;  %v3472_v13 = vadd.f32 %v3464_v38, %v7644_v1  ;;  %v3425_v22 = vpop.f32.mrb[78].mxu0  ;;  %v3466_v0 = vpop.f32.mrb[78].mxu1 }
0x10bd   :  { %v3913_v51 = vmul.f32 -1.442695, %v3469_v18  ;;  %v3426_v25 = vpop.f32.mrb[79].mxu0  ;;  %v3467_v11 = vpop.f32.mrb[79].mxu1  ;;  %v3919_v22 = vld [vmem:[%s6744_s8] ss:$0 sm:$0xff] }
0x10be   :  { %v3914_v63 = vmul.f32 -1.442695, %v3470_v37  ;;  %v3915_v39 = vmul.f32 -1.442695, %v3472_v13 }
0x10bf   :  { %4495 = vpow2.f32 %v3913_v51 }
0x10c0   :  { %4497 = vpow2.f32 %v3914_v63 }
0x10c1   :  { %4499 = vpow2.f32 %v3915_v39 }
0x10c2   :  { %4501 = vtanh.f32 %v3471_v21 }
0x10c9   :  { %v4496_v4 = vpop.eup %4495 }
0x10ca   :  { %v4498_v5 = vpop.eup %4497  ;;  %v3476_v6 = vadd.f32 1.0, %v4496_v4 }
0x10cb   :  { %v3482_v34 = vadd.f32 1.0, %v4498_v5  ;;  %v4500_v44 = vpop.eup %4499 }
0x10cc   :  { %4503 = vrcp.f32 %v3476_v6  ;;  %v4502_v29 = vpop.eup %4501  ;;  %v3489_v24 = vadd.f32 1.0, %v4500_v44 }
0x10cd   :  { %4505 = vrcp.f32 %v3482_v34 }
0x10ce   :  { %4507 = vrcp.f32 %v3489_v24 }
0x10d6   :  { %v4504_v12 = vpop.eup %4503 }
0x10d7   :  { %v4506_v19 = vpop.eup %4505  ;;  %v3493_v30 = vmul.f32 %v4504_v12, %v4502_v29 }
0x10d8   :  { %v3492_v3 = vmul.f32 %v4506_v19, %v6594_v52  ;;  %v4508_v33 = vpop.eup %4507  ;;  %v4266_v52 = vld [vmem:[#allocation12 + $0x18] sm:$0xff]  }
0x10da   :  { %v3494_v54 = vadd.f32 %v3493_v30, %v3492_v3 }
0x10dc   :  { %4509 = vtanh.f32 %v3494_v54 }
0x10e6   :  { %v4510_v47 = vpop.eup %4509 }
0x10e7   :  { %v3496_v53 = vmul.f32 %v4510_v47, %v4508_v33 }
0x10e9   :  { %v3497_v9 = vpack.c.bf16 %v3496_v53, %v3496_v53 }
0x10eb   :  { %3531 = vmatmul.mubr.bf16.vlgmr.msra.gmra.mrb[72].mxu0 %v3497_v9  ;;  %3572 = vmatmul.mubr.bf16.vlgmr.msra.gmra.mrb[72].mxu1 %v3497_v9 }
0x10ec   :  { %3938 = vmatpush3.bf16.msra.mxu0 %v4263_v20  ;;  %3953 = vmatprep.mubr.msk.bf16.mxu0 %vm4895_vm0, %v4894_v49 }
0x10ed   :  { %3939 = vmatprep.subr.bf16.mxu0 %v4894_v49 }
0x10f0   :  { %3940 = vmatpush3.bf16.msra.mxu0 %v4264_v15 }
0x10f1   :  { %3941 = vmatprep.subr.bf16.mxu0 %v4894_v49 }
0x10f4   :  { %3942 = vmatpush3.bf16.msra.mxu0 %v4265_v17 }
0x10f5   :  { %3943 = vmatprep.subr.bf16.mxu0 %v4894_v49 }
0x10f8   :  { %3944 = vmatpush3.bf16.msra.mxu0 %v4266_v52 }
0x10f9   :  { %3945 = vmatprep.subr.bf16.mxu0 %v4894_v49 }
0x10fc   :  { %3946 = vmatpush3.bf16.msra.mxu0 %v4267_v28 }
0x10fd   :  { %3947 = vmatprep.subr.bf16.mxu0 %v4894_v49 }
0x1100   :  { %3948 = vmatpush3.bf16.msra.mxu0 %v4268_v2 }
0x1101   :  { %3949 = vmatprep.subr.bf16.mxu0 %v4894_v49 }
0x1104   :  { %3950 = vmatpush3.bf16.msra.mxu0 %v4269_v10 }
0x1105   :  { %3951 = vmatprep.subr.bf16.mxu0 %v4894_v49 }
0x1108   :  { %3952 = vmatpush3.bf16.msra.mxu0 %v4270_v31 }
0x11be   :  { %v3532_v58 = vpop.f32.mrb[72].mxu0  ;;  %v3573_v42 = vpop.f32.mrb[72].mxu1 }
0x11bf   :  { %v3985_v43 = vadd.f32 %v3532_v58, %v7596_v41  ;;  %v3534_v61 = vpop.f32.mrb[73].mxu0  ;;  %v3575_v45 = vpop.f32.mrb[73].mxu1  ;;  %v3987_v55 = vadd.f32 %v3573_v42, %v5509_v59 }
0x11c0   :  { %v3986_v46 = vadd.f32 %v3534_v61, %v5498_v40  ;;  %v3536_v48 = vpop.f32.mrb[74].mxu0  ;;  %v3577_v7 = vpop.f32.mrb[74].mxu1  ;;  %v3988_v50 = vadd.f32 %v3575_v45, %v5504_v56 }
0x11c1   :  { %v3916_v36 = vmul.f32 -1.442695, %v3985_v43  ;;  %v3537_v27 = vpop.f32.mrb[75].mxu0  ;;  %v3578_v8 = vpop.f32.mrb[75].mxu1 }
0x11c2   :  { %v3917_v26 = vmul.f32 -1.442695, %v3986_v46  ;;  %v3918_v62 = vmul.f32 -1.442695, %v3988_v50 }
0x11c3   :  { %4511 = vpow2.f32 %v3916_v36 }
0x11c4   :  { %4513 = vpow2.f32 %v3917_v26 }
0x11c5   :  { %4515 = vpow2.f32 %v3918_v62 }
0x11c6   :  { %4517 = vtanh.f32 %v3987_v55 }
0x11cd   :  { %v4512_v57 = vpop.eup %4511 }
0x11ce   :  { %v4514_v14 = vpop.eup %4513  ;;  %v3587_v41 = vadd.f32 1.0, %v4512_v57 }
0x11cf   :  { %v3593_v35 = vadd.f32 1.0, %v4514_v14  ;;  %v4516_v40 = vpop.eup %4515 }
0x11d0   :  { %4519 = vrcp.f32 %v3587_v41  ;;  %v4518_v18 = vpop.eup %4517  ;;  %v3600_v38 = vadd.f32 1.0, %v4516_v40 }
0x11d1   :  { %4521 = vrcp.f32 %v3593_v35 }
0x11d2   :  { %4523 = vrcp.f32 %v3600_v38 }
0x11da   :  { %v4520_v60 = vpop.eup %4519 }
0x11db   :  { %v4522_v21 = vpop.eup %4521  ;;  %v3604_v23 = vmul.f32 %v4520_v60, %v4518_v18 }
0x11dc   :  { %v3603_v32 = vmul.f32 %v4522_v21, %v6640_v16  ;;  %v4524_v59 = vpop.eup %4523 }
0x11de   :  { %v3605_v56 = vadd.f32 %v3604_v23, %v3603_v32 }
0x11e0   :  { %4525 = vtanh.f32 %v3605_v56 }
0x11ea   :  { %v4526_v37 = vpop.eup %4525 }
0x11eb   :  { %v3607_v1 = vmul.f32 %v4526_v37, %v4524_v59 }
0x11ed   :  { %v3608_v13 = vpack.c.bf16 %v3607_v1, %v3607_v1 }
0x11ef   :  { %3954 = vmatmul.mubr.bf16.vlgmr.msra.gmra.mrb[80].mxu0 %v3608_v13 }
0x12c2   :  { %v3714_v0 = vpop.f32.mrb[80].mxu0 }
0x12c3   :  { %v3715_v51 = vadd.f32 %v3919_v22, %v3714_v0  ;;  %v3955_v25 = vpop.f32.mrb[81].mxu0 }
0x12c4   :  { %v3717_v11 = vpop.f32.mrb[82].mxu0 }
0x12c5   :  { %3720 = vst [vmem:[#allocation14] sm:$0xff] %v3715_v51  ;;  %v3956_v16 = vpop.f32.mrb[83].mxu0 }
0x12c6   :  { %4862 = shalt.err (!%p4859_p10)
}
0x12c7   :  { %s4863_s8 = scalar_lea.hbm %s6745_s9, 128 }
0x12c8   :  { %p4864_p11 = scmp.ne.s32.totalorder %s6745_s9, %s4863_s8  ;;  %p4867_p12 = scmp.lt.u32.totalorder %s4863_s8, %s6745_s9 }
0x12ca   :  { %p4869_p13 = pnand %p4867_p12, %p4864_p11 }
0x12cc   :  { %4872 = shalt.err (!%p4869_p13)
}
0x12cd   :  { %3730 = dma.vmem_to_hbm [thread:$0]  %s3728_s21, 128, %s6745_s9, [#allocation5]  }
0x12ce   :  { %4881 = dma.done.wait [#allocation5], 128  }
0x12cf   :  { %4882 = vsyncadd [#allocation5], 4294967168 }
0x12d0   :  { %3734 = vsyncpa [#allocation4], 1 }
0x12d1   :  { %3735 = vsyncpa [#allocation7], 1 }
0x12d2   :  { %3736 = vsyncpa [#allocation10], 1 }
0x12d3   :  { %3737 = vsyncpa [#allocation13], 1 }
0x12d4   :  { %3738 = vsyncpa [#allocation5], 1 }

</bundles_post_ra>
